<compile_context>
chip_gen: v7x
topology: tpu7x:2x2x1
jax: 0.10.0
libtpu: 0.0.40
codegen_flags: <defaults>
</compile_context>

<pallas_src>
import numpy as np
import jax
import jax.numpy as jnp
from jax.experimental import pallas as pl
from jax.experimental.pallas import tpu as pltpu

EPS = 1e-5


def _bn_train(y, gamma, beta):
    # BatchNorm2d in training mode: per-channel batch mean + biased variance.
    # One-pass statistics, all in f32. y: (P, C); gamma/beta: (1, C).
    inv_p = 1.0 / y.shape[0]
    mean = jnp.sum(y, axis=0, keepdims=True) * inv_p
    ex2 = jnp.sum(y * y, axis=0, keepdims=True) * inv_p
    var = jnp.maximum(ex2 - mean * mean, 0.0)
    return (y - mean) * (gamma * jax.lax.rsqrt(var + EPS)) + beta


def bottleneck_kernel(x_ref, w1s_ref, g1_ref, b1_ref,
                      w2_ref, g2_ref, b2_ref,
                      w3_ref, g3_ref, b3_ref,
                      gs_ref, bs_ref,
                      out_ref, pad_ref, tap_ref):
    N, H, W, Cin = x_ref.shape
    width = w2_ref.shape[1]
    Cout = w3_ref.shape[1]
    P = N * H * W

    xf = x_ref[...].reshape(P, Cin).astype(jnp.bfloat16)

    # ---- fused conv1 + shortcut (both 1x1, shared LHS, K=Cin): one MXU dot ---
    y1s = jnp.dot(xf, w1s_ref[...], preferred_element_type=jnp.float32)  # (P, width+Cout)
    y1 = jnp.maximum(_bn_train(y1s[:, :width], g1_ref[...], b1_ref[...]), 0.0)
    sc = _bn_train(y1s[:, width:], gs_ref[...], bs_ref[...])

    # ---- conv2: grouped 3x3, stride 1, pad 1 ---------------------------------
    # Zero only the 1-pixel halo (interior is overwritten next), fill interior,
    # gather the 9 spatial taps once into a bf16 (P, 9*width) staging buffer,
    # then contract against the stacked block-diagonal weight with ONE dot so
    # the accumulation over taps/groups happens inside the MXU.
    pad_ref[:, :, 0:1, :] = jnp.zeros((N, H + 2, 1, width), jnp.float32)
    pad_ref[:, :, W + 1:W + 2, :] = jnp.zeros((N, H + 2, 1, width), jnp.float32)
    pad_ref[:, 0:1, :, :] = jnp.zeros((N, 1, W + 2, width), jnp.float32)
    pad_ref[:, H + 1:H + 2, :, :] = jnp.zeros((N, 1, W + 2, width), jnp.float32)
    pad_ref[:, 1:H + 1, 1:W + 1, :] = y1.reshape(N, H, W, width)
    for t in range(9):  # static unrolled loop over (ky, kx): tap copies only, no adds
        dy, dx = t // 3, t % 3
        tap_ref[:, t * width:(t + 1) * width] = (
            pad_ref[:, dy:dy + H, dx:dx + W, :].reshape(P, width).astype(jnp.bfloat16))
    y2 = jnp.dot(tap_ref[...], w2_ref[...], preferred_element_type=jnp.float32)
    y2 = jnp.maximum(_bn_train(y2, g2_ref[...], b2_ref[...]), 0.0)

    # ---- conv3 (1x1) -> bn3 -> add shortcut -> relu --------------------------
    y3 = jnp.dot(y2.astype(jnp.bfloat16), w3_ref[...],
                 preferred_element_type=jnp.float32)
    y3 = _bn_train(y3, g3_ref[...], b3_ref[...])
    out_ref[...] = jnp.maximum(y3 + sc, 0.0).reshape(N, H, W, Cout)


def bottleneck_forward(x_nhwc, w1s, g1, b1, w2_stack, g2, b2, w3, g3, b3, gs, bs):
    N, H, W, Cin = x_nhwc.shape
    width = w2_stack.shape[1]
    Cout = w3.shape[1]
    P = N * H * W
    args = (x_nhwc, w1s, g1, b1, w2_stack, g2, b2, w3, g3, b3, gs, bs)
    # TODO(synk): for real ResNet spatial sizes (and v7x's 64 MiB VMEM / second
    # TensorCore) this should be tiled over P = N*H*W with a two-phase BatchNorm
    # reduction; the fully-VMEM-resident single invocation below is sized for the
    # small demo shapes.
    return pl.pallas_call(
        bottleneck_kernel,
        out_shape=jax.ShapeDtypeStruct((N, H, W, Cout), jnp.float32),
        in_specs=[pl.BlockSpec(memory_space=pltpu.MemorySpace.VMEM)] * len(args),
        out_specs=pl.BlockSpec(memory_space=pltpu.MemorySpace.VMEM),
        scratch_shapes=[pltpu.VMEM((N, H + 2, W + 2, width), jnp.float32),
                        pltpu.VMEM((P, 9 * width), jnp.bfloat16)],
    )(*args)


def reference_nchw(x, w1, w2, w3, ws, g1, b1, g2, b2, g3, b3, gs, bs, groups):
    # Pure-JAX reference of the PyTorch module (NCHW, training-mode BN, f32).
    def bn(y, g, b):
        mean = y.mean(axis=(0, 2, 3), keepdims=True)
        var = ((y - mean) ** 2).mean(axis=(0, 2, 3), keepdims=True)
        return (y - mean) / jnp.sqrt(var + EPS) * g.reshape(1, -1, 1, 1) + b.reshape(1, -1, 1, 1)

    def conv(y, w, fgc=1, pad=0):
        return jax.lax.conv_general_dilated(
            y, w, (1, 1), [(pad, pad), (pad, pad)],
            feature_group_count=fgc, dimension_numbers=("NCHW", "OIHW", "NCHW"))

    out = jax.nn.relu(bn(conv(x, w1), g1, b1))
    out = jax.nn.relu(bn(conv(out, w2, fgc=groups, pad=1), g2, b2))
    out = bn(conv(out, w3), g3, b3)
    sc = bn(conv(x, ws), gs, bs)
    return jax.nn.relu(out + sc)


if __name__ == "__main__":
    key = jax.random.PRNGKey(0)
    ks = jax.random.split(key, 13)

    N, Cin, H, W = 2, 64, 8, 8
    groups, wpg = 32, 4
    width = groups * wpg          # 128
    Cout = 256
    # TODO(synk): stride != 1 (strided conv2 + strided shortcut conv) is not implemented;
    # this kernel covers the stride=1 configuration (shortcut conv present since Cin != Cout).

    # Deterministic synthetic parameters (PyTorch shapes: OIHW conv weights).
    w1_oihw = (0.1 * jax.random.normal(ks[0], (width, Cin, 1, 1))).astype(jnp.float32)
    w2_oihw = (0.1 * jax.random.normal(ks[1], (width, wpg, 3, 3))).astype(jnp.float32)
    w3_oihw = (0.1 * jax.random.normal(ks[2], (Cout, width, 1, 1))).astype(jnp.float32)
    ws_oihw = (0.1 * jax.random.normal(ks[3], (Cout, Cin, 1, 1))).astype(jnp.float32)
    g1 = jax.random.uniform(ks[4], (1, width), minval=0.5, maxval=1.5).astype(jnp.float32)
    b1 = (0.1 * jax.random.normal(ks[5], (1, width))).astype(jnp.float32)
    g2 = jax.random.uniform(ks[6], (1, width), minval=0.5, maxval=1.5).astype(jnp.float32)
    b2 = (0.1 * jax.random.normal(ks[7], (1, width))).astype(jnp.float32)
    g3 = jax.random.uniform(ks[8], (1, Cout), minval=0.5, maxval=1.5).astype(jnp.float32)
    b3 = (0.1 * jax.random.normal(ks[9], (1, Cout))).astype(jnp.float32)
    gs = jax.random.uniform(ks[10], (1, Cout), minval=0.5, maxval=1.5).astype(jnp.float32)
    bs = (0.1 * jax.random.normal(ks[11], (1, Cout))).astype(jnp.float32)

    x_nchw = jax.random.normal(ks[12], (N, Cin, H, W), jnp.float32)

    # Repack weights for the channels-last matmul kernel (bf16 MXU operands).
    w1 = jnp.transpose(w1_oihw[:, :, 0, 0])     # (Cin, width)
    w3 = jnp.transpose(w3_oihw[:, :, 0, 0])     # (width, Cout)
    ws = jnp.transpose(ws_oihw[:, :, 0, 0])     # (Cin, Cout)
    w1s = jnp.concatenate([w1, ws], axis=1).astype(jnp.bfloat16)   # (Cin, width+Cout)
    w3 = w3.astype(jnp.bfloat16)

    # Grouped 3x3 weights -> stacked block-diagonal (9*width, width) matrix:
    # row block t = tap (ky, kx); within each block, group g occupies the
    # (wpg x wpg) diagonal sub-block.  Feeds the single K-concatenated dot.
    w2_np = np.asarray(w2_oihw)
    w2_stack = np.zeros((9 * width, width), np.float32)
    for t in range(9):
        ky, kx = t // 3, t % 3
        for g in range(groups):
            blk = w2_np[g * wpg:(g + 1) * wpg, :, ky, kx]   # (out/grp, in/grp)
            w2_stack[t * width + g * wpg:t * width + (g + 1) * wpg,
                     g * wpg:(g + 1) * wpg] = blk.T
    w2_stack = jnp.asarray(w2_stack, dtype=jnp.bfloat16)

    # Run the Pallas kernel (NHWC).
    x_nhwc = jnp.transpose(x_nchw, (0, 2, 3, 1))
    out_nhwc = bottleneck_forward(x_nhwc, w1s, g1, b1, w2_stack, g2, b2,
                                  w3, g3, b3, gs, bs)
    out_nhwc = jax.block_until_ready(out_nhwc)

    # Correctness check vs pure-JAX NCHW f32 reference.  bf16 MXU operands
    # (with f32 accumulation / f32 BN) introduce ~1% relative error vs f32.
    ref = reference_nchw(x_nchw, w1_oihw, w2_oihw, w3_oihw, ws_oihw,
                         g1, b1, g2, b2, g3, b3, gs, bs, groups)
    out_nchw = jnp.transpose(out_nhwc, (0, 3, 1, 2))
    np.testing.assert_allclose(np.asarray(out_nchw), np.asarray(ref), rtol=5e-2, atol=5e-2)

    print("KERNEL_OK")
</pallas_src>

<mosaic_0001>
module attributes {stable_mosaic.version = 11 : i64} {
  func.func @bottleneck_kernel(%arg0: memref<2x8x8x64xf32, #tpu.memory_space<vmem>>, %arg1: memref<64x384xbf16, #tpu.memory_space<vmem>>, %arg2: memref<1x128xf32, #tpu.memory_space<vmem>>, %arg3: memref<1x128xf32, #tpu.memory_space<vmem>>, %arg4: memref<1152x128xbf16, #tpu.memory_space<vmem>>, %arg5: memref<1x128xf32, #tpu.memory_space<vmem>>, %arg6: memref<1x128xf32, #tpu.memory_space<vmem>>, %arg7: memref<128x256xbf16, #tpu.memory_space<vmem>>, %arg8: memref<1x256xf32, #tpu.memory_space<vmem>>, %arg9: memref<1x256xf32, #tpu.memory_space<vmem>>, %arg10: memref<1x256xf32, #tpu.memory_space<vmem>>, %arg11: memref<1x256xf32, #tpu.memory_space<vmem>>, %arg12: memref<2x8x8x256xf32, #tpu.memory_space<vmem>>, %arg13: memref<2x10x10x128xf32, #tpu.memory_space<vmem>>, %arg14: memref<128x1152xbf16, #tpu.memory_space<vmem>>) attributes {dimension_semantics = [], scalar_prefetch = 0 : i64, scratch_operands = 2 : i64, tpu.core_type = #tpu.core_type<tc>} {
    %c0 = arith.constant 0 : index
    %c0_0 = arith.constant 0 : index
    %c0_1 = arith.constant 0 : index
    %c0_2 = arith.constant 0 : index
    %0 = vector.load %arg0[%c0, %c0_0, %c0_1, %c0_2] : memref<2x8x8x64xf32, #tpu.memory_space<vmem>>, vector<2x8x8x64xf32>
    %1 = vector.shape_cast %0 : vector<2x8x8x64xf32> to vector<128x64xf32>
    %2 = arith.truncf %1 : vector<128x64xf32> to vector<128x64xbf16>
    %c0_3 = arith.constant 0 : index
    %c0_4 = arith.constant 0 : index
    %3 = vector.load %arg1[%c0_3, %c0_4] : memref<64x384xbf16, #tpu.memory_space<vmem>>, vector<64x384xbf16>
    %cst = arith.constant dense<0.000000e+00> : vector<128x384xf32>
    %4 = tpu.matmul %2, %3, %cst {dimension_numbers = #tpu.dot_dimension_numbers<[1], [0], [0], [1], [0, 0, 1, 1], [], []>} : vector<128x64xbf16>, vector<64x384xbf16>, vector<128x384xf32> -> vector<128x384xf32>
    %5 = vector.extract_strided_slice %4 {offsets = [0, 0], sizes = [128, 128], strides = [1, 1]} : vector<128x384xf32> to vector<128x128xf32>
    %c0_5 = arith.constant 0 : index
    %c0_6 = arith.constant 0 : index
    %6 = vector.load %arg2[%c0_5, %c0_6] : memref<1x128xf32, #tpu.memory_space<vmem>>, vector<1x128xf32>
    %c0_7 = arith.constant 0 : index
    %c0_8 = arith.constant 0 : index
    %7 = vector.load %arg3[%c0_7, %c0_8] : memref<1x128xf32, #tpu.memory_space<vmem>>, vector<1x128xf32>
    %cst_9 = arith.constant dense<0.000000e+00> : vector<128xf32>
    %8 = vector.multi_reduction <add>, %5, %cst_9 [0] : vector<128x128xf32> to vector<128xf32>
    %9 = vector.shape_cast %8 : vector<128xf32> to vector<1x128xf32>
    %cst_10 = arith.constant 7.812500e-03 : f32
    %10 = vector.broadcast %cst_10 : f32 to vector<1x128xf32>
    %11 = arith.mulf %9, %10 : vector<1x128xf32>
    %12 = arith.mulf %5, %5 : vector<128x128xf32>
    %cst_11 = arith.constant dense<0.000000e+00> : vector<128xf32>
    %13 = vector.multi_reduction <add>, %12, %cst_11 [0] : vector<128x128xf32> to vector<128xf32>
    %14 = vector.shape_cast %13 : vector<128xf32> to vector<1x128xf32>
    %cst_12 = arith.constant 7.812500e-03 : f32
    %15 = vector.broadcast %cst_12 : f32 to vector<1x128xf32>
    %16 = arith.mulf %14, %15 : vector<1x128xf32>
    %17 = arith.mulf %11, %11 : vector<1x128xf32>
    %18 = arith.subf %16, %17 : vector<1x128xf32>
    %cst_13 = arith.constant 0.000000e+00 : f32
    %19 = vector.broadcast %cst_13 : f32 to vector<1x128xf32>
    %20 = arith.maximumf %18, %19 : vector<1x128xf32>
    %21 = vector.broadcast %11 : vector<1x128xf32> to vector<128x128xf32>
    %22 = arith.subf %5, %21 : vector<128x128xf32>
    %cst_14 = arith.constant 9.99999974E-6 : f32
    %23 = vector.broadcast %cst_14 : f32 to vector<1x128xf32>
    %24 = arith.addf %20, %23 : vector<1x128xf32>
    %25 = math.rsqrt %24 : vector<1x128xf32>
    %26 = arith.mulf %6, %25 : vector<1x128xf32>
    %27 = vector.broadcast %26 : vector<1x128xf32> to vector<128x128xf32>
    %28 = arith.mulf %22, %27 : vector<128x128xf32>
    %29 = vector.broadcast %7 : vector<1x128xf32> to vector<128x128xf32>
    %30 = arith.addf %28, %29 : vector<128x128xf32>
    %cst_15 = arith.constant 0.000000e+00 : f32
    %31 = vector.broadcast %cst_15 : f32 to vector<128x128xf32>
    %32 = arith.maximumf %30, %31 : vector<128x128xf32>
    %33 = vector.extract_strided_slice %4 {offsets = [0, 128], sizes = [128, 256], strides = [1, 1]} : vector<128x384xf32> to vector<128x256xf32>
    %c0_16 = arith.constant 0 : index
    %c0_17 = arith.constant 0 : index
    %34 = vector.load %arg10[%c0_16, %c0_17] : memref<1x256xf32, #tpu.memory_space<vmem>>, vector<1x256xf32>
    %c0_18 = arith.constant 0 : index
    %c0_19 = arith.constant 0 : index
    %35 = vector.load %arg11[%c0_18, %c0_19] : memref<1x256xf32, #tpu.memory_space<vmem>>, vector<1x256xf32>
    %cst_20 = arith.constant dense<0.000000e+00> : vector<256xf32>
    %36 = vector.multi_reduction <add>, %33, %cst_20 [0] : vector<128x256xf32> to vector<256xf32>
    %37 = vector.shape_cast %36 : vector<256xf32> to vector<1x256xf32>
    %cst_21 = arith.constant 7.812500e-03 : f32
    %38 = vector.broadcast %cst_21 : f32 to vector<1x256xf32>
    %39 = arith.mulf %37, %38 : vector<1x256xf32>
    %40 = arith.mulf %33, %33 : vector<128x256xf32>
    %cst_22 = arith.constant dense<0.000000e+00> : vector<256xf32>
    %41 = vector.multi_reduction <add>, %40, %cst_22 [0] : vector<128x256xf32> to vector<256xf32>
    %42 = vector.shape_cast %41 : vector<256xf32> to vector<1x256xf32>
    %cst_23 = arith.constant 7.812500e-03 : f32
    %43 = vector.broadcast %cst_23 : f32 to vector<1x256xf32>
    %44 = arith.mulf %42, %43 : vector<1x256xf32>
    %45 = arith.mulf %39, %39 : vector<1x256xf32>
    %46 = arith.subf %44, %45 : vector<1x256xf32>
    %cst_24 = arith.constant 0.000000e+00 : f32
    %47 = vector.broadcast %cst_24 : f32 to vector<1x256xf32>
    %48 = arith.maximumf %46, %47 : vector<1x256xf32>
    %49 = vector.broadcast %39 : vector<1x256xf32> to vector<128x256xf32>
    %50 = arith.subf %33, %49 : vector<128x256xf32>
    %cst_25 = arith.constant 9.99999974E-6 : f32
    %51 = vector.broadcast %cst_25 : f32 to vector<1x256xf32>
    %52 = arith.addf %48, %51 : vector<1x256xf32>
    %53 = math.rsqrt %52 : vector<1x256xf32>
    %54 = arith.mulf %34, %53 : vector<1x256xf32>
    %55 = vector.broadcast %54 : vector<1x256xf32> to vector<128x256xf32>
    %56 = arith.mulf %50, %55 : vector<128x256xf32>
    %57 = vector.broadcast %35 : vector<1x256xf32> to vector<128x256xf32>
    %58 = arith.addf %56, %57 : vector<128x256xf32>
    %cst_26 = arith.constant 0.000000e+00 : f32
    %59 = vector.broadcast %cst_26 : f32 to vector<2x10x1x128xf32>
    %c0_27 = arith.constant 0 : index
    %c0_28 = arith.constant 0 : index
    %c0_29 = arith.constant 0 : index
    %c0_30 = arith.constant 0 : index
    %60 = vector.load %arg13[%c0_27, %c0_28, %c0_29, %c0_30] : memref<2x10x10x128xf32, #tpu.memory_space<vmem>>, vector<2x10x1x128xf32>
    tpu.vector_store %arg13[%c0_27, %c0_28, %c0_29, %c0_30], %59 {strides = array<i32>} : memref<2x10x10x128xf32, #tpu.memory_space<vmem>>, vector<2x10x1x128xf32>,
    %cst_31 = arith.constant 0.000000e+00 : f32
    %61 = vector.broadcast %cst_31 : f32 to vector<2x10x1x128xf32>
    %c0_32 = arith.constant 0 : index
    %c0_33 = arith.constant 0 : index
    %c9 = arith.constant 9 : index
    %c0_34 = arith.constant 0 : index
    %62 = vector.load %arg13[%c0_32, %c0_33, %c9, %c0_34] : memref<2x10x10x128xf32, #tpu.memory_space<vmem>>, vector<2x10x1x128xf32>
    tpu.vector_store %arg13[%c0_32, %c0_33, %c9, %c0_34], %61 {strides = array<i32>} : memref<2x10x10x128xf32, #tpu.memory_space<vmem>>, vector<2x10x1x128xf32>,
    %cst_35 = arith.constant 0.000000e+00 : f32
    %63 = vector.broadcast %cst_35 : f32 to vector<2x1x10x128xf32>
    %c0_36 = arith.constant 0 : index
    %c0_37 = arith.constant 0 : index
    %c0_38 = arith.constant 0 : index
    %c0_39 = arith.constant 0 : index
    %64 = vector.load %arg13[%c0_36, %c0_37, %c0_38, %c0_39] : memref<2x10x10x128xf32, #tpu.memory_space<vmem>>, vector<2x1x10x128xf32>
    tpu.vector_store %arg13[%c0_36, %c0_37, %c0_38, %c0_39], %63 {strides = array<i32>} : memref<2x10x10x128xf32, #tpu.memory_space<vmem>>, vector<2x1x10x128xf32>,
    %cst_40 = arith.constant 0.000000e+00 : f32
    %65 = vector.broadcast %cst_40 : f32 to vector<2x1x10x128xf32>
    %c0_41 = arith.constant 0 : index
    %c9_42 = arith.constant 9 : index
    %c0_43 = arith.constant 0 : index
    %c0_44 = arith.constant 0 : index
    %66 = vector.load %arg13[%c0_41, %c9_42, %c0_43, %c0_44] : memref<2x10x10x128xf32, #tpu.memory_space<vmem>>, vector<2x1x10x128xf32>
    tpu.vector_store %arg13[%c0_41, %c9_42, %c0_43, %c0_44], %65 {strides = array<i32>} : memref<2x10x10x128xf32, #tpu.memory_space<vmem>>, vector<2x1x10x128xf32>,
    %67 = vector.shape_cast %32 : vector<128x128xf32> to vector<2x8x8x128xf32>
    %c0_45 = arith.constant 0 : index
    %c1 = arith.constant 1 : index
    %c1_46 = arith.constant 1 : index
    %c0_47 = arith.constant 0 : index
    %68 = vector.load %arg13[%c0_45, %c1, %c1_46, %c0_47] : memref<2x10x10x128xf32, #tpu.memory_space<vmem>>, vector<2x8x8x128xf32>
    tpu.vector_store %arg13[%c0_45, %c1, %c1_46, %c0_47], %67 {strides = array<i32>} : memref<2x10x10x128xf32, #tpu.memory_space<vmem>>, vector<2x8x8x128xf32>,
    %c0_48 = arith.constant 0 : index
    %c0_49 = arith.constant 0 : index
    %c0_50 = arith.constant 0 : index
    %c0_51 = arith.constant 0 : index
    %69 = vector.load %arg13[%c0_48, %c0_49, %c0_50, %c0_51] : memref<2x10x10x128xf32, #tpu.memory_space<vmem>>, vector<2x8x8x128xf32>
    %70 = vector.shape_cast %69 : vector<2x8x8x128xf32> to vector<128x128xf32>
    %71 = arith.truncf %70 : vector<128x128xf32> to vector<128x128xbf16>
    %c0_52 = arith.constant 0 : index
    %c0_53 = arith.constant 0 : index
    %72 = vector.load %arg14[%c0_52, %c0_53] : memref<128x1152xbf16, #tpu.memory_space<vmem>>, vector<128x128xbf16>
    tpu.vector_store %arg14[%c0_52, %c0_53], %71 {strides = array<i32>} : memref<128x1152xbf16, #tpu.memory_space<vmem>>, vector<128x128xbf16>,
    %c0_54 = arith.constant 0 : index
    %c0_55 = arith.constant 0 : index
    %c1_56 = arith.constant 1 : index
    %c0_57 = arith.constant 0 : index
    %73 = vector.load %arg13[%c0_54, %c0_55, %c1_56, %c0_57] : memref<2x10x10x128xf32, #tpu.memory_space<vmem>>, vector<2x8x8x128xf32>
    %74 = vector.shape_cast %73 : vector<2x8x8x128xf32> to vector<128x128xf32>
    %75 = arith.truncf %74 : vector<128x128xf32> to vector<128x128xbf16>
    %c0_58 = arith.constant 0 : index
    %c128 = arith.constant 128 : index
    %76 = vector.load %arg14[%c0_58, %c128] : memref<128x1152xbf16, #tpu.memory_space<vmem>>, vector<128x128xbf16>
    tpu.vector_store %arg14[%c0_58, %c128], %75 {strides = array<i32>} : memref<128x1152xbf16, #tpu.memory_space<vmem>>, vector<128x128xbf16>,
    %c0_59 = arith.constant 0 : index
    %c0_60 = arith.constant 0 : index
    %c2 = arith.constant 2 : index
    %c0_61 = arith.constant 0 : index
    %77 = vector.load %arg13[%c0_59, %c0_60, %c2, %c0_61] : memref<2x10x10x128xf32, #tpu.memory_space<vmem>>, vector<2x8x8x128xf32>
    %78 = vector.shape_cast %77 : vector<2x8x8x128xf32> to vector<128x128xf32>
    %79 = arith.truncf %78 : vector<128x128xf32> to vector<128x128xbf16>
    %c0_62 = arith.constant 0 : index
    %c256 = arith.constant 256 : index
    %80 = vector.load %arg14[%c0_62, %c256] : memref<128x1152xbf16, #tpu.memory_space<vmem>>, vector<128x128xbf16>
    tpu.vector_store %arg14[%c0_62, %c256], %79 {strides = array<i32>} : memref<128x1152xbf16, #tpu.memory_space<vmem>>, vector<128x128xbf16>,
    %c0_63 = arith.constant 0 : index
    %c1_64 = arith.constant 1 : index
    %c0_65 = arith.constant 0 : index
    %c0_66 = arith.constant 0 : index
    %81 = vector.load %arg13[%c0_63, %c1_64, %c0_65, %c0_66] : memref<2x10x10x128xf32, #tpu.memory_space<vmem>>, vector<2x8x8x128xf32>
    %82 = vector.shape_cast %81 : vector<2x8x8x128xf32> to vector<128x128xf32>
    %83 = arith.truncf %82 : vector<128x128xf32> to vector<128x128xbf16>
    %c0_67 = arith.constant 0 : index
    %c384 = arith.constant 384 : index
    %84 = vector.load %arg14[%c0_67, %c384] : memref<128x1152xbf16, #tpu.memory_space<vmem>>, vector<128x128xbf16>
    tpu.vector_store %arg14[%c0_67, %c384], %83 {strides = array<i32>} : memref<128x1152xbf16, #tpu.memory_space<vmem>>, vector<128x128xbf16>,
    %c0_68 = arith.constant 0 : index
    %c1_69 = arith.constant 1 : index
    %c1_70 = arith.constant 1 : index
    %c0_71 = arith.constant 0 : index
    %85 = vector.load %arg13[%c0_68, %c1_69, %c1_70, %c0_71] : memref<2x10x10x128xf32, #tpu.memory_space<vmem>>, vector<2x8x8x128xf32>
    %86 = vector.shape_cast %85 : vector<2x8x8x128xf32> to vector<128x128xf32>
    %87 = arith.truncf %86 : vector<128x128xf32> to vector<128x128xbf16>
    %c0_72 = arith.constant 0 : index
    %c512 = arith.constant 512 : index
    %88 = vector.load %arg14[%c0_72, %c512] : memref<128x1152xbf16, #tpu.memory_space<vmem>>, vector<128x128xbf16>
    tpu.vector_store %arg14[%c0_72, %c512], %87 {strides = array<i32>} : memref<128x1152xbf16, #tpu.memory_space<vmem>>, vector<128x128xbf16>,
    %c0_73 = arith.constant 0 : index
    %c1_74 = arith.constant 1 : index
    %c2_75 = arith.constant 2 : index
    %c0_76 = arith.constant 0 : index
    %89 = vector.load %arg13[%c0_73, %c1_74, %c2_75, %c0_76] : memref<2x10x10x128xf32, #tpu.memory_space<vmem>>, vector<2x8x8x128xf32>
    %90 = vector.shape_cast %89 : vector<2x8x8x128xf32> to vector<128x128xf32>
    %91 = arith.truncf %90 : vector<128x128xf32> to vector<128x128xbf16>
    %c0_77 = arith.constant 0 : index
    %c640 = arith.constant 640 : index
    %92 = vector.load %arg14[%c0_77, %c640] : memref<128x1152xbf16, #tpu.memory_space<vmem>>, vector<128x128xbf16>
    tpu.vector_store %arg14[%c0_77, %c640], %91 {strides = array<i32>} : memref<128x1152xbf16, #tpu.memory_space<vmem>>, vector<128x128xbf16>,
    %c0_78 = arith.constant 0 : index
    %c2_79 = arith.constant 2 : index
    %c0_80 = arith.constant 0 : index
    %c0_81 = arith.constant 0 : index
    %93 = vector.load %arg13[%c0_78, %c2_79, %c0_80, %c0_81] : memref<2x10x10x128xf32, #tpu.memory_space<vmem>>, vector<2x8x8x128xf32>
    %94 = vector.shape_cast %93 : vector<2x8x8x128xf32> to vector<128x128xf32>
    %95 = arith.truncf %94 : vector<128x128xf32> to vector<128x128xbf16>
    %c0_82 = arith.constant 0 : index
    %c768 = arith.constant 768 : index
    %96 = vector.load %arg14[%c0_82, %c768] : memref<128x1152xbf16, #tpu.memory_space<vmem>>, vector<128x128xbf16>
    tpu.vector_store %arg14[%c0_82, %c768], %95 {strides = array<i32>} : memref<128x1152xbf16, #tpu.memory_space<vmem>>, vector<128x128xbf16>,
    %c0_83 = arith.constant 0 : index
    %c2_84 = arith.constant 2 : index
    %c1_85 = arith.constant 1 : index
    %c0_86 = arith.constant 0 : index
    %97 = vector.load %arg13[%c0_83, %c2_84, %c1_85, %c0_86] : memref<2x10x10x128xf32, #tpu.memory_space<vmem>>, vector<2x8x8x128xf32>
    %98 = vector.shape_cast %97 : vector<2x8x8x128xf32> to vector<128x128xf32>
    %99 = arith.truncf %98 : vector<128x128xf32> to vector<128x128xbf16>
    %c0_87 = arith.constant 0 : index
    %c896 = arith.constant 896 : index
    %100 = vector.load %arg14[%c0_87, %c896] : memref<128x1152xbf16, #tpu.memory_space<vmem>>, vector<128x128xbf16>
    tpu.vector_store %arg14[%c0_87, %c896], %99 {strides = array<i32>} : memref<128x1152xbf16, #tpu.memory_space<vmem>>, vector<128x128xbf16>,
    %c0_88 = arith.constant 0 : index
    %c2_89 = arith.constant 2 : index
    %c2_90 = arith.constant 2 : index
    %c0_91 = arith.constant 0 : index
    %101 = vector.load %arg13[%c0_88, %c2_89, %c2_90, %c0_91] : memref<2x10x10x128xf32, #tpu.memory_space<vmem>>, vector<2x8x8x128xf32>
    %102 = vector.shape_cast %101 : vector<2x8x8x128xf32> to vector<128x128xf32>
    %103 = arith.truncf %102 : vector<128x128xf32> to vector<128x128xbf16>
    %c0_92 = arith.constant 0 : index
    %c1024 = arith.constant 1024 : index
    %104 = vector.load %arg14[%c0_92, %c1024] : memref<128x1152xbf16, #tpu.memory_space<vmem>>, vector<128x128xbf16>
    tpu.vector_store %arg14[%c0_92, %c1024], %103 {strides = array<i32>} : memref<128x1152xbf16, #tpu.memory_space<vmem>>, vector<128x128xbf16>,
    %c0_93 = arith.constant 0 : index
    %c0_94 = arith.constant 0 : index
    %105 = vector.load %arg14[%c0_93, %c0_94] : memref<128x1152xbf16, #tpu.memory_space<vmem>>, vector<128x1152xbf16>
    %c0_95 = arith.constant 0 : index
    %c0_96 = arith.constant 0 : index
    %106 = vector.load %arg4[%c0_95, %c0_96] : memref<1152x128xbf16, #tpu.memory_space<vmem>>, vector<1152x128xbf16>
    %cst_97 = arith.constant dense<0.000000e+00> : vector<128x128xf32>
    %107 = tpu.matmul %105, %106, %cst_97 {dimension_numbers = #tpu.dot_dimension_numbers<[1], [0], [0], [1], [0, 0, 1, 1], [], []>} : vector<128x1152xbf16>, vector<1152x128xbf16>, vector<128x128xf32> -> vector<128x128xf32>
    %c0_98 = arith.constant 0 : index
    %c0_99 = arith.constant 0 : index
    %108 = vector.load %arg5[%c0_98, %c0_99] : memref<1x128xf32, #tpu.memory_space<vmem>>, vector<1x128xf32>
    %c0_100 = arith.constant 0 : index
    %c0_101 = arith.constant 0 : index
    %109 = vector.load %arg6[%c0_100, %c0_101] : memref<1x128xf32, #tpu.memory_space<vmem>>, vector<1x128xf32>
    %cst_102 = arith.constant dense<0.000000e+00> : vector<128xf32>
    %110 = vector.multi_reduction <add>, %107, %cst_102 [0] : vector<128x128xf32> to vector<128xf32>
    %111 = vector.shape_cast %110 : vector<128xf32> to vector<1x128xf32>
    %cst_103 = arith.constant 7.812500e-03 : f32
    %112 = vector.broadcast %cst_103 : f32 to vector<1x128xf32>
    %113 = arith.mulf %111, %112 : vector<1x128xf32>
    %114 = arith.mulf %107, %107 : vector<128x128xf32>
    %cst_104 = arith.constant dense<0.000000e+00> : vector<128xf32>
    %115 = vector.multi_reduction <add>, %114, %cst_104 [0] : vector<128x128xf32> to vector<128xf32>
    %116 = vector.shape_cast %115 : vector<128xf32> to vector<1x128xf32>
    %cst_105 = arith.constant 7.812500e-03 : f32
    %117 = vector.broadcast %cst_105 : f32 to vector<1x128xf32>
    %118 = arith.mulf %116, %117 : vector<1x128xf32>
    %119 = arith.mulf %113, %113 : vector<1x128xf32>
    %120 = arith.subf %118, %119 : vector<1x128xf32>
    %cst_106 = arith.constant 0.000000e+00 : f32
    %121 = vector.broadcast %cst_106 : f32 to vector<1x128xf32>
    %122 = arith.maximumf %120, %121 : vector<1x128xf32>
    %123 = vector.broadcast %113 : vector<1x128xf32> to vector<128x128xf32>
    %124 = arith.subf %107, %123 : vector<128x128xf32>
    %cst_107 = arith.constant 9.99999974E-6 : f32
    %125 = vector.broadcast %cst_107 : f32 to vector<1x128xf32>
    %126 = arith.addf %122, %125 : vector<1x128xf32>
    %127 = math.rsqrt %126 : vector<1x128xf32>
    %128 = arith.mulf %108, %127 : vector<1x128xf32>
    %129 = vector.broadcast %128 : vector<1x128xf32> to vector<128x128xf32>
    %130 = arith.mulf %124, %129 : vector<128x128xf32>
    %131 = vector.broadcast %109 : vector<1x128xf32> to vector<128x128xf32>
    %132 = arith.addf %130, %131 : vector<128x128xf32>
    %cst_108 = arith.constant 0.000000e+00 : f32
    %133 = vector.broadcast %cst_108 : f32 to vector<128x128xf32>
    %134 = arith.maximumf %132, %133 : vector<128x128xf32>
    %135 = arith.truncf %134 : vector<128x128xf32> to vector<128x128xbf16>
    %c0_109 = arith.constant 0 : index
    %c0_110 = arith.constant 0 : index
    %136 = vector.load %arg7[%c0_109, %c0_110] : memref<128x256xbf16, #tpu.memory_space<vmem>>, vector<128x256xbf16>
    %cst_111 = arith.constant dense<0.000000e+00> : vector<128x256xf32>
    %137 = tpu.matmul %135, %136, %cst_111 {dimension_numbers = #tpu.dot_dimension_numbers<[1], [0], [0], [1], [0, 0, 1, 1], [], []>} : vector<128x128xbf16>, vector<128x256xbf16>, vector<128x256xf32> -> vector<128x256xf32>
    %c0_112 = arith.constant 0 : index
    %c0_113 = arith.constant 0 : index
    %138 = vector.load %arg8[%c0_112, %c0_113] : memref<1x256xf32, #tpu.memory_space<vmem>>, vector<1x256xf32>
    %c0_114 = arith.constant 0 : index
    %c0_115 = arith.constant 0 : index
    %139 = vector.load %arg9[%c0_114, %c0_115] : memref<1x256xf32, #tpu.memory_space<vmem>>, vector<1x256xf32>
    %cst_116 = arith.constant dense<0.000000e+00> : vector<256xf32>
    %140 = vector.multi_reduction <add>, %137, %cst_116 [0] : vector<128x256xf32> to vector<256xf32>
    %141 = vector.shape_cast %140 : vector<256xf32> to vector<1x256xf32>
    %cst_117 = arith.constant 7.812500e-03 : f32
    %142 = vector.broadcast %cst_117 : f32 to vector<1x256xf32>
    %143 = arith.mulf %141, %142 : vector<1x256xf32>
    %144 = arith.mulf %137, %137 : vector<128x256xf32>
    %cst_118 = arith.constant dense<0.000000e+00> : vector<256xf32>
    %145 = vector.multi_reduction <add>, %144, %cst_118 [0] : vector<128x256xf32> to vector<256xf32>
    %146 = vector.shape_cast %145 : vector<256xf32> to vector<1x256xf32>
    %cst_119 = arith.constant 7.812500e-03 : f32
    %147 = vector.broadcast %cst_119 : f32 to vector<1x256xf32>
    %148 = arith.mulf %146, %147 : vector<1x256xf32>
    %149 = arith.mulf %143, %143 : vector<1x256xf32>
    %150 = arith.subf %148, %149 : vector<1x256xf32>
    %cst_120 = arith.constant 0.000000e+00 : f32
    %151 = vector.broadcast %cst_120 : f32 to vector<1x256xf32>
    %152 = arith.maximumf %150, %151 : vector<1x256xf32>
    %153 = vector.broadcast %143 : vector<1x256xf32> to vector<128x256xf32>
    %154 = arith.subf %137, %153 : vector<128x256xf32>
    %cst_121 = arith.constant 9.99999974E-6 : f32
    %155 = vector.broadcast %cst_121 : f32 to vector<1x256xf32>
    %156 = arith.addf %152, %155 : vector<1x256xf32>
    %157 = math.rsqrt %156 : vector<1x256xf32>
    %158 = arith.mulf %138, %157 : vector<1x256xf32>
    %159 = vector.broadcast %158 : vector<1x256xf32> to vector<128x256xf32>
    %160 = arith.mulf %154, %159 : vector<128x256xf32>
    %161 = vector.broadcast %139 : vector<1x256xf32> to vector<128x256xf32>
    %162 = arith.addf %160, %161 : vector<128x256xf32>
    %163 = arith.addf %162, %58 : vector<128x256xf32>
    %cst_122 = arith.constant 0.000000e+00 : f32
    %164 = vector.broadcast %cst_122 : f32 to vector<128x256xf32>
    %165 = arith.maximumf %163, %164 : vector<128x256xf32>
    %166 = vector.shape_cast %165 : vector<128x256xf32> to vector<2x8x8x256xf32>
    %c0_123 = arith.constant 0 : index
    %c0_124 = arith.constant 0 : index
    %c0_125 = arith.constant 0 : index
    %c0_126 = arith.constant 0 : index
    %167 = vector.load %arg12[%c0_123, %c0_124, %c0_125, %c0_126] : memref<2x8x8x256xf32, #tpu.memory_space<vmem>>, vector<2x8x8x256xf32>
    tpu.vector_store %arg12[%c0_123, %c0_124, %c0_125, %c0_126], %166 {strides = array<i32>} : memref<2x8x8x256xf32, #tpu.memory_space<vmem>>, vector<2x8x8x256xf32>,
    return
  }
}

</mosaic_0001>

<bundles_post_ra>
// kernel: tpu_custom_call.1
= control target key start
LH: loop header
LB: loop body
LE: loop exit
PB: predicated region body
PF: predicated region fallthrough
CT: control target
= control target key end

     0   :  { %17 = vsyncpa [#allocation5], 0  ;;  %s5639_s0 = inlined_call_operand.hbm [shape: f32[2,8,8,64], index: 0, kind: input, shape index: {}]   ;;  %s5640_s1 = inlined_call_operand.hbm [shape: bf16[64,384], index: 1, kind: input, shape index: {}]   ;;  %s5641_s2 = inlined_call_operand.vmem [shape: f32[1,128], index: 2, kind: input, shape index: {}]   ;;  %s5642_s3 = inlined_call_operand.vmem [shape: f32[1,128], index: 3, kind: input, shape index: {}]   ;;  %s5643_s4 = inlined_call_operand.hbm [shape: bf16[1152,128], index: 4, kind: input, shape index: {}]   ;;  %s5644_s5 = inlined_call_operand.vmem [shape: f32[1,128], index: 5, kind: input, shape index: {}]   ;;  %s5645_s6 = inlined_call_operand.vmem [shape: f32[1,128], index: 6, kind: input, shape index: {}]   ;;  %s5646_s7 = inlined_call_operand.hbm [shape: bf16[128,256], index: 7, kind: input, shape index: {}]   ;;  %s5647_s8 = inlined_call_operand.vmem [shape: f32[1,256], index: 8, kind: input, shape index: {}]   ;;  %s5648_s9 = inlined_call_operand.vmem [shape: f32[1,256], index: 9, kind: input, shape index: {}]   ;;  %s5649_s10 = inlined_call_operand.vmem [shape: f32[1,256], index: 10, kind: input, shape index: {}]   ;;  %s5650_s11 = inlined_call_operand.vmem [shape: f32[1,256], index: 11, kind: input, shape index: {}]   ;;  %s5651_s12 = inlined_call_operand.hbm [shape: f32[2,8,8,256], index: 12, kind: output, shape index: {}]  }
   0x1   :  { %18 = vsyncpa [#allocation8], 0 }
   0x2   :  { %19 = vsyncpa [#allocation11], 0 }
   0x3   :  { %20 = vsyncpa [#allocation6], 0  ;;  %s3809_s21 = smov [#allocation7]   ;;  %s3691_s25 = scalar_lea.hbm %s5640_s1, 1536 }
   0x4   :  { %s38_s22 = sshll.u32 %s3809_s21, 4  ;;  %p3692_p0 = scmp.ne.s32.totalorder %s5640_s1, %s3691_s25  ;;  %s39_s22 = int_to_ptr.vmem [resolvable:$true] %s38_s22 }
   0x5   :  { %p3695_p1 = scmp.lt.u32.totalorder %s3691_s25, %s5640_s1 }
   0x7   :  { %p3697_p2 = pnand %p3695_p1, %p3692_p0 }
   0x9   :  { %3700 = shalt.err (!%p3697_p2)
}
   0xa   :  { %s3701_s30 = scalar_lea.vmem %s39_s22, 1536  ;;  %p3706_p4 = scmp.lt.s32.totalorder %s39_s22, %s39_s22 }
   0xb   :  { %p3702_p3 = scmp.ne.s32.totalorder %s39_s22, %s3701_s30  ;;  %p3707_p5 = scmp.lt.s32.totalorder %s3701_s30, %s3701_s30 }
   0xd   :  { %p3708_p6 = por %p3707_p5, %p3706_p4 }
   0xf   :  { %p3709_p7 = pnand %p3708_p6, %p3702_p3 }
  0x11   :  { %3712 = shalt.err (!%p3709_p7)
}
  0x12   :  { %s3810_s13 = smov 192   ;;  %s3811_s14 = smov 12  }
  0x13   :  { %44 = dma.hbm_to_vmem [thread:$0]  %s5640_s1, 1536, %s39_s22, [#allocation8], %s3810_s13, %s3810_s13, %s3811_s14  }
  0x14   :  { %s3812_s17 = smov [#allocation4]   ;;  %s3713_s21 = scalar_lea.hbm %s5639_s0, 2048 }
  0x15   :  { %s26_s18 = sshll.u32 %s3812_s17, 4  ;;  %p3714_p8 = scmp.ne.s32.totalorder %s5639_s0, %s3713_s21  ;;  %s27_s18 = int_to_ptr.vmem [resolvable:$true] %s26_s18 }
  0x16   :  { %p3717_p9 = scmp.lt.u32.totalorder %s3713_s21, %s5639_s0 }
  0x18   :  { %p3719_p10 = pnand %p3717_p9, %p3714_p8 }
  0x1a   :  { %3722 = shalt.err (!%p3719_p10)
}
  0x1b   :  { %s3723_s27 = scalar_lea.vmem %s27_s18, 2048  ;;  %p3728_p12 = scmp.lt.s32.totalorder %s27_s18, %s27_s18 }
  0x1c   :  { %p3724_p11 = scmp.ne.s32.totalorder %s27_s18, %s3723_s27  ;;  %p3729_p13 = scmp.lt.s32.totalorder %s3723_s27, %s3723_s27 }
  0x1e   :  { %p3730_p0 = por %p3729_p13, %p3728_p12 }
  0x20   :  { %p3731_p1 = pnand %p3730_p0, %p3724_p11 }
  0x22   :  { %3734 = shalt.err (!%p3731_p1)
}
  0x23   :  { %s3813_s1 = smov 128   ;;  %s3814_s22 = smov 8  }
  0x24   :  { %32 = dma.hbm_to_vmem [thread:$0]  %s5639_s0, 2048, %s27_s18, [#allocation5], %s3813_s1, %s3813_s1, %s3814_s22  }
  0x25   :  { %s3815_s30 = smov [#allocation9]   ;;  %s3735_s16 = scalar_lea.hbm %s5643_s4, 9216 }
  0x26   :  { %s54_s13 = sshll.u32 %s3815_s30, 4  ;;  %p3736_p2 = scmp.ne.s32.totalorder %s5643_s4, %s3735_s16  ;;  %s55_s13 = int_to_ptr.vmem [resolvable:$true] %s54_s13 }
  0x27   :  { %p3739_p3 = scmp.lt.u32.totalorder %s3735_s16, %s5643_s4 }
  0x29   :  { %p3741_p4 = pnand %p3739_p3, %p3736_p2 }
  0x2b   :  { %3744 = shalt.err (!%p3741_p4)
}
  0x2c   :  { %s3745_s23 = scalar_lea.vmem %s55_s13, 9216  ;;  %p3750_p6 = scmp.lt.s32.totalorder %s55_s13, %s55_s13 }
  0x2d   :  { %p3746_p5 = scmp.ne.s32.totalorder %s55_s13, %s3745_s23  ;;  %p3751_p7 = scmp.lt.s32.totalorder %s3745_s23, %s3745_s23 }
  0x2f   :  { %p3752_p8 = por %p3751_p7, %p3750_p6 }
  0x31   :  { %p3753_p9 = pnand %p3752_p8, %p3746_p5 }
  0x33   :  { %3756 = shalt.err (!%p3753_p9)
}
  0x34   :  { %s3816_s0 = smov 64   ;;  %s3817_s18 = smov 4  }
  0x35   :  { %60 = dma.hbm_to_vmem [thread:$0]  %s5643_s4, 9216, %s55_s13, [#allocation8], %s3816_s0, %s3816_s0, %s3817_s18  }
  0x36   :  { %s3818_s26 = smov [#allocation10]   ;;  %s3757_s30 = scalar_lea.hbm %s5646_s7, 2048 }
  0x37   :  { %s70_s27 = sshll.u32 %s3818_s26, 4  ;;  %p3758_p10 = scmp.ne.s32.totalorder %s5646_s7, %s3757_s30  ;;  %s71_s27 = int_to_ptr.vmem [resolvable:$true] %s70_s27 }
  0x38   :  { %p3761_p11 = scmp.lt.u32.totalorder %s3757_s30, %s5646_s7 }
  0x3a   :  { %p3763_p12 = pnand %p3761_p11, %p3758_p10 }
  0x3c   :  { %3766 = shalt.err (!%p3763_p12)
}
  0x3d   :  { %s3767_s19 = scalar_lea.vmem %s71_s27, 2048  ;;  %p3772_p0 = scmp.lt.s32.totalorder %s71_s27, %s71_s27 }
  0x3e   :  { %p3768_p13 = scmp.ne.s32.totalorder %s71_s27, %s3767_s19  ;;  %p3773_p1 = scmp.lt.s32.totalorder %s3767_s19, %s3767_s19 }
  0x40   :  { %p3774_p2 = por %p3773_p1, %p3772_p0 }
  0x42   :  { %p3775_p3 = pnand %p3774_p2, %p3768_p13 }
  0x44   :  { %3778 = shalt.err (!%p3775_p3)
}
  0x45   :  { %76 = dma.hbm_to_vmem [thread:$0]  %s5646_s7, 2048, %s71_s27, [#allocation11], %s3813_s1, %s3813_s1, %s3814_s22  }
  0x46   :  { %3801 = dma.done.wait [#allocation5], 2048  }
  0x47   :  { %3802 = vsyncadd [#allocation5], 4294965248 }
  0x48   :  { %3803 = dma.done.wait [#allocation8], 10752  }
  0x49   :  { %3804 = vsyncadd [#allocation8], 4294956544 }
  0x4a   :  { %3805 = dma.done.wait [#allocation11], 2048  }
  0x4b   :  { %3806 = vsyncadd [#allocation11], 4294965248  ;;  %v5652_v0 = vmov 0   ;;  %v3565_v1 = vld [vmem:[#allocation7 + $0x4] ss:$12 sps:$4 sm:$0xff]   ;;  %v99_v10 = vld [vmem:[#allocation4 + $0x8] sm:$0xff] }
  0x4c   :  { %259 = vmatprep.mubr.bf16.mxu0 %v5652_v0  ;;  %299 = vmatprep.mubr.bf16.mxu1 %v5652_v0  ;;  %v3567_v2 = vld [vmem:[#allocation7] ss:$12 sps:$4 sm:$0xff]   ;;  %v3568_v3 = vld [vmem:[#allocation7 + $0x1c] ss:$12 sps:$4 sm:$0xff]   ;;  %v3570_v4 = vld [vmem:[#allocation7 + $0x18] ss:$12 sps:$4 sm:$0xff]  }
  0x4d   :  { %227 = vmatprep.subr.bf16.mxu0 %v3565_v1  ;;  %3541 = vmatprep.subr.bf16.mxu1 %v3565_v1  ;;  %v3571_v5 = vld [vmem:[#allocation7 + $0x34] ss:$12 sps:$4 sm:$0xff]   ;;  %v3573_v6 = vld [vmem:[#allocation7 + $0x30] ss:$12 sps:$4 sm:$0xff]   ;;  %v3574_v7 = vld [vmem:[#allocation7 + $0x4c] ss:$12 sps:$4 sm:$0xff]  }
  0x4e   :  { %228 = vmatpush1.bf16.msra.mxu0 %v3567_v2  ;;  %3545 = vmatpush1.bf16.msra.mxu1 %v3567_v2  ;;  %v3576_v8 = vld [vmem:[#allocation7 + $0x48] ss:$12 sps:$4 sm:$0xff]   ;;  %v98_v9 = vld [vmem:[#allocation4] sm:$0xff]  ;;  %vm202_vm0 = vcmask 523264   ;;  %v101_v18 = vld [vmem:[#allocation4 + $0x18] sm:$0xff]  ;;  %v5654_v53 = vmov 0.0  }
  0x4f   :  { %229 = vmatprep.subr.bf16.mxu0 %v3568_v3  ;;  %3542 = vmatprep.subr.bf16.mxu1 %v3568_v3  ;;  %v106_v11 = vld [vmem:[#allocation4 + $0x40] sm:$0xff]  ;;  %v107_v12 = vld [vmem:[#allocation4 + $0x48] sm:$0xff]  ;;  %v114_v14 = vpack.c.bf16 %v99_v10, %v98_v9  ;;  %v100_v17 = vld [vmem:[#allocation4 + $0x10] sm:$0xff]  ;;  %850 = vst [vmem:[#allocation2] sm:$0x1] %v5654_v53 }
  0x50   :  { %v3577_v13 = vld [vmem:[#allocation7 + $0x8] ss:$12 sps:$4 sm:$0xff]   ;;  %v118_v15 = vpack.c.bf16 %v107_v12, %v106_v11  ;;  %v3578_v16 = vld [vmem:[#allocation7 + $0x20] ss:$12 sps:$4 sm:$0xff]   ;;  %v109_v20 = vld [vmem:[#allocation4 + $0x58] sm:$0xff]  ;;  %v115_v22 = vpack.c.bf16 %v101_v18, %v100_v17  ;;  %890 = vst [vmem:[#allocation2] sm:$0xff] %v5654_v53 }
  0x51   :  { %v108_v19 = vld [vmem:[#allocation4 + $0x50] sm:$0xff]  ;;  %v3579_v21 = vld [vmem:[#allocation7 + $0x38] ss:$12 sps:$4 sm:$0xff]   ;;  %v103_v26 = vld [vmem:[#allocation4 + $0x28] sm:$0xff]  ;;  %870 = vst [vmem:[#allocation2 + $0x9] sm:$0x1] %v5654_v53 }
  0x52   :  { %230 = vmatpush1.bf16.msra.mxu0 %v3570_v4  ;;  %3546 = vmatpush1.bf16.msra.mxu1 %v3570_v4  ;;  %v119_v23 = vpack.c.bf16 %v109_v20, %v108_v19  ;;  %v3580_v24 = vld [vmem:[#allocation7 + $0x50] ss:$12 sps:$4 sm:$0xff]   ;;  %v102_v25 = vld [vmem:[#allocation4 + $0x20] sm:$0xff]  ;;  %v111_v28 = vld [vmem:[#allocation4 + $0x68] sm:$0xff]  ;;  %851 = vst [vmem:[#allocation2 + $0x10] sm:$0x1] %v5654_v53 }
  0x53   :  { %231 = vmatprep.subr.bf16.mxu0 %v3571_v5  ;;  %3543 = vmatprep.subr.bf16.mxu1 %v3571_v5  ;;  %v110_v27 = vld [vmem:[#allocation4 + $0x60] sm:$0xff]  ;;  %v116_v29 = vpack.c.bf16 %v103_v26, %v102_v25  ;;  %v104_v31 = vld [vmem:[#allocation4 + $0x30] sm:$0xff]  ;;  %v105_v32 = vld [vmem:[#allocation4 + $0x38] sm:$0xff]  ;;  %852 = vst [vmem:[#allocation2 + $0x20] sm:$0x1] %v5654_v53 }
  0x54   :  { %v120_v30 = vpack.c.bf16 %v111_v28, %v110_v27  ;;  %v112_v33 = vld [vmem:[#allocation4 + $0x70] sm:$0xff]  ;;  %v113_v34 = vld [vmem:[#allocation4 + $0x78] sm:$0xff]  ;;  %v117_v35 = vpack.c.bf16 %v105_v32, %v104_v31  ;;  %v3581_v37 = vld [vmem:[#allocation9 + $0x40] sm:$0xff]   ;;  %853 = vst [vmem:[#allocation2 + $0x30] sm:$0x1] %v5654_v53 }
  0x55   :  { %v121_v36 = vpack.c.bf16 %v113_v34, %v112_v33  ;;  %v3582_v38 = vld [vmem:[#allocation9] sm:$0xff]   ;;  %v3585_v41 = vld [vmem:[#allocation9 + $0x48] sm:$0xff]   ;;  %v3589_v45 = vld [vmem:[#allocation9 + $0x50] sm:$0xff]   ;;  %854 = vst [vmem:[#allocation2 + $0x40] sm:$0x1] %v5654_v53 }
  0x56   :  { %232 = vmatpush1.bf16.msra.mxu0 %v3573_v6  ;;  %3547 = vmatpush1.bf16.msra.mxu1 %v3573_v6  ;;  %v3583_v39 = vld [vmem:[#allocation9 + $0xc0] sm:$0xff]   ;;  %v3586_v42 = vld [vmem:[#allocation9 + $0x8] sm:$0xff]   ;;  %v3590_v46 = vld [vmem:[#allocation9 + $0x10] sm:$0xff]   ;;  %855 = vst [vmem:[#allocation2 + $0x50] sm:$0x1] %v5654_v53 }
  0x57   :  { %233 = vmatprep.subr.bf16.mxu0 %v3574_v7  ;;  %3544 = vmatprep.subr.bf16.mxu1 %v3574_v7  ;;  %v3584_v40 = vld [vmem:[#allocation9 + $0x80] sm:$0xff]   ;;  %v3587_v43 = vld [vmem:[#allocation9 + $0xc8] sm:$0xff]   ;;  %v3591_v47 = vld [vmem:[#allocation9 + $0xd0] sm:$0xff]   ;;  %856 = vst [vmem:[#allocation2 + $0x60] sm:$0x1] %v5654_v53 }
  0x58   :  { %v3588_v44 = vld [vmem:[#allocation9 + $0x88] sm:$0xff]   ;;  %v3592_v48 = vld [vmem:[#allocation9 + $0x90] sm:$0xff]   ;;  %v3593_v49 = vld [vmem:[#allocation9 + $0x58] sm:$0xff]   ;;  %857 = vst [vmem:[#allocation2 + $0x70] sm:$0x1] %v5654_v53 }
  0x59   :  { %v3594_v50 = vld [vmem:[#allocation9 + $0x18] sm:$0xff]   ;;  %858 = vst [vmem:[#allocation2 + $0x80] sm:$0x1] %v5654_v53  ;;  %861 = vst [vmem:[#allocation2 + $0xb0] sm:$0x1] %v5654_v53  ;;  %v3597_v54 = vld [vmem:[#allocation9 + $0x60] sm:$0xff]  }
  0x5a   :  { %234 = vmatpush1.bf16.msra.mxu0 %v3576_v8  ;;  %3548 = vmatpush1.bf16.msra.mxu1 %v3576_v8  ;;  %v3595_v51 = vld [vmem:[#allocation9 + $0xd8] sm:$0xff]   ;;  %862 = vst [vmem:[#allocation2 + $0xc0] sm:$0x1] %v5654_v53  ;;  %863 = vst [vmem:[#allocation2 + $0xd0] sm:$0x1] %v5654_v53  ;;  %v3598_v55 = vld [vmem:[#allocation9 + $0x20] sm:$0xff]  }
  0x5b   :  { %3485 = vmatprep.subr.bf16.mxu1 %v3577_v13  ;;  %3277 = vmatprep.subr.bf16.mxu0 %v3583_v39  ;;  %v3596_v52 = vld [vmem:[#allocation9 + $0x98] sm:$0xff]   ;;  %864 = vst [vmem:[#allocation2 + $0xe0] sm:$0x1] %v5654_v53  ;;  %865 = vst [vmem:[#allocation2 + $0xf0] sm:$0x1] %v5654_v53  ;;  %v3599_v56 = vld [vmem:[#allocation9 + $0xe0] sm:$0xff]  }
  0x5c   :  { %866 = vst [vmem:[#allocation2 + $0x100] sm:$0x1] %v5654_v53  ;;  %867 = vst [vmem:[#allocation2 + $0x110] sm:$0x1] %v5654_v53  ;;  %v3600_v57 = vld [vmem:[#allocation9 + $0xa0] sm:$0xff]   ;;  %v3601_v58 = vld [vmem:[#allocation9 + $0x68] sm:$0xff]  }
  0x5d   :  { %3095 = vmatmul.mubr.msk.bf16.vlgmr.msra.gmra.mrb[0].mxu0 %vm202_vm0, %v114_v14  ;;  %3099 = vmatmul.mubr.msk.bf16.vlgmr.msra.gmra.mrb[0].mxu1 %vm202_vm0, %v118_v15  ;;  %868 = vst [vmem:[#allocation2 + $0x120] sm:$0x1] %v5654_v53  ;;  %871 = vst [vmem:[#allocation2 + $0x19] sm:$0x1] %v5654_v53  ;;  %v3602_v59 = vld [vmem:[#allocation9 + $0x28] sm:$0xff]   ;;  %v3605_v62 = vld [vmem:[#allocation9 + $0x70] sm:$0xff]  }
  0x5e   :  { %269 = vmatprep.mubr.bf16.mxu0 %v5652_v0  ;;  %309 = vmatprep.mubr.bf16.mxu1 %v5652_v0  ;;  %872 = vst [vmem:[#allocation2 + $0x29] sm:$0x1] %v5654_v53  ;;  %873 = vst [vmem:[#allocation2 + $0x39] sm:$0x1] %v5654_v53  ;;  %v3603_v60 = vld [vmem:[#allocation9 + $0xe8] sm:$0xff]   ;;  %v3606_v63 = vld [vmem:[#allocation9 + $0x30] sm:$0xff]  }
  0x5f   :  { %3486 = vmatpush3.bf16.msra.mxu1 %v3577_v13  ;;  %3278 = vmatpush3.bf16.msra.mxu0 %v3584_v40  ;;  %874 = vst [vmem:[#allocation2 + $0x49] sm:$0x1] %v5654_v53  ;;  %875 = vst [vmem:[#allocation2 + $0x59] sm:$0x1] %v5654_v53  ;;  %v3604_v61 = vld [vmem:[#allocation9 + $0xa8] sm:$0xff]   ;;  %v3607_v1 = vld [vmem:[#allocation9 + $0xf0] sm:$0xff]  }
  0x60   :  { %3487 = vmatprep.subr.bf16.mxu1 %v3578_v16  ;;  %3279 = vmatprep.subr.bf16.mxu0 %v3587_v43  ;;  %876 = vst [vmem:[#allocation2 + $0x69] sm:$0x1] %v5654_v53  ;;  %877 = vst [vmem:[#allocation2 + $0x79] sm:$0x1] %v5654_v53  ;;  %v3608_v2 = vld [vmem:[#allocation9 + $0xb0] sm:$0xff]   ;;  %v3609_v3 = vld [vmem:[#allocation9 + $0x78] sm:$0xff]  }
  0x61   :  { %878 = vst [vmem:[#allocation2 + $0x89] sm:$0x1] %v5654_v53  ;;  %879 = vst [vmem:[#allocation2 + $0x99] sm:$0x1] %v5654_v53  ;;  %v3610_v4 = vld [vmem:[#allocation9 + $0x38] sm:$0xff]   ;;  %v3613_v7 = vld [vmem:[#allocation9 + $0x140] sm:$0xff]  }
  0x62   :  { %880 = vst [vmem:[#allocation2 + $0xa9] sm:$0x1] %v5654_v53  ;;  %881 = vst [vmem:[#allocation2 + $0xb9] sm:$0x1] %v5654_v53  ;;  %v3611_v5 = vld [vmem:[#allocation9 + $0xf8] sm:$0xff]   ;;  %v3622_v12 = vld [vmem:[#allocation9 + $0x1c0] sm:$0xff]  }
  0x63   :  { %3488 = vmatpush3.bf16.msra.mxu1 %v3578_v16  ;;  %3280 = vmatpush3.bf16.msra.mxu0 %v3588_v44  ;;  %882 = vst [vmem:[#allocation2 + $0xc9] sm:$0x1] %v5654_v53  ;;  %883 = vst [vmem:[#allocation2 + $0xd9] sm:$0x1] %v5654_v53  ;;  %v3612_v6 = vld [vmem:[#allocation9 + $0xb8] sm:$0xff]  }
  0x64   :  { %3489 = vmatprep.subr.bf16.mxu1 %v3579_v21  ;;  %3281 = vmatprep.subr.bf16.mxu0 %v3591_v47  ;;  %884 = vst [vmem:[#allocation2 + $0xe9] sm:$0x1] %v5654_v53  ;;  %885 = vst [vmem:[#allocation2 + $0xf9] sm:$0x1] %v5654_v53 }
  0x65   :  { %3096 = vmatmul.mubr.msk.bf16.gmra.mrb[4].mxu0 %vm202_vm0, %v115_v22  ;;  %3100 = vmatmul.mubr.msk.bf16.gmra.mrb[4].mxu1 %vm202_vm0, %v119_v23  ;;  %886 = vst [vmem:[#allocation2 + $0x109] sm:$0x1] %v5654_v53  ;;  %887 = vst [vmem:[#allocation2 + $0x119] sm:$0x1] %v5654_v53 }
  0x66   :  { %279 = vmatprep.mubr.bf16.mxu0 %v5652_v0  ;;  %319 = vmatprep.mubr.bf16.mxu1 %v5652_v0  ;;  %888 = vst [vmem:[#allocation2 + $0x129] sm:$0x1] %v5654_v53  ;;  %889 = vst [vmem:[#allocation2 + $0x139] sm:$0x1] %v5654_v53 }
  0x67   :  { %3490 = vmatpush3.bf16.msra.mxu1 %v3579_v21  ;;  %3282 = vmatpush3.bf16.msra.mxu0 %v3592_v48  ;;  %891 = vst [vmem:[#allocation2 + $0x8] sm:$0x3] %v5654_v53  ;;  %892 = vst [vmem:[#allocation2 + $0xa0] sm:$0xff] %v5654_v53 }
  0x68   :  { %3491 = vmatprep.subr.bf16.mxu1 %v3580_v24  ;;  %3283 = vmatprep.subr.bf16.mxu0 %v3595_v51  ;;  %893 = vst [vmem:[#allocation2 + $0xa8] sm:$0x3] %v5654_v53  ;;  %895 = vst [vmem:[#allocation2 + $0x90] sm:$0xff] %v5654_v53 }
  0x69   :  { %896 = vst [vmem:[#allocation2 + $0x98] sm:$0x3] %v5654_v53  ;;  %897 = vst [vmem:[#allocation2 + $0x130] sm:$0xff] %v5654_v53 }
  0x6a   :  { %898 = vst [vmem:[#allocation2 + $0x138] sm:$0x3] %v5654_v53 }
  0x6b   :  { %3492 = vmatpush3.bf16.msra.mxu1 %v3580_v24  ;;  %3284 = vmatpush3.bf16.msra.mxu0 %v3596_v52 }
  0x6c   :  { %3213 = vmatprep.subr.bf16.mxu1 %v3581_v37  ;;  %3285 = vmatprep.subr.bf16.mxu0 %v3599_v56 }
  0x6d   :  { %3097 = vmatmul.mubr.msk.bf16.gmra.mrb[8].mxu0 %vm202_vm0, %v116_v29  ;;  %3101 = vmatmul.mubr.msk.bf16.gmra.mrb[8].mxu1 %vm202_vm0, %v120_v30 }
  0x6e   :  { %289 = vmatprep.mubr.bf16.mxu0 %v5652_v0  ;;  %329 = vmatprep.mubr.bf16.mxu1 %v5652_v0 }
  0x6f   :  { %3286 = vmatpush3.bf16.msra.mxu0 %v3600_v57 }
  0x70   :  { %3287 = vmatprep.subr.bf16.mxu0 %v3603_v60 }
  0x73   :  { %3288 = vmatpush3.bf16.msra.mxu0 %v3604_v61 }
  0x74   :  { %3289 = vmatprep.subr.bf16.mxu0 %v3607_v1 }
  0x75   :  { %3098 = vmatmul.mubr.msk.bf16.gmra.mrb[12].mxu0 %vm202_vm0, %v117_v35  ;;  %3102 = vmatmul.mubr.msk.bf16.gmra.mrb[12].mxu1 %vm202_vm0, %v121_v36 }
  0x76   :  { %3493 = vmatprep.mubr.msk.bf16.mxu1 %vm202_vm0, %v114_v14 }
  0x77   :  { %3290 = vmatpush3.bf16.msra.mxu0 %v3608_v2 }
  0x78   :  { %3291 = vmatprep.subr.bf16.mxu0 %v3611_v5 }
  0x7b   :  { %3292 = vmatpush3.bf16.msra.mxu0 %v3612_v6 }
  0x7c   :  { %3405 = vmatprep.subr.bf16.mxu0 %v3622_v12 }
  0x7d   :  { %3494 = vmatmul.mubr.msk.bf16.vlgmr.msra.gmra.mrb[16].mxu1 %vm202_vm0, %v115_v22 }
  0x7e   :  { %3497 = vmatprep.mubr.msk.bf16.mxu1 %vm202_vm0, %v116_v29  ;;  %3214 = vmatpush3.bf16.msra.mxu1 %v3582_v38 }
  0x7f   :  { %3215 = vmatprep.subr.bf16.mxu1 %v3585_v41 }
  0x82   :  { %3216 = vmatpush3.bf16.msra.mxu1 %v3586_v42 }
  0x83   :  { %3217 = vmatprep.subr.bf16.mxu1 %v3589_v45 }
  0x85   :  { %3498 = vmatmul.mubr.msk.bf16.gmra.mrb[20].mxu1 %vm202_vm0, %v117_v35 }
  0x86   :  { %3501 = vmatprep.mubr.msk.bf16.mxu1 %vm202_vm0, %v118_v15  ;;  %3218 = vmatpush3.bf16.msra.mxu1 %v3590_v46 }
  0x87   :  { %3219 = vmatprep.subr.bf16.mxu1 %v3593_v49 }
  0x8a   :  { %3220 = vmatpush3.bf16.msra.mxu1 %v3594_v50 }
  0x8b   :  { %3221 = vmatprep.subr.bf16.mxu1 %v3597_v54 }
  0x8d   :  { %3502 = vmatmul.mubr.msk.bf16.gmra.mrb[24].mxu1 %vm202_vm0, %v119_v23 }
  0x8e   :  { %3505 = vmatprep.mubr.msk.bf16.mxu1 %vm202_vm0, %v120_v30  ;;  %3222 = vmatpush3.bf16.msra.mxu1 %v3598_v55 }
  0x8f   :  { %3223 = vmatprep.subr.bf16.mxu1 %v3601_v58 }
  0x92   :  { %3224 = vmatpush3.bf16.msra.mxu1 %v3602_v59 }
  0x93   :  { %3225 = vmatprep.subr.bf16.mxu1 %v3605_v62 }
  0x95   :  { %3506 = vmatmul.mubr.msk.bf16.gmra.mrb[28].mxu1 %vm202_vm0, %v121_v36 }
  0x96   :  { %3226 = vmatpush3.bf16.msra.mxu1 %v3606_v63 }
  0x97   :  { %3227 = vmatprep.subr.bf16.mxu1 %v3609_v3 }
  0x9a   :  { %3228 = vmatpush3.bf16.msra.mxu1 %v3610_v4 }
  0x9b   :  { %3341 = vmatprep.subr.bf16.mxu1 %v3613_v7 }
 0x130   :  { %v4013_v8 = vpop.f32.mrb[0].mxu0  ;;  %v4015_v9 = vpop.f32.mrb[0].mxu1 }
 0x131   :  { %v4017_v10 = vpop.f32.mrb[1].mxu0  ;;  %v4019_v11 = vpop.f32.mrb[1].mxu1  ;;  %v461_v15 = vmul.f32 %v4013_v8, %v4013_v8 }
 0x132   :  { %v4021_v13 = vpop.f32.mrb[2].mxu0  ;;  %v4023_v14 = vpop.f32.mrb[2].mxu1  ;;  %v627_v20 = vmul.f32 %v4017_v10, %v4017_v10 }
 0x133   :  { %v439_v16 = vadd.f32 %v4021_v13, %v4013_v8  ;;  %v462_v17 = vmul.f32 %v4021_v13, %v4021_v13  ;;  %v4031_v18 = vpop.f32.mrb[3].mxu0  ;;  %v4033_v19 = vpop.f32.mrb[3].mxu1 }
 0x134   :  { %v583_v21 = vadd.f32 %v4031_v18, %v4017_v10  ;;  %v629_v22 = vmul.f32 %v4031_v18, %v4031_v18 }
 0x135   :  { %v477_v23 = vadd.f32 %v462_v17, %v461_v15 }
 0x136   :  { %v659_v24 = vadd.f32 %v629_v22, %v627_v20 }
 0x138   :  { %v4041_v25 = vpop.f32.mrb[4].mxu0  ;;  %v4043_v26 = vpop.f32.mrb[4].mxu1 }
 0x139   :  { %v440_v27 = vadd.f32 %v439_v16, %v4041_v25  ;;  %v463_v28 = vmul.f32 %v4041_v25, %v4041_v25  ;;  %v4048_v29 = vpop.f32.mrb[5].mxu0  ;;  %v4050_v30 = vpop.f32.mrb[5].mxu1 }
 0x13a   :  { %v584_v31 = vadd.f32 %v583_v21, %v4048_v29  ;;  %v631_v32 = vmul.f32 %v4048_v29, %v4048_v29  ;;  %v4055_v33 = vpop.f32.mrb[6].mxu0  ;;  %v4057_v34 = vpop.f32.mrb[6].mxu1 }
 0x13b   :  { %v478_v35 = vadd.f32 %v477_v23, %v463_v28  ;;  %v441_v36 = vadd.f32 %v440_v27, %v4055_v33  ;;  %v464_v37 = vmul.f32 %v4055_v33, %v4055_v33  ;;  %v4062_v38 = vpop.f32.mrb[7].mxu0  ;;  %v4064_v39 = vpop.f32.mrb[7].mxu1 }
 0x13c   :  { %v660_v40 = vadd.f32 %v659_v24, %v631_v32  ;;  %v585_v41 = vadd.f32 %v584_v31, %v4062_v38  ;;  %v633_v42 = vmul.f32 %v4062_v38, %v4062_v38 }
 0x13d   :  { %v479_v43 = vadd.f32 %v478_v35, %v464_v37  ;;  %v469_v35 = vmul.f32 %v4015_v9, %v4015_v9 }
 0x13e   :  { %v661_v44 = vadd.f32 %v660_v40, %v633_v42  ;;  %v643_v40 = vmul.f32 %v4019_v11, %v4019_v11 }
 0x140   :  { %v4069_v45 = vpop.f32.mrb[8].mxu0  ;;  %v4071_v46 = vpop.f32.mrb[8].mxu1 }
 0x141   :  { %v442_v47 = vadd.f32 %v441_v36, %v4069_v45  ;;  %v465_v48 = vmul.f32 %v4069_v45, %v4069_v45  ;;  %v4076_v49 = vpop.f32.mrb[9].mxu0  ;;  %v4078_v50 = vpop.f32.mrb[9].mxu1 }
 0x142   :  { %5690 = vst [vmem:[#allocation17_spill] sm:$0xff] %v4078_v50  ;;  %v586_v51 = vadd.f32 %v585_v41, %v4076_v49  ;;  %v635_v52 = vmul.f32 %v4076_v49, %v4076_v49  ;;  %v4083_v54 = vpop.f32.mrb[10].mxu0  ;;  %v4085_v55 = vpop.f32.mrb[10].mxu1  ;;  %v470_v41 = vmul.f32 %v4023_v14, %v4023_v14 }
 0x143   :  { %v480_v56 = vadd.f32 %v479_v43, %v465_v48  ;;  %v443_v57 = vadd.f32 %v442_v47, %v4083_v54  ;;  %v466_v58 = vmul.f32 %v4083_v54, %v4083_v54  ;;  %v4090_v59 = vpop.f32.mrb[11].mxu0  ;;  %v4092_v60 = vpop.f32.mrb[11].mxu1  ;;  %v471_v47 = vmul.f32 %v4043_v26, %v4043_v26 }
 0x144   :  { %5691 = vst [vmem:[#allocation18_spill] sm:$0xff] %v4092_v60  ;;  %v662_v61 = vadd.f32 %v661_v44, %v635_v52  ;;  %v587_v62 = vadd.f32 %v586_v51, %v4090_v59  ;;  %v637_v63 = vmul.f32 %v4090_v59, %v4090_v59  ;;  %v645_v44 = vmul.f32 %v4033_v19, %v4033_v19 }
 0x145   :  { %v481_v1 = vadd.f32 %v480_v56, %v466_v58  ;;  %v647_v52 = vmul.f32 %v4050_v30, %v4050_v30  ;;  %v472_v56 = vmul.f32 %v4057_v34, %v4057_v34 }
 0x146   :  { %v663_v2 = vadd.f32 %v662_v61, %v637_v63  ;;  %v473_v63 = vmul.f32 %v4071_v46, %v4071_v46 }
 0x148   :  { %v4097_v3 = vpop.f32.mrb[12].mxu0  ;;  %v4099_v4 = vpop.f32.mrb[12].mxu1 }
 0x149   :  { %v444_v5 = vadd.f32 %v443_v57, %v4097_v3  ;;  %v467_v6 = vmul.f32 %v4097_v3, %v4097_v3  ;;  %v4104_v7 = vpop.f32.mrb[13].mxu0  ;;  %v4106_v12 = vpop.f32.mrb[13].mxu1 }
 0x14a   :  { %5692 = vst [vmem:[#allocation19_spill] sm:$0xff] %v4106_v12  ;;  %v588_v15 = vadd.f32 %v587_v62, %v4104_v7  ;;  %v639_v16 = vmul.f32 %v4104_v7, %v4104_v7  ;;  %v4111_v17 = vpop.f32.mrb[14].mxu0  ;;  %v4113_v20 = vpop.f32.mrb[14].mxu1  ;;  %v649_v62 = vmul.f32 %v4064_v39, %v4064_v39 }
 0x14b   :  { %v482_v21 = vadd.f32 %v481_v1, %v467_v6  ;;  %v445_v22 = vadd.f32 %v444_v5, %v4111_v17  ;;  %v468_v23 = vmul.f32 %v4111_v17, %v4111_v17  ;;  %v4118_v24 = vpop.f32.mrb[15].mxu0  ;;  %v4120_v27 = vpop.f32.mrb[15].mxu1  ;;  %v651_v6 = vmul.f32 %v4078_v50, %v4078_v50 }
 0x14c   :  { %5693 = vst [vmem:[#allocation20_spill] sm:$0xff] %v4120_v27  ;;  %v664_v28 = vadd.f32 %v663_v2, %v639_v16  ;;  %v589_v31 = vadd.f32 %v588_v15, %v4118_v24  ;;  %v641_v32 = vmul.f32 %v4118_v24, %v4118_v24 }
 0x14d   :  { %v446_v36 = vadd.f32 %v445_v22, %v4015_v9  ;;  %v483_v37 = vadd.f32 %v482_v21, %v468_v23 }
 0x14e   :  { %v590_v42 = vadd.f32 %v589_v31, %v4019_v11  ;;  %v665_v43 = vadd.f32 %v664_v28, %v641_v32  ;;  %v474_v28 = vmul.f32 %v4085_v55, %v4085_v55 }
 0x14f   :  { %v447_v48 = vadd.f32 %v446_v36, %v4023_v14  ;;  %v484_v51 = vadd.f32 %v483_v37, %v469_v35 }
 0x150   :  { %v591_v57 = vadd.f32 %v590_v42, %v4033_v19  ;;  %v666_v58 = vadd.f32 %v665_v43, %v643_v40  ;;  %v4143_v61 = vpop.f32.mrb[16].mxu1 }
 0x151   :  { %v485_v1 = vadd.f32 %v484_v51, %v470_v41  ;;  %v448_v2 = vadd.f32 %v447_v48, %v4043_v26  ;;  %v4150_v5 = vpop.f32.mrb[17].mxu1  ;;  %v632_v32 = vmul.f32 %v4143_v61, %v4143_v61 }
 0x152   :  { %v667_v15 = vadd.f32 %v666_v58, %v645_v44  ;;  %v592_v16 = vadd.f32 %v591_v57, %v4050_v30  ;;  %v628_v21 = vmul.f32 %v4150_v5, %v4150_v5  ;;  %v4157_v22 = vpop.f32.mrb[18].mxu1  ;;  %v653_v44 = vmul.f32 %v4092_v60, %v4092_v60 }
 0x153   :  { %v449_v23 = vadd.f32 %v448_v2, %v4057_v34  ;;  %v486_v31 = vadd.f32 %v485_v1, %v471_v47  ;;  %v4164_v35 = vpop.f32.mrb[19].mxu1  ;;  %v475_v47 = vmul.f32 %v4099_v4, %v4099_v4  ;;  %v655_v2 = vmul.f32 %v4106_v12, %v4106_v12 }
 0x154   :  { %v593_v36 = vadd.f32 %v592_v16, %v4064_v39  ;;  %v668_v37 = vadd.f32 %v667_v15, %v647_v52  ;;  %v604_v40 = vadd.f32 %v4164_v35, %v4150_v5  ;;  %v630_v41 = vmul.f32 %v4164_v35, %v4164_v35 }
 0x155   :  { %v450_v42 = vadd.f32 %v449_v23, %v4071_v46  ;;  %v487_v43 = vadd.f32 %v486_v31, %v472_v56  ;;  %v634_v56 = vmul.f32 %v4157_v22, %v4157_v22 }
 0x156   :  { %v594_v48 = vadd.f32 %v593_v36, %v4078_v50  ;;  %v669_v51 = vadd.f32 %v668_v37, %v649_v62  ;;  %v605_v52 = vadd.f32 %v4143_v61, %v604_v40  ;;  %v680_v57 = vadd.f32 %v630_v41, %v628_v21 }
 0x157   :  { %v451_v58 = vadd.f32 %v450_v42, %v4085_v55  ;;  %v488_v1 = vadd.f32 %v487_v43, %v473_v63  ;;  %v476_v63 = vmul.f32 %v4113_v20, %v4113_v20 }
 0x158   :  { %v595_v15 = vadd.f32 %v594_v48, %v4092_v60  ;;  %v670_v16 = vadd.f32 %v669_v51, %v651_v6  ;;  %v681_v23 = vadd.f32 %v680_v57, %v632_v32  ;;  %v4184_v31 = vpop.f32.mrb[20].mxu1  ;;  %v606_v62 = vadd.f32 %v4157_v22, %v605_v52 }
 0x159   :  { %v489_v36 = vadd.f32 %v488_v1, %v474_v28  ;;  %v452_v21 = vadd.f32 %v451_v58, %v4099_v4  ;;  %v4190_v37 = vpop.f32.mrb[21].mxu1  ;;  %v657_v48 = vmul.f32 %v4120_v27, %v4120_v27 }
 0x15a   :  { %5694 = vst [vmem:[#allocation21_spill] sm:$0xff] %v4190_v37  ;;  %v671_v40 = vadd.f32 %v670_v16, %v653_v44  ;;  %v596_v41 = vadd.f32 %v595_v15, %v4106_v12  ;;  %v607_v42 = vadd.f32 %v606_v62, %v4190_v37  ;;  %v636_v6 = vmul.f32 %v4190_v37, %v4190_v37  ;;  %v4196_v32 = vpop.f32.mrb[22].mxu1 }
 0x15b   :  { %5695 = vst [vmem:[#allocation22_spill] sm:$0xff] %v4196_v32  ;;  %v490_v43 = vadd.f32 %v489_v36, %v475_v47  ;;  %v453_v28 = vadd.f32 %v452_v21, %v4113_v20  ;;  %v682_v51 = vadd.f32 %v681_v23, %v634_v56  ;;  %v4201_v52 = vpop.f32.mrb[23].mxu1  ;;  %v640_v47 = vmul.f32 %v4184_v31, %v4184_v31 }
 0x15c   :  { %5696 = vst [vmem:[#allocation23_spill] sm:$0xff] %v4201_v52  ;;  %v672_v57 = vadd.f32 %v671_v40, %v655_v2  ;;  %v597_v44 = vadd.f32 %v596_v41, %v4120_v27  ;;  %v608_v58 = vadd.f32 %v607_v42, %v4201_v52  ;;  %v638_v1 = vmul.f32 %v4201_v52, %v4201_v52 }
 0x15d   :  { %v454_v15 = vrot.slane %v453_v28, 4  ;;  %v491_v16 = vadd.f32 %v490_v43, %v476_v63  ;;  %v683_v62 = vadd.f32 %v682_v51, %v636_v6  ;;  %v642_v2 = vmul.f32 %v4196_v32, %v4196_v32 }
 0x15e   :  { %v598_v36 = vrot.slane %v597_v44, 4  ;;  %v673_v21 = vadd.f32 %v672_v57, %v657_v48  ;;  %v609_v56 = vadd.f32 %v4184_v31, %v608_v58 }
 0x15f   :  { %v455_v23 = vadd.f32 %v454_v15, %v453_v28  ;;  %v492_v0 = vrot.slane %v491_v16, 4  ;;  %v684_v40 = vadd.f32 %v683_v62, %v638_v1 }
 0x160   :  { %v599_v41 = vadd.f32 %v598_v36, %v597_v44  ;;  %v674_v42 = vrot.slane %v673_v21, 4  ;;  %v4212_v53 = vpop.f32.mrb[24].mxu1  ;;  %v610_v63 = vadd.f32 %v4196_v32, %v609_v56 }
 0x161   :  { %v456_v43 = vrot.slane %v455_v23, 2  ;;  %v493_v52 = vadd.f32 %v492_v0, %v491_v16  ;;  %v685_v37 = vadd.f32 %v684_v40, %v640_v47  ;;  %v4215_v6 = vpop.f32.mrb[25].mxu1  ;;  %v648_v40 = vmul.f32 %v4212_v53, %v4212_v53 }
 0x162   :  { %5697 = vst [vmem:[#allocation24_spill] sm:$0xff] %v4215_v6  ;;  %v600_v48 = vrot.slane %v599_v41, 2  ;;  %v675_v51 = vadd.f32 %v674_v42, %v673_v21  ;;  %v611_v28 = vadd.f32 %v610_v63, %v4215_v6  ;;  %v644_v57 = vmul.f32 %v4215_v6, %v4215_v6  ;;  %v4220_v58 = vpop.f32.mrb[26].mxu1 }
 0x163   :  { %v457_v44 = vadd.f32 %v456_v43, %v455_v23  ;;  %v494_v1 = vrot.slane %v493_v52, 2  ;;  %v686_v15 = vadd.f32 %v685_v37, %v642_v2  ;;  %v4222_v62 = vpop.f32.mrb[27].mxu1 }
 0x164   :  { %5698 = vst [vmem:[#allocation25_spill] sm:$0xff] %v4222_v62  ;;  %v601_v36 = vadd.f32 %v600_v48, %v599_v41  ;;  %v676_v56 = vrot.slane %v675_v51, 2  ;;  %v612_v0 = vadd.f32 %v611_v28, %v4222_v62  ;;  %v646_v16 = vmul.f32 %v4222_v62, %v4222_v62 }
 0x165   :  { %v458_v47 = vrot.slane %v457_v44, 1  ;;  %v495_v21 = vadd.f32 %v494_v1, %v493_v52  ;;  %v687_v42 = vadd.f32 %v686_v15, %v644_v57  ;;  %v650_v41 = vmul.f32 %v4220_v58, %v4220_v58 }
 0x166   :  { %v602_v63 = vrot.slane %v601_v36, 1  ;;  %v677_v6 = vadd.f32 %v676_v56, %v675_v51  ;;  %v613_v23 = vadd.f32 %v4212_v53, %v612_v0 }
 0x167   :  { %v459_v37 = vadd.f32 %v458_v47, %v457_v44  ;;  %v496_v2 = vrot.slane %v495_v21, 1  ;;  %v688_v43 = vadd.f32 %v687_v42, %v646_v16 }
 0x168   :  { %v603_v48 = vadd.f32 %v602_v63, %v601_v36  ;;  %v678_v28 = vrot.slane %v677_v6, 1  ;;  %v4232_v32 = vpop.f32.mrb[28].mxu1  ;;  %v614_v52 = vadd.f32 %v4220_v58, %v613_v23  ;;  %v3821_v23 = vmov 1966171168  }
 0x169   :  { %5699 = vst [vmem:[#allocation26_spill] sm:$0xff] %v4232_v32  ;;  %v4235_v1 = vmul.f32 0.0078125, %v459_v37  ;;  %v497_v62 = vadd.f32 %v496_v2, %v495_v21  ;;  %v689_v57 = vadd.f32 %v688_v43, %v648_v40  ;;  %v4237_v15 = vpop.f32.mrb[29].mxu1 }
 0x16a   :  { %5700 = vst [vmem:[#allocation27_spill] sm:$0xff] %v4237_v15  ;;  %v4239_v51 = vmul.f32 0.0078125, %v603_v48  ;;  %v679_v44 = vadd.f32 %v678_v28, %v677_v6  ;;  %v615_v56 = vadd.f32 %v614_v52, %v4237_v15  ;;  %v652_v0 = vmul.f32 %v4237_v15, %v4237_v15  ;;  %v4244_v36 = vpop.f32.mrb[30].mxu1 }
 0x16b   :  { %5701 = vst [vmem:[#allocation28_spill] sm:$0xff] %v4244_v36  ;;  %v498_v16 = vmul.f32 0.0078125, %v497_v62  ;;  %v499_v47 = vmul.f32 %v4235_v1, %v4235_v1  ;;  %v690_v40 = vadd.f32 %v689_v57, %v650_v41  ;;  %v4250_v42 = vpop.f32.mrb[31].mxu1  ;;  %v522_v28 = vlaneseq }
 0x16c   :  { %5702 = vst [vmem:[#allocation29_spill] sm:$0xff] %v4250_v42  ;;  %v701_v63 = vmul.f32 0.0078125, %v679_v44  ;;  %v703_v6 = vmul.f32 %v4239_v51, %v4239_v51  ;;  %v656_v41 = vmul.f32 %v4232_v32, %v4232_v32  ;;  %v5728_v15 = vmov 0.0  }
 0x16d   :  { %v500_v62 = vsub.f32 %v498_v16, %v499_v47  ;;  %v691_v47 = vadd.f32 %v690_v40, %v652_v0  ;;  %v504_v16 = vsub.f32 %v4041_v25, %v4235_v1  ;;  %v658_v0 = vmul.f32 %v4244_v36, %v4244_v36 }
 0x16e   :  { %v705_v48 = vsub.f32 %v701_v63, %v703_v6  ;;  %v616_v63 = vadd.f32 %v615_v56, %v4250_v42  ;;  %v654_v6 = vmul.f32 %v4250_v42, %v4250_v42  ;;  %v505_v56 = vsub.f32 %v4055_v33, %v4235_v1 }
 0x16f   :  { %v501_v44 = vmax.f32 %v500_v62, 0.0  ;;  %v503_v62 = vsub.f32 %v4021_v13, %v4235_v1 }
 0x170   :  { %v617_v40 = vadd.f32 %v4232_v32, %v616_v63  ;;  %v692_v52 = vadd.f32 %v691_v47, %v654_v6  ;;  %v707_v33 = vmax.f32 %v705_v48, 0.0  ;;  %v437_v63 = vld [vmem:[%s5641_s2] sm:$0x1] }
 0x171   :  { %v518_v57 = vadd.f32 1e-05, %v501_v44  ;;  %v502_v44 = vsub.f32 %v4013_v8, %v4235_v1 }
 0x172   :  { %v618_v43 = vadd.f32 %v4244_v36, %v617_v40  ;;  %v693_v2 = vadd.f32 %v692_v52, %v656_v41  ;;  %v4323_v40 = vshrl.u32 %v522_v28, 7  ;;  %v741_v28 = vadd.f32 1e-05, %v707_v33 }
 0x173   :  { %3677 = vrsqrt.f32 %v518_v57  ;;  %v506_v57 = vsub.f32 %v4069_v45, %v4235_v1  ;;  %v4341_v36 = vunpack.c.l.s4 %v3821_v23 }
 0x174   :  { %v619_v41 = vrot.slane %v618_v43, 4  ;;  %v694_v52 = vadd.f32 %v693_v2, %v658_v0  ;;  %v4331_v45 = vsub.s32 0, %v4323_v40  ;;  %3679 = vrsqrt.f32 %v741_v28 }
 0x176   :  { %v620_v47 = vadd.f32 %v619_v41, %v618_v43  ;;  %v695_v25 = vrot.slane %v694_v52, 4  ;;  %5703 = vst [vmem:[#allocation30_spill] sm:$0xff] %v4331_v45  ;;  %v4339_v41 = vld [vmem:[%s5642_s3] ss:$0 sm:$0xff] }
 0x178   :  { %v621_v6 = vrot.slane %v620_v47, 2  ;;  %v696_v13 = vadd.f32 %v695_v25, %v694_v52  ;;  %v5704_v25 = vsub.f32 %v4113_v20, %v4235_v1 }
 0x17a   :  { %v622_v21 = vadd.f32 %v621_v6, %v620_v47  ;;  %v697_v2 = vrot.slane %v696_v13, 2 }
 0x17c   :  { %v623_v48 = vrot.slane %v622_v21, 1  ;;  %v698_v43 = vadd.f32 %v697_v2, %v696_v13 }
 0x17d   :  { %v3678_v37 = vpop.eup %3677 }
 0x17e   :  { %v520_v8 = vmul.f32 %v3678_v37, %v437_v63  ;;  %v624_v47 = vadd.f32 %v623_v48, %v622_v21  ;;  %v699_v33 = vrot.slane %v698_v43, 1 }
 0x180   :  { %v4334_v0 = vrot.slane %v520_v8, %v4331_v45  ;;  %v4353_v28 = vmul.f32 0.0078125, %v624_v47  ;;  %v700_v2 = vadd.f32 %v699_v33, %v698_v43  ;;  %v5705_v33 = vld [vmem:[#allocation21_spill] sm:$0xff]  ;;  %v5708_v43 = vld [vmem:[#allocation24_spill] sm:$0xff] }
 0x182   :  { %v542_v37 = vmul.f32 %v4334_v0, %v5704_v25  ;;  %v527_v8 = vmul.f32 %v4334_v0, %v502_v44  ;;  %v528_v13 = vmul.f32 %v4334_v0, %v503_v62  ;;  %v529_v63 = vmul.f32 %v4334_v0, %v504_v16 }
 0x183   :  { %v530_v6 = vmul.f32 %v4334_v0, %v505_v56  ;;  %v531_v52 = vmul.f32 %v4334_v0, %v506_v57  ;;  %v702_v25 = vmul.f32 0.0078125, %v700_v2  ;;  %v704_v56 = vmul.f32 %v4353_v28, %v4353_v28  ;;  %v5709_v57 = vld [vmem:[#allocation25_spill] sm:$0xff] }
 0x184   :  { %v564_v23 = vadd.f32 %v4339_v41, %v542_v37  ;;  %v549_v20 = vadd.f32 %v4339_v41, %v527_v8  ;;  %v550_v21 = vadd.f32 %v4339_v41, %v528_v13  ;;  %v551_v48 = vadd.f32 %v4339_v41, %v529_v63  ;;  %v5706_v63 = vld [vmem:[#allocation23_spill] sm:$0xff]  ;;  %v948_v37 = vld [vmem:[#allocation2 + $0x1] sm:$0xff] }
 0x185   :  { %v552_v44 = vadd.f32 %v4339_v41, %v530_v6  ;;  %v553_v62 = vadd.f32 %v4339_v41, %v531_v52  ;;  %v706_v13 = vsub.f32 %v702_v25, %v704_v56  ;;  %v4392_v6 = vpop.eup %3679  ;;  %v5714_v52 = vsub.f32 %v4083_v54, %v4235_v1 }
 0x186   :  { %v580_v16 = vmax.f32 %v564_v23, 0.0  ;;  %v5707_v23 = vld [vmem:[#allocation22_spill] sm:$0xff]  ;;  %v4394_v47 = vmax.f32 %v549_v20, 0.0  ;;  %v4396_v27 = vmax.f32 %v550_v21, 0.0  ;;  %v4398_v8 = vmax.f32 %v551_v48, 0.0 }
 0x187   :  { %v708_v25 = vmax.f32 %v706_v13, 0.0  ;;  %v4402_v12 = vmax.f32 %v553_v62, 0.0  ;;  %v532_v56 = vmul.f32 %v4334_v0, %v5714_v52  ;;  %v5715_v2 = vsub.f32 %v4097_v3, %v4235_v1 }
 0x188   :  { %915 = vst [vmem:[#allocation2 + $0x121] sm:$0xff] %v580_v16  ;;  %5710 = vst [vmem:[#allocation21_spill] sm:$0xff] %v4394_v47  ;;  %v4400_v16 = vmax.f32 %v552_v44, 0.0  ;;  %v964_v21 = vpack.c.bf16 %v4394_v47, %v948_v37  ;;  %v4418_v48 = vpack.c.bf16 %v4398_v8, %v4396_v27  ;;  %v5716_v54 = vsub.f32 %v4111_v17, %v4235_v1 }
 0x189   :  { %5711 = vst [vmem:[#allocation23_spill] sm:$0xff] %v4396_v27  ;;  %5712 = vst [vmem:[#allocation22_spill] sm:$0xff] %v4398_v8  ;;  %v742_v13 = vadd.f32 1e-05, %v708_v25  ;;  %v533_v20 = vmul.f32 %v4334_v0, %v5715_v2  ;;  %v5717_v44 = vsub.f32 %v4015_v9, %v4235_v1  ;;  %v554_v52 = vadd.f32 %v4339_v41, %v532_v56 }
 0x18a   :  { %5713 = vst [vmem:[#allocation24_spill] sm:$0xff] %v4402_v12  ;;  %900 = vst [vmem:[#allocation2 + $0x11] sm:$0xff] %v4394_v47  ;;  %v534_v3 = vmul.f32 %v4334_v0, %v5716_v54  ;;  %v4432_v37 = vpack.c.bf16 %v4402_v12, %v4400_v16  ;;  %1885 = vmatprep.mubr.bf16.mxu1 %v964_v21  ;;  %v5718_v9 = vsub.f32 %v4023_v14, %v4235_v1 }
 0x18b   :  { %901 = vst [vmem:[#allocation2 + $0x21] sm:$0xff] %v4396_v27  ;;  %902 = vst [vmem:[#allocation2 + $0x31] sm:$0xff] %v4398_v8  ;;  %v535_v62 = vmul.f32 %v4334_v0, %v5717_v44  ;;  %3681 = vrsqrt.f32 %v742_v13  ;;  %v555_v2 = vadd.f32 %v4339_v41, %v533_v20  ;;  %v5719_v54 = vsub.f32 %v4043_v26, %v4235_v1  ;;  %v3630_v8 = vld [vmem:[#allocation9 + $0x190] sm:$0xff]  }
 0x18c   :  { %903 = vst [vmem:[#allocation2 + $0x41] sm:$0xff] %v4400_v16  ;;  %904 = vst [vmem:[#allocation2 + $0x51] sm:$0xff] %v4402_v12  ;;  %v556_v17 = vadd.f32 %v4339_v41, %v534_v3  ;;  %v536_v13 = vmul.f32 %v4334_v0, %v5718_v9  ;;  %v4446_v32 = vmax.f32 %v554_v52, 0.0  ;;  %v5722_v20 = vsub.f32 %v4057_v34, %v4235_v1 }
 0x18d   :  { %v557_v25 = vadd.f32 %v4339_v41, %v535_v62  ;;  %v537_v44 = vmul.f32 %v4334_v0, %v5719_v54  ;;  %v4448_v56 = vmax.f32 %v555_v2, 0.0  ;;  %v5723_v3 = vsub.f32 %v4071_v46, %v4235_v1  ;;  %v980_v2 = vld [vmem:[#allocation2 + $0x2] sm:$0xff] }
 0x18e   :  { %5720 = vst [vmem:[#allocation25_spill] sm:$0xff] %v4446_v32  ;;  %v538_v21 = vmul.f32 %v4334_v0, %v5722_v20  ;;  %v4458_v62 = vmax.f32 %v556_v17, 0.0  ;;  %v558_v26 = vadd.f32 %v4339_v41, %v536_v13  ;;  %905 = vst [vmem:[#allocation2 + $0x61] sm:$0xff] %v4446_v32  ;;  %v750_v54 = vunpack.c.0.s8 %v4341_v36 }
 0x18f   :  { %5721 = vst [vmem:[#allocation31_spill] sm:$0xff] %v4448_v56  ;;  %v539_v14 = vmul.f32 %v4334_v0, %v5723_v3  ;;  %v4460_v9 = vmax.f32 %v557_v25, 0.0  ;;  %v559_v52 = vadd.f32 %v4339_v41, %v537_v44  ;;  %906 = vst [vmem:[#allocation2 + $0x71] sm:$0xff] %v4448_v56  ;;  %v4468_v34 = vpack.c.bf16 %v4448_v56, %v4446_v32  ;;  %v3614_v44 = vld [vmem:[#allocation9 + $0x100] sm:$0xff]  }
 0x190   :  { %v560_v46 = vadd.f32 %v4339_v41, %v538_v21  ;;  %v5725_v25 = vsub.f32 %v4085_v55, %v4235_v1  ;;  %907 = vst [vmem:[#allocation2 + $0x81] sm:$0xff] %v4458_v62  ;;  %v4479_v20 = vmax.f32 %v558_v26, 0.0  ;;  %v5726_v21 = vsub.f32 %v4099_v4, %v4235_v1  ;;  %v3625_v26 = vld [vmem:[#allocation9 + $0x1c8] sm:$0xff]  }
 0x191   :  { %5724 = vst [vmem:[#allocation32_spill] sm:$0xff] %v4468_v34  ;;  %v561_v17 = vadd.f32 %v4339_v41, %v539_v14  ;;  %908 = vst [vmem:[#allocation2 + $0xb1] sm:$0xff] %v4460_v9  ;;  %v4481_v3 = vmax.f32 %v559_v52, 0.0  ;;  %v1012_v34 = vld [vmem:[#allocation2 + $0x10] sm:$0xff] }
 0x192   :  { %v540_v13 = vmul.f32 %v4334_v0, %v5725_v25  ;;  %v541_v14 = vmul.f32 %v4334_v0, %v5726_v21  ;;  %v1013_v55 = vld [vmem:[#allocation2 + $0x20] sm:$0xff]  ;;  %v4487_v42 = vld [vmem:[#allocation2 + $0x12] sm:$0xff]  ;;  %v4489_v25 = vmax.f32 %v560_v46, 0.0  ;;  %v932_v50 = vpack.c.bf16 %v1012_v34, %v5728_v15  ;;  %909 = vst [vmem:[#allocation2 + $0xc1] sm:$0xff] %v4479_v20 }
 0x193   :  { %5727 = vst [vmem:[#allocation33_spill] sm:$0xff] %v4487_v42  ;;  %v4491_v36 = vmax.f32 %v561_v17, 0.0  ;;  %v1028_v52 = vpack.c.bf16 %v1013_v55, %v1012_v34  ;;  %v996_v4 = vpack.c.bf16 %v4487_v42, %v980_v2  ;;  %v1014_v1 = vld [vmem:[#allocation2 + $0x30] sm:$0xff]  ;;  %v4498_v0 = vld [vmem:[#allocation2 + $0x40] sm:$0xff]  ;;  %910 = vst [vmem:[#allocation2 + $0xd1] sm:$0xff] %v4481_v3  ;;  %v4504_v46 = vpack.c.bf16 %v4481_v3, %v4479_v20 }
 0x194   :  { %v562_v60 = vadd.f32 %v4339_v41, %v540_v13  ;;  %v3615_v17 = vld [vmem:[#allocation9 + $0x148] sm:$0xff]   ;;  %v3624_v13 = vld [vmem:[#allocation9 + $0x180] sm:$0xff]   ;;  %911 = vst [vmem:[#allocation2 + $0xe1] sm:$0xff] %v4489_v25  ;;  %v4515_v34 = vsub.s32 %v750_v54, %v4323_v40  ;;  %1886 = vmatmul.mubr.bf16.vlgmr.msra.gmra.mrb[32].mxu1 %v932_v50  ;;  %v1029_v21 = vpack.c.bf16 %v4498_v0, %v1014_v1  ;;  %v3619_v50 = vld [vmem:[#allocation9 + $0x158] sm:$0xff]  }
 0x195   :  { %912 = vst [vmem:[#allocation2 + $0xf1] sm:$0xff] %v4491_v36  ;;  %v4510_v15 = vpack.c.bf16 %v4491_v36, %v4489_v25  ;;  %1982 = vmatprep.mubr.bf16.mxu0 %v1028_v52  ;;  %v563_v47 = vadd.f32 %v4339_v41, %v541_v14  ;;  %v3682_v27 = vpop.eup %3681  ;;  %3342 = vmatpush3.bf16.msra.mxu1 %v3614_v44  ;;  %v3616_v42 = vld [vmem:[#allocation9 + $0x108] sm:$0xff]  }
 0x196   :  { %v4512_v2 = vmax.f32 %v562_v60, 0.0  ;;  %5730 = vst [vmem:[#allocation35_spill] sm:$0xff] %v4515_v34  ;;  %1983 = vmatmul.mubr.bf16.vlgmr.msra.gmra.mrb[16].mxu0 %v996_v4  ;;  %1893 = vmatprep.mubr.bf16.mxu1 %v4418_v48  ;;  %v3617_v60 = vld [vmem:[#allocation9 + $0x150] sm:$0xff]   ;;  %v3626_v44 = vld [vmem:[#allocation9 + $0x188] sm:$0xff]   ;;  %v4550_v41 = vpack.c.bf16 %v1014_v1, %v1013_v55 }
 0x197   :  { %5729 = vst [vmem:[#allocation34_spill] sm:$0xff] %v4510_v15  ;;  %v747_v15 = vcombine.low %v4392_v6, %v3682_v27  ;;  %1990 = vmatprep.mubr.bf16.mxu0 %v1029_v21  ;;  %v4522_v54 = vmax.f32 %v563_v47, 0.0  ;;  %3343 = vmatprep.subr.bf16.mxu1 %v3615_v17  ;;  %v4529_v52 = vld [vmem:[#allocation2 + $0x22] sm:$0xff]  ;;  %v4531_v27 = vld [vmem:[#allocation2 + $0x32] sm:$0xff]  ;;  %v581_v47 = vld [vmem:[%s5649_s10] sm:$0x3] }
 0x198   :  { %913 = vst [vmem:[#allocation2 + $0x101] sm:$0xff] %v4512_v2  ;;  %3406 = vmatpush3.bf16.msra.mxu0 %v3624_v13  ;;  %v3629_v6 = vld [vmem:[#allocation9 + $0x1d0] sm:$0xff]   ;;  %v4537_v21 = vld [vmem:[#allocation2 + $0x60] sm:$0xff] }
 0x199   :  { %5731 = vst [vmem:[#allocation36_spill] sm:$0xff] %v4522_v54  ;;  %v754_v14 = vrot.slane %v747_v15, %v4515_v34  ;;  %3407 = vmatprep.subr.bf16.mxu0 %v3625_v26  ;;  %914 = vst [vmem:[#allocation2 + $0x111] sm:$0xff] %v4522_v54  ;;  %3344 = vmatpush3.bf16.msra.mxu1 %v3616_v42  ;;  %v1016_v4 = vld [vmem:[#allocation2 + $0x50] sm:$0xff]  ;;  %v4541_v17 = vpack.c.bf16 %v4522_v54, %v4512_v2  ;;  %v582_v13 = vld [vmem:[%s5650_s11] sm:$0x3]  ;;  %v4548_v15 = vsub.s32 1, %v4323_v40 }
 0x19a   :  { %3345 = vmatprep.subr.bf16.mxu1 %v3617_v60  ;;  %v3618_v42 = vld [vmem:[#allocation9 + $0x110] sm:$0xff]   ;;  %v4556_v54 = vpack.c.bf16 %v4531_v27, %v4529_v52  ;;  %v4558_v32 = vld [vmem:[#allocation2 + $0x42] sm:$0xff]  ;;  %v1030_v40 = vpack.c.bf16 %v4537_v21, %v1016_v4 }
 0x19b   :  { %v761_v26 = vrot.slane %v754_v14, %v4515_v34  ;;  %5732 = vst [vmem:[#allocation37_spill] sm:$0xff] %v4548_v15  ;;  %v3631_v14 = vld [vmem:[#allocation9 + $0x1d8] sm:$0xff]   ;;  %v4564_v1 = vld [vmem:[#allocation2 + $0x70] sm:$0xff]  ;;  %v4566_v60 = vld [vmem:[#allocation2 + $0x80] sm:$0xff]  ;;  %v4569_v12 = vrot.slane %v582_v13, %v4548_v15  ;;  %v5735_v13 = vsub.f32 %v4150_v5, %v4353_v28  ;;  %v5739_v5 = vsub.f32 %v4143_v61, %v4353_v28 }
 0x19c   :  { %5733 = vst [vmem:[#allocation38_spill] sm:$0xff] %v4556_v54  ;;  %3408 = vmatpush3.bf16.msra.mxu0 %v3626_v44  ;;  %1894 = vmatmul.mubr.bf16.gmra.mrb[36].mxu1 %v4550_v41  ;;  %v4562_v55 = vld [vmem:[#allocation2 + $0x52] sm:$0xff]  ;;  %v4574_v44 = vpack.c.bf16 %v1016_v4, %v4498_v0  ;;  %v1031_v0 = vpack.c.bf16 %v4566_v60, %v4564_v1  ;;  %v3621_v4 = vld [vmem:[#allocation9 + $0x160] sm:$0xff]  }
 0x19d   :  { %v763_v34 = vmul.f32 %v761_v26, %v581_v47  ;;  %3409 = vmatprep.subr.bf16.mxu0 %v3629_v6  ;;  %1901 = vmatprep.mubr.bf16.mxu1 %v4432_v37  ;;  %v3620_v6 = vld [vmem:[#allocation9 + $0x118] sm:$0xff]   ;;  %v5744_v61 = vsub.f32 %v5705_v33, %v4353_v28  ;;  %v5750_v33 = vsub.f32 %v4184_v31, %v4353_v28 }
 0x19e   :  { %1991 = vmatmul.mubr.bf16.gmra.mrb[20].mxu0 %v4556_v54  ;;  %3346 = vmatpush3.bf16.msra.mxu1 %v3618_v42  ;;  %v4586_v54 = vpack.c.bf16 %v4562_v55, %v4558_v32  ;;  %v5734_v42 = vsub.f32 %v4017_v10, %v4239_v51  ;;  %v5738_v10 = vsub.f32 %v4048_v29, %v4239_v51 }
 0x19f   :  { %v768_v26 = vrot.slane %v763_v34, %v4331_v45  ;;  %v4580_v56 = vrot.slane %v763_v34, %v4548_v15  ;;  %1998 = vmatprep.mubr.bf16.mxu0 %v1030_v40  ;;  %3347 = vmatprep.subr.bf16.mxu1 %v3619_v50  ;;  %v5736_v15 = vsub.f32 %v4031_v18, %v4239_v51 }
 0x1a0   :  { %3410 = vmatpush3.bf16.msra.mxu0 %v3630_v8  ;;  %v5737_v8 = vsub.f32 %v4164_v35, %v4353_v28  ;;  %v5740_v18 = vsub.f32 %v4062_v38, %v4239_v51  ;;  %v5741_v35 = vsub.f32 %v4157_v22, %v4353_v28  ;;  %v5742_v29 = vsub.f32 %v4076_v49, %v4239_v51 }
 0x1a1   :  { %v4595_v40 = vmul.f32 %v768_v26, %v5734_v42  ;;  %v776_v47 = vmul.f32 %v4580_v56, %v5735_v13  ;;  %v4604_v45 = vmul.f32 %v768_v26, %v5736_v15  ;;  %3411 = vmatprep.subr.bf16.mxu0 %v3631_v14  ;;  %v4613_v42 = vmul.f32 %v768_v26, %v5738_v10 }
 0x1a2   :  { %v778_v50 = vmul.f32 %v4580_v56, %v5737_v8  ;;  %v4619_v13 = vmul.f32 %v4580_v56, %v5739_v5  ;;  %v4624_v15 = vmul.f32 %v768_v26, %v5740_v18  ;;  %v4630_v14 = vmul.f32 %v4580_v56, %v5741_v35  ;;  %3348 = vmatpush3.bf16.msra.mxu1 %v3620_v6 }
 0x1a3   :  { %v4635_v8 = vmul.f32 %v768_v26, %v5742_v29  ;;  %v4641_v10 = vmul.f32 %v4580_v56, %v5744_v61  ;;  %v5745_v38 = vsub.f32 %v4090_v59, %v4239_v51  ;;  %v5747_v22 = vsub.f32 %v5706_v63, %v4353_v28  ;;  %3349 = vmatprep.subr.bf16.mxu1 %v3621_v4 }
 0x1a4   :  { %v5748_v49 = vsub.f32 %v4104_v7, %v4239_v51  ;;  %v4663_v29 = vmul.f32 %v4580_v56, %v5750_v33  ;;  %v5751_v59 = vsub.f32 %v4118_v24, %v4239_v51  ;;  %v5753_v63 = vsub.f32 %v5707_v23, %v4353_v28  ;;  %v3623_v7 = vld [vmem:[#allocation9 + $0x120] sm:$0xff]   ;;  %1902 = vmatmul.mubr.bf16.gmra.mrb[40].mxu1 %v4574_v44 }
 0x1a5   :  { %5743 = vst [vmem:[#allocation39_spill] sm:$0xff] %v4635_v8  ;;  %v4646_v5 = vmul.f32 %v768_v26, %v5745_v38  ;;  %v4652_v18 = vmul.f32 %v4580_v56, %v5747_v22  ;;  %v5754_v38 = vsub.f32 %v4019_v11, %v4239_v51  ;;  %v5756_v22 = vsub.f32 %v5708_v43, %v4353_v28  ;;  %v3627_v11 = vld [vmem:[#allocation9 + $0x168] sm:$0xff]  }
 0x1a6   :  { %v4657_v35 = vmul.f32 %v768_v26, %v5748_v49  ;;  %v4668_v61 = vmul.f32 %v768_v26, %v5751_v59  ;;  %v4674_v6 = vmul.f32 %v4580_v56, %v5753_v63  ;;  %v5757_v49 = vsub.f32 %v4033_v19, %v4239_v51  ;;  %v3632_v59 = vld [vmem:[#allocation9 + $0x198] sm:$0xff]   ;;  %1999 = vmatmul.mubr.bf16.gmra.mrb[24].mxu0 %v4586_v54 }
 0x1a7   :  { %5746 = vst [vmem:[#allocation40_spill] sm:$0xff] %v4646_v5  ;;  %v4679_v31 = vmul.f32 %v768_v26, %v5754_v38  ;;  %v4685_v24 = vmul.f32 %v4580_v56, %v5756_v22  ;;  %v5759_v4 = vsub.f32 %v5709_v57, %v4353_v28  ;;  %v5760_v43 = vsub.f32 %v4050_v30, %v4239_v51  ;;  %v3635_v30 = vld [vmem:[#allocation9 + $0x1e0] sm:$0xff]  }
 0x1a8   :  { %5749 = vst [vmem:[#allocation41_spill] sm:$0xff] %v4657_v35  ;;  %5752 = vst [vmem:[#allocation42_spill] sm:$0xff] %v4668_v61  ;;  %v4690_v23 = vmul.f32 %v768_v26, %v5757_v49  ;;  %v5762_v19 = vsub.f32 %v4212_v53, %v4353_v28  ;;  %v5763_v57 = vsub.f32 %v4064_v39, %v4239_v51  ;;  %v5776_v61 = vld [vmem:[#allocation32_spill] sm:$0xff]  ;;  %2006 = vmatprep.mubr.bf16.mxu0 %v1031_v0 }
 0x1a9   :  { %5755 = vst [vmem:[#allocation43_spill] sm:$0xff] %v4679_v31  ;;  %v4696_v33 = vmul.f32 %v4580_v56, %v5759_v4  ;;  %v4702_v63 = vmul.f32 %v768_v26, %v5760_v43  ;;  %v5765_v49 = vsub.f32 %v4220_v58, %v4353_v28  ;;  %v5766_v43 = vld [vmem:[#allocation17_spill] sm:$0xff]  ;;  %1909 = vmatprep.mubr.bf16.mxu1 %v5776_v61  ;;  %v5786_v0 = vld [vmem:[#allocation28_spill] sm:$0xff] }
 0x1aa   :  { %5758 = vst [vmem:[#allocation44_spill] sm:$0xff] %v4690_v23  ;;  %v4708_v38 = vmul.f32 %v4580_v56, %v5762_v19  ;;  %v4713_v22 = vmul.f32 %v768_v26, %v5763_v57  ;;  %v5767_v53 = vsub.f32 %v5766_v43, %v4239_v51  ;;  %v5769_v19 = vld [vmem:[#allocation27_spill] sm:$0xff]  ;;  %v5771_v57 = vld [vmem:[#allocation18_spill] sm:$0xff]  ;;  %3350 = vmatpush3.bf16.msra.mxu1 %v3623_v7 }
 0x1ab   :  { %5761 = vst [vmem:[#allocation45_spill] sm:$0xff] %v4702_v63  ;;  %v4719_v4 = vmul.f32 %v4580_v56, %v5765_v49  ;;  %v5770_v63 = vsub.f32 %v5769_v19, %v4353_v28  ;;  %v5772_v58 = vsub.f32 %v5771_v57, %v4239_v51  ;;  %v5774_v49 = vld [vmem:[#allocation29_spill] sm:$0xff]  ;;  %v5777_v43 = vld [vmem:[#allocation19_spill] sm:$0xff]  ;;  %v5780_v19 = vld [vmem:[#allocation26_spill] sm:$0xff]  ;;  %3351 = vmatprep.subr.bf16.mxu1 %v3627_v11 }
 0x1ac   :  { %5764 = vst [vmem:[#allocation46_spill] sm:$0xff] %v4713_v22  ;;  %v4725_v34 = vmul.f32 %v768_v26, %v5767_v53  ;;  %v5775_v23 = vsub.f32 %v5774_v49, %v4353_v28  ;;  %v5778_v53 = vsub.f32 %v5777_v43, %v4239_v51  ;;  %v5782_v57 = vld [vmem:[#allocation20_spill] sm:$0xff]  ;;  %v3628_v49 = vld [vmem:[#allocation9 + $0x128] sm:$0xff]   ;;  %3412 = vmatpush3.bf16.msra.mxu0 %v3632_v59  ;;  %v3634_v59 = vld [vmem:[#allocation9 + $0x130] sm:$0xff]  }
 0x1ad   :  { %v4731_v39 = vmul.f32 %v4580_v56, %v5770_v63  ;;  %v4736_v22 = vmul.f32 %v768_v26, %v5772_v58  ;;  %v5781_v63 = vsub.f32 %v5780_v19, %v4353_v28  ;;  %v5783_v58 = vsub.f32 %v5782_v57, %v4239_v51  ;;  %v4762_v43 = vld [vmem:[#allocation2 + $0x62] sm:$0xff]  ;;  %v3633_v19 = vld [vmem:[#allocation9 + $0x170] sm:$0xff]   ;;  %3413 = vmatprep.subr.bf16.mxu0 %v3635_v30 }
 0x1ae   :  { %5768 = vst [vmem:[#allocation17_spill] sm:$0xff] %v4725_v34  ;;  %v802_v31 = vmul.f32 %v4580_v56, %v5775_v23  ;;  %v4746_v34 = vmul.f32 %v768_v26, %v5778_v53  ;;  %v956_v23 = vld [vmem:[#allocation2 + $0xa1] sm:$0xff]  ;;  %v4764_v53 = vld [vmem:[#allocation2 + $0x72] sm:$0xff]  ;;  %v4770_v51 = vpack.c.bf16 %v4564_v1, %v4537_v21  ;;  %v740_v7 = vsub.f32 %v5786_v0, %v4353_v28 }
 0x1af   :  { %5773 = vst [vmem:[#allocation27_spill] sm:$0xff] %v4736_v22  ;;  %v4752_v35 = vmul.f32 %v4580_v56, %v5781_v63  ;;  %v4757_v22 = vmul.f32 %v768_v26, %v5783_v58  ;;  %v1020_v63 = vld [vmem:[#allocation2 + $0xb0] sm:$0xff]  ;;  %v3636_v26 = vld [vmem:[#allocation9 + $0x1a0] sm:$0xff]   ;;  %v968_v11 = vpack.c.bf16 %v4460_v9, %v956_v23  ;;  %3352 = vmatpush3.bf16.msra.mxu1 %v3628_v49  ;;  %v3637_v57 = vld [vmem:[#allocation9 + $0x1e8] sm:$0xff]  }
 0x1b0   :  { %5779 = vst [vmem:[#allocation18_spill] sm:$0xff] %v4746_v34  ;;  %v4760_v5 = vadd.f32 %v4569_v12, %v802_v31  ;;  %v4766_v34 = vld [vmem:[#allocation2 + $0xc0] sm:$0xff]  ;;  %v4776_v31 = vpack.c.bf16 %v4764_v53, %v4762_v43  ;;  %v4780_v58 = vadd.f32 %v4569_v12, %v776_v47  ;;  %v4783_v30 = vadd.f32 %v4569_v12, %v778_v50  ;;  %v3639_v28 = vld [vmem:[#allocation9 + $0x178] sm:$0xff]   ;;  %v3638_v49 = vld [vmem:[#allocation9 + $0x1a8] sm:$0xff]  }
 0x1b1   :  { %5784 = vst [vmem:[#allocation29_spill] sm:$0xff] %v4757_v22  ;;  %1910 = vmatmul.mubr.bf16.gmra.mrb[44].mxu1 %v4770_v51  ;;  %v1032_v21 = vpack.c.bf16 %v4766_v34, %v1020_v63  ;;  %3353 = vmatprep.subr.bf16.mxu1 %v3633_v19  ;;  %v806_v1 = vmul.f32 %v4580_v56, %v740_v7  ;;  %v3641_v19 = vld [vmem:[#allocation9 + $0x1f0] sm:$0xff]  }
 0x1b2   :  { %5785 = vst [vmem:[#allocation32_spill] sm:$0xff] %v4760_v5  ;;  %5787 = vst [vmem:[#allocation19_spill] sm:$0xff] %v4780_v58  ;;  %v4790_v23 = vadd.f32 %v4569_v12, %v4619_v13  ;;  %2007 = vmatmul.mubr.bf16.gmra.mrb[28].mxu0 %v4776_v31  ;;  %1917 = vmatprep.mubr.bf16.mxu1 %v968_v11  ;;  %v4795_v47 = vadd.f32 %v4569_v12, %v4630_v14  ;;  %v3640_v13 = vld [vmem:[#allocation9 + $0x138] sm:$0xff]  }
 0x1b3   :  { %5788 = vst [vmem:[#allocation26_spill] sm:$0xff] %v4783_v30  ;;  %v4799_v50 = vadd.f32 %v4569_v12, %v4641_v10  ;;  %2014 = vmatprep.mubr.bf16.mxu0 %v1032_v21  ;;  %3414 = vmatpush3.bf16.msra.mxu0 %v3636_v26  ;;  %v4803_v56 = vadd.f32 %v4569_v12, %v4652_v18  ;;  %v988_v10 = vld [vmem:[#allocation2 + $0xa2] sm:$0xff]  ;;  %v4813_v7 = vld [vmem:[#allocation2 + $0xb2] sm:$0xff] }
 0x1b4   :  { %5789 = vst [vmem:[#allocation20_spill] sm:$0xff] %v4790_v23  ;;  %5790 = vst [vmem:[#allocation28_spill] sm:$0xff] %v4795_v47  ;;  %3354 = vmatpush3.bf16.msra.mxu1 %v3634_v59  ;;  %3415 = vmatprep.subr.bf16.mxu0 %v3637_v57  ;;  %v4807_v0 = vadd.f32 %v4569_v12, %v4663_v29  ;;  %v4811_v14 = vadd.f32 %v4569_v12, %v4674_v6  ;;  %v3645_v26 = vld [vmem:[#allocation9 + $0x200] sm:$0xff]   ;;  %v1022_v59 = vld [vmem:[#allocation2 + $0xd0] sm:$0xff] }
 0x1b5   :  { %5791 = vst [vmem:[#allocation47_spill] sm:$0xff] %v4799_v50  ;;  %5792 = vst [vmem:[#allocation48_spill] sm:$0xff] %v4803_v56  ;;  %3355 = vmatprep.subr.bf16.mxu1 %v3639_v28  ;;  %v4817_v18 = vadd.f32 %v4569_v12, %v4685_v24  ;;  %v4821_v11 = vadd.f32 %v4569_v12, %v4696_v33  ;;  %v1023_v29 = vld [vmem:[#allocation2 + $0xe0] sm:$0xff]  ;;  %v4825_v57 = vadd.f32 %v4569_v12, %v4708_v38  ;;  %v3642_v24 = vld [vmem:[#allocation9 + $0x1b0] sm:$0xff]  }
 0x1b6   :  { %5793 = vst [vmem:[#allocation49_spill] sm:$0xff] %v4807_v0  ;;  %5794 = vst [vmem:[#allocation50_spill] sm:$0xff] %v4811_v14  ;;  %v4829_v6 = vadd.f32 %v4569_v12, %v4719_v4  ;;  %v4831_v21 = vld [vmem:[#allocation2] sm:$0xff]  ;;  %v4836_v33 = vadd.f32 %v4569_v12, %v4731_v39  ;;  %v1000_v5 = vpack.c.bf16 %v4813_v7, %v988_v10  ;;  %v3643_v38 = vld [vmem:[#allocation9 + $0x1f8] sm:$0xff]  }
 0x1b7   :  { %5795 = vst [vmem:[#allocation51_spill] sm:$0xff] %v4817_v18  ;;  %5796 = vst [vmem:[#allocation52_spill] sm:$0xff] %v4821_v11  ;;  %v936_v28 = vpack.c.bf16 %v1020_v63, %v4831_v21  ;;  %3416 = vmatpush3.bf16.msra.mxu0 %v3638_v49  ;;  %v4844_v4 = vadd.f32 %v4569_v12, %v806_v1  ;;  %v1033_v63 = vpack.c.bf16 %v1023_v29, %v1022_v59  ;;  %v3644_v39 = vld [vmem:[#allocation9 + $0x1b8] sm:$0xff]   ;;  %v4847_v49 = vld [vmem:[#allocation2 + $0xc2] sm:$0xff] }
 0x1b8   :  { %5797 = vst [vmem:[#allocation53_spill] sm:$0xff] %v4825_v57  ;;  %5798 = vst [vmem:[#allocation54_spill] sm:$0xff] %v4829_v6  ;;  %3356 = vmatpush3.bf16.msra.mxu1 %v3640_v13  ;;  %3417 = vmatprep.subr.bf16.mxu0 %v3641_v19  ;;  %v4841_v57 = vadd.f32 %v4569_v12, %v4752_v35  ;;  %v4849_v13 = vld [vmem:[#allocation2 + $0xd2] sm:$0xff]  ;;  %v1025_v35 = vld [vmem:[#allocation2 + $0x100] sm:$0xff]  ;;  %v4852_v10 = vpack.c.bf16 %v1022_v59, %v4766_v34 }
 0x1b9   :  { %5799 = vst [vmem:[#allocation55_spill] sm:$0xff] %v4836_v33  ;;  %5801 = vst [vmem:[#allocation57_spill] sm:$0xff] %v4844_v4  ;;  %1918 = vmatmul.mubr.bf16.gmra.mrb[48].mxu1 %v936_v28  ;;  %3509 = vmatprep.subr.bf16.mxu1 %v3645_v26  ;;  %v1024_v19 = vld [vmem:[#allocation2 + $0xf0] sm:$0xff]  ;;  %v4856_v12 = vpack.c.bf16 %v4849_v13, %v4847_v49  ;;  %v5802_v1 = vld [vmem:[#allocation34_spill] sm:$0xff] }
 0x1ba   :  { %5800 = vst [vmem:[#allocation56_spill] sm:$0xff] %v4841_v57  ;;  %2015 = vmatmul.mubr.bf16.gmra.mrb[32].mxu0 %v1000_v5  ;;  %1925 = vmatprep.mubr.bf16.mxu1 %v4504_v46  ;;  %v1034_v5 = vpack.c.bf16 %v1025_v35, %v1024_v19  ;;  %v4861_v28 = vld [vmem:[#allocation2 + $0xe2] sm:$0xff]  ;;  %v4867_v59 = vpack.c.bf16 %v1024_v19, %v1023_v29  ;;  %v4879_v4 = vld [vmem:[#allocation2 + $0x112] sm:$0xff] }
 0x1bb   :  { %2022 = vmatprep.mubr.bf16.mxu0 %v1033_v63  ;;  %3418 = vmatpush3.bf16.msra.mxu0 %v3642_v24  ;;  %v4863_v24 = vld [vmem:[#allocation2 + $0xf2] sm:$0xff]  ;;  %v4865_v34 = vld [vmem:[#allocation2 + $0x120] sm:$0xff] }
 0x1bc   :  { %3419 = vmatprep.subr.bf16.mxu0 %v3643_v38  ;;  %v1026_v38 = vld [vmem:[#allocation2 + $0x110] sm:$0xff]  ;;  %v4871_v63 = vpack.c.bf16 %v4863_v24, %v4861_v28  ;;  %v5803_v19 = vld [vmem:[#allocation33_spill] sm:$0xff] }
 0x1bd   :  { %v4881_v57 = vpack.c.bf16 %v1026_v38, %v1025_v35  ;;  %v1092_v33 = vpack.c.bf16 %v4529_v52, %v5803_v19  ;;  %v5804_v6 = vld [vmem:[#allocation23_spill] sm:$0xff]  ;;  %v5805_v11 = vld [vmem:[#allocation21_spill] sm:$0xff]  ;;  %v1093_v35 = vpack.c.bf16 %v4558_v32, %v4531_v27 }
 0x1be   :  { %v5806_v18 = vpack.c.bf16 %v5804_v6, %v5805_v11  ;;  %v3647_v52 = vld [vmem:[#allocation9 + $0x210] sm:$0xff]   ;;  %v5807_v11 = vld [vmem:[#allocation22_spill] sm:$0xff]  ;;  %v3649_v32 = vld [vmem:[#allocation9 + $0x220] sm:$0xff]  }
 0x1bf   :  { %3420 = vmatpush3.bf16.msra.mxu0 %v3644_v39  ;;  %v1035_v39 = vpack.c.bf16 %v4865_v34, %v1026_v38  ;;  %v3652_v38 = vld [vmem:[#allocation9 + $0x238] sm:$0xff]   ;;  %v5812_v19 = vld [vmem:[#allocation31_spill] sm:$0xff] }
 0x1c1   :  { %1926 = vmatmul.mubr.bf16.gmra.mrb[52].mxu1 %v4852_v10 }
 0x1c2   :  { %2023 = vmatmul.mubr.bf16.gmra.mrb[36].mxu0 %v4856_v12  ;;  %1933 = vmatprep.mubr.bf16.mxu1 %v5802_v1 }
 0x1c3   :  { %2030 = vmatprep.mubr.bf16.mxu0 %v1034_v5  ;;  %v4877_v5 = vld [vmem:[#allocation2 + $0x102] sm:$0xff] }
 0x1c4   :  { %v4885_v29 = vpack.c.bf16 %v4879_v4, %v4877_v5 }
 0x1c9   :  { %1934 = vmatmul.mubr.bf16.gmra.mrb[56].mxu1 %v4867_v59 }
 0x1ca   :  { %2031 = vmatmul.mubr.bf16.gmra.mrb[40].mxu0 %v4871_v63  ;;  %1941 = vmatprep.mubr.bf16.mxu1 %v4541_v17 }
 0x1cb   :  { %2038 = vmatprep.mubr.bf16.mxu0 %v1035_v39  ;;  %v3646_v39 = vld [vmem:[#allocation9 + $0x208] sm:$0xff]  }
 0x1d1   :  { %1942 = vmatmul.mubr.bf16.gmra.mrb[60].mxu1 %v4881_v57 }
 0x1d2   :  { %2039 = vmatmul.mubr.bf16.gmra.mrb[44].mxu0 %v4885_v29  ;;  %2079 = vmatprep.mubr.bf16.mxu1 %v1092_v33  ;;  %v3648_v33 = vld [vmem:[#allocation9 + $0x218] sm:$0xff]  }
 0x1d3   :  { %2176 = vmatprep.mubr.bf16.mxu0 %v4418_v48  ;;  %v1094_v48 = vpack.c.bf16 %v4762_v43, %v4562_v55  ;;  %v3650_v55 = vld [vmem:[#allocation9 + $0x228] sm:$0xff]   ;;  %v5809_v43 = vld [vmem:[#allocation25_spill] sm:$0xff] }
 0x1d9   :  { %2080 = vmatmul.mubr.bf16.vlgmr.msra.gmra.mrb[64].mxu1 %v5806_v18  ;;  %v5808_v18 = vpack.c.bf16 %v4400_v16, %v5807_v11 }
 0x1da   :  { %2177 = vmatmul.mubr.bf16.vlgmr.msra.gmra.mrb[48].mxu0 %v4550_v41  ;;  %3510 = vmatpush3.bf16.msra.mxu1 %v3645_v26  ;;  %v1148_v41 = vld [vmem:[#allocation2 + $0x91] sm:$0xff] }
 0x1db   :  { %2087 = vmatprep.mubr.bf16.mxu1 %v1093_v35  ;;  %2184 = vmatprep.mubr.bf16.mxu0 %v4432_v37  ;;  %v1083_v37 = vld [vmem:[#allocation2 + $0x82] sm:$0xff]  ;;  %v5810_v26 = vld [vmem:[#allocation24_spill] sm:$0xff]  ;;  %v1160_v16 = vpack.c.bf16 %v1148_v41, %v4458_v62 }
 0x1dc   :  { %3511 = vmatprep.subr.bf16.mxu1 %v3646_v39  ;;  %v1095_v27 = vpack.c.bf16 %v1083_v37, %v4764_v53  ;;  %v5811_v6 = vpack.c.bf16 %v5809_v43, %v5810_v26  ;;  %v1096_v53 = vpack.c.bf16 %v4847_v49, %v4813_v7  ;;  %v1091_v7 = vld [vmem:[#allocation2 + $0x122] sm:$0xff] }
 0x1dd   :  { %v1099_v49 = vpack.c.bf16 %v1091_v7, %v4879_v4 }
 0x1de   :  { %3512 = vmatpush3.bf16.msra.mxu1 %v3646_v39  ;;  %v5813_v39 = vpack.c.bf16 %v4458_v62, %v5812_v19  ;;  %v1098_v62 = vpack.c.bf16 %v4877_v5, %v4863_v24 }
 0x1df   :  { %3513 = vmatprep.subr.bf16.mxu1 %v3647_v52 }
 0x1e1   :  { %2088 = vmatmul.mubr.bf16.gmra.mrb[68].mxu1 %v5808_v18 }
 0x1e2   :  { %2185 = vmatmul.mubr.bf16.gmra.mrb[52].mxu0 %v4574_v44  ;;  %2095 = vmatprep.mubr.bf16.mxu1 %v1094_v48  ;;  %v3651_v44 = vld [vmem:[#allocation9 + $0x230] sm:$0xff]  }
 0x1e3   :  { %2192 = vmatprep.mubr.bf16.mxu0 %v5776_v61  ;;  %3514 = vmatpush3.bf16.msra.mxu1 %v3647_v52  ;;  %v1128_v61 = vpack.c.bf16 %v4831_v21, %v4566_v60  ;;  %v5814_v60 = vpack.c.bf16 %v4479_v20, %v4460_v9  ;;  %v1155_v9 = vld [vmem:[#allocation2 + $0x121] sm:$0xff]  ;;  %v1156_v20 = vld [vmem:[#allocation2 + $0x131] sm:$0xff] }
 0x1e4   :  { %3515 = vmatprep.subr.bf16.mxu1 %v3648_v33 }
 0x1e7   :  { %3516 = vmatpush3.bf16.msra.mxu1 %v3648_v33 }
 0x1e8   :  { %3517 = vmatprep.subr.bf16.mxu1 %v3649_v32 }
 0x1e9   :  { %2096 = vmatmul.mubr.bf16.gmra.mrb[72].mxu1 %v5811_v6 }
 0x1ea   :  { %2193 = vmatmul.mubr.bf16.gmra.mrb[56].mxu0 %v4770_v51  ;;  %2103 = vmatprep.mubr.bf16.mxu1 %v1095_v27  ;;  %v1097_v51 = vpack.c.bf16 %v4861_v28, %v4849_v13  ;;  %v5816_v13 = vpack.c.bf16 %v4512_v2, %v4491_v36  ;;  %v5819_v28 = vmov 0   ;;  %v1180_v36 = vld [vmem:[#allocation2 + $0x92] sm:$0xff] }
 0x1eb   :  { %2200 = vmatprep.mubr.bf16.mxu0 %v1160_v16  ;;  %3518 = vmatpush3.bf16.msra.mxu1 %v3649_v32  ;;  %v1192_v2 = vpack.c.bf16 %v1180_v36, %v1083_v37 }
 0x1ec   :  { %3519 = vmatprep.subr.bf16.mxu1 %v3650_v55 }
 0x1ef   :  { %3520 = vmatpush3.bf16.msra.mxu1 %v3650_v55 }
 0x1f0   :  { %3521 = vmatprep.subr.bf16.mxu1 %v3651_v44 }
 0x1f1   :  { %2104 = vmatmul.mubr.bf16.gmra.mrb[76].mxu1 %v5813_v39 }
 0x1f2   :  { %2201 = vmatmul.mubr.bf16.gmra.mrb[60].mxu0 %v1128_v61  ;;  %2111 = vmatprep.mubr.bf16.mxu1 %v1096_v53 }
 0x1f3   :  { %2208 = vmatprep.mubr.bf16.mxu0 %v4504_v46  ;;  %3522 = vmatpush3.bf16.msra.mxu1 %v3651_v44  ;;  %v5815_v46 = vpack.c.bf16 %v4489_v25, %v4481_v3  ;;  %v5817_v3 = vld [vmem:[#allocation36_spill] sm:$0xff] }
 0x1f4   :  { %3523 = vmatprep.subr.bf16.mxu1 %v3652_v38  ;;  %v1067_v25 = vpack.c.bf16 %v1155_v9, %v5817_v3 }
 0x1f7   :  { %3524 = vmatpush3.bf16.msra.mxu1 %v3652_v38 }
 0x1f9   :  { %2112 = vmatmul.mubr.bf16.gmra.mrb[80].mxu1 %v5814_v60 }
 0x1fa   :  { %2209 = vmatmul.mubr.bf16.gmra.mrb[64].mxu0 %v4852_v10  ;;  %2119 = vmatprep.mubr.bf16.mxu1 %v1097_v51  ;;  %v1164_v10 = vpack.c.bf16 %v1156_v20, %v1155_v9  ;;  %v3653_v20 = vld [vmem:[#allocation10] ss:$8 sps:$4 sm:$0xff]  }
 0x1fb   :  { %2216 = vmatprep.mubr.bf16.mxu0 %v5802_v1  ;;  %v1132_v1 = vpack.c.bf16 %v4831_v21, %v4865_v34 }
 0x201   :  { %2120 = vmatmul.mubr.bf16.gmra.mrb[84].mxu1 %v5815_v46 }
 0x202   :  { %2217 = vmatmul.mubr.bf16.gmra.mrb[68].mxu0 %v4867_v59  ;;  %2127 = vmatprep.mubr.bf16.mxu1 %v1098_v62 }
 0x203   :  { %2224 = vmatprep.mubr.bf16.mxu0 %v4541_v17  ;;  %v5818_v17 = vld [vmem:[#allocation38_spill] sm:$0xff] }
 0x209   :  { %2128 = vmatmul.mubr.bf16.gmra.mrb[88].mxu1 %v5816_v13 }
 0x20a   :  { %2225 = vmatmul.mubr.bf16.gmra.mrb[72].mxu0 %v4881_v57  ;;  %2135 = vmatprep.mubr.bf16.mxu1 %v1099_v49  ;;  %v1188_v57 = vld [vmem:[#allocation2 + $0x132] sm:$0xff]  ;;  %v3655_v49 = vld [vmem:[#allocation10 + $0x4] ss:$8 sps:$4 sm:$0xff]  }
 0x20b   :  { %2232 = vmatprep.mubr.bf16.mxu0 %v1164_v10  ;;  %v1196_v21 = vpack.c.bf16 %v1188_v57, %v1091_v7  ;;  %2586 = vmatprep.subr.bf16.mxu0 %v3655_v49 }
 0x20c   :  { %2587 = vmatpush1.bf16.msra.mxu0 %v3653_v20 }
 0x211   :  { %2136 = vmatmul.mubr.bf16.gmra.mrb[92].mxu1 %v1067_v25 }
 0x212   :  { %2233 = vmatmul.mubr.bf16.gmra.mrb[76].mxu0 %v1132_v1  ;;  %3525 = vmatprep.mubr.bf16.mxu1 %v5818_v17 }
 0x213   :  { %2618 = vmatprep.mubr.bf16.mxu0 %v5819_v28 }
 0x219   :  { %3526 = vmatmul.mubr.bf16.vlgmr.msra.gmra.mrb[96].mxu1 %v4586_v54 }
 0x21a   :  { %3529 = vmatprep.mubr.bf16.mxu1 %v4776_v31 }
 0x221   :  { %3530 = vmatmul.mubr.bf16.gmra.mrb[100].mxu1 %v1192_v2 }
 0x222   :  { %3533 = vmatprep.mubr.bf16.mxu1 %v4856_v12 }
 0x229   :  { %3534 = vmatmul.mubr.bf16.gmra.mrb[104].mxu1 %v4871_v63 }
 0x22a   :  { %3537 = vmatprep.mubr.bf16.mxu1 %v4885_v29 }
 0x231   :  { %3538 = vmatmul.mubr.bf16.gmra.mrb[108].mxu1 %v1196_v21 }
 0x267   :  { %v3229_v4 = vpop.f32.mrb[32].mxu1 }
 0x268   :  { %v3230_v34 = vpop.f32.mrb[33].mxu1 }
 0x269   :  { %v3293_v24 = vpop.f32.mrb[16].mxu0  ;;  %v3231_v59 = vadd.f32 %v3230_v34, %v3229_v4  ;;  %v3232_v54 = vpop.f32.mrb[34].mxu1 }
 0x26a   :  { %v3294_v5 = vpop.f32.mrb[17].mxu0  ;;  %v3233_v52 = vpop.f32.mrb[35].mxu1 }
 0x26b   :  { %v3295_v35 = vadd.f32 %v3294_v5, %v3293_v24  ;;  %v3296_v31 = vpop.f32.mrb[18].mxu0  ;;  %v3234_v48 = vadd.f32 %v3233_v52, %v3232_v54  ;;  %v3656_v5 = vld [vmem:[#allocation10 + $0x10] ss:$8 sps:$4 sm:$0xff]   ;;  %v3658_v54 = vld [vmem:[#allocation10 + $0x14] ss:$8 sps:$4 sm:$0xff]  }
 0x26c   :  { %v3297_v33 = vpop.f32.mrb[19].mxu0  ;;  %2588 = vmatprep.subr.bf16.mxu0 %v3658_v54 }
 0x26d   :  { %v4949_v11 = vadd.f32 %v3295_v35, %v3231_v59  ;;  %v3298_v12 = vadd.f32 %v3297_v33, %v3296_v31  ;;  %2589 = vmatpush1.bf16.msra.mxu0 %v3656_v5 }
 0x26f   :  { %v4951_v63 = vadd.f32 %v3298_v12, %v3234_v48  ;;  %v3235_v29 = vpop.f32.mrb[36].mxu1 }
 0x270   :  { %v3236_v32 = vpop.f32.mrb[37].mxu1 }
 0x271   :  { %v3299_v18 = vpop.f32.mrb[20].mxu0  ;;  %v3237_v37 = vadd.f32 %v3236_v32, %v3235_v29  ;;  %v3238_v27 = vpop.f32.mrb[38].mxu1 }
 0x272   :  { %v3300_v41 = vpop.f32.mrb[21].mxu0  ;;  %v3239_v26 = vpop.f32.mrb[39].mxu1 }
 0x273   :  { %v3301_v55 = vadd.f32 %v3300_v41, %v3299_v18  ;;  %v3302_v43 = vpop.f32.mrb[22].mxu0  ;;  %v3240_v6 = vadd.f32 %v3239_v26, %v3238_v27 }
 0x274   :  { %v3303_v16 = vpop.f32.mrb[23].mxu0 }
 0x275   :  { %v4953_v44 = vadd.f32 %v3301_v55, %v3237_v37  ;;  %v3304_v61 = vadd.f32 %v3303_v16, %v3302_v43 }
 0x277   :  { %v4955_v53 = vadd.f32 %v3304_v61, %v3240_v6  ;;  %v3241_v38 = vpop.f32.mrb[40].mxu1 }
 0x278   :  { %v3242_v39 = vpop.f32.mrb[41].mxu1 }
 0x279   :  { %v3305_v19 = vpop.f32.mrb[24].mxu0  ;;  %v3243_v51 = vadd.f32 %v3242_v39, %v3241_v38  ;;  %v3244_v62 = vpop.f32.mrb[42].mxu1 }
 0x27a   :  { %v3306_v60 = vpop.f32.mrb[25].mxu0  ;;  %v3245_v9 = vpop.f32.mrb[43].mxu1 }
 0x27b   :  { %v3307_v46 = vadd.f32 %v3306_v60, %v3305_v19  ;;  %v3308_v7 = vpop.f32.mrb[26].mxu0  ;;  %v3246_v13 = vadd.f32 %v3245_v9, %v3244_v62 }
 0x27c   :  { %v3309_v10 = vpop.f32.mrb[27].mxu0 }
 0x27d   :  { %v4957_v3 = vadd.f32 %v3307_v46, %v3243_v51  ;;  %v3310_v25 = vadd.f32 %v3309_v10, %v3308_v7 }
 0x27f   :  { %v4959_v1 = vadd.f32 %v3310_v25, %v3246_v13 }
 0x284   :  { %v3247_v17 = vpop.f32.mrb[44].mxu1 }
 0x285   :  { %v3311_v36 = vpop.f32.mrb[28].mxu0  ;;  %v3248_v2 = vpop.f32.mrb[45].mxu1 }
 0x286   :  { %v3249_v57 = vadd.f32 %v3248_v2, %v3247_v17  ;;  %v3312_v21 = vpop.f32.mrb[29].mxu0  ;;  %v3250_v4 = vpop.f32.mrb[46].mxu1 }
 0x287   :  { %v3313_v24 = vadd.f32 %v3312_v21, %v3311_v36  ;;  %v3314_v34 = vpop.f32.mrb[30].mxu0  ;;  %v3251_v59 = vpop.f32.mrb[47].mxu1 }
 0x288   :  { %v3252_v35 = vadd.f32 %v3251_v59, %v3250_v4  ;;  %v3315_v31 = vpop.f32.mrb[31].mxu0 }
 0x289   :  { %v4961_v52 = vadd.f32 %v3313_v24, %v3249_v57  ;;  %v3316_v48 = vadd.f32 %v3315_v31, %v3314_v34 }
 0x28b   :  { %v4963_v33 = vadd.f32 %v3316_v48, %v3252_v35 }
 0x28c   :  { %v3253_v12 = vpop.f32.mrb[48].mxu1 }
 0x28d   :  { %v3317_v29 = vpop.f32.mrb[32].mxu0  ;;  %v3254_v18 = vpop.f32.mrb[49].mxu1 }
 0x28e   :  { %v3255_v32 = vadd.f32 %v3254_v18, %v3253_v12  ;;  %v3318_v37 = vpop.f32.mrb[33].mxu0  ;;  %v3256_v41 = vpop.f32.mrb[50].mxu1 }
 0x28f   :  { %v3319_v27 = vadd.f32 %v3318_v37, %v3317_v29  ;;  %v3320_v55 = vpop.f32.mrb[34].mxu0  ;;  %v3257_v43 = vpop.f32.mrb[51].mxu1 }
 0x290   :  { %v3258_v26 = vadd.f32 %v3257_v43, %v3256_v41  ;;  %v3321_v6 = vpop.f32.mrb[35].mxu0 }
 0x291   :  { %v4965_v16 = vadd.f32 %v3319_v27, %v3255_v32  ;;  %v3322_v61 = vadd.f32 %v3321_v6, %v3320_v55 }
 0x293   :  { %v4967_v38 = vadd.f32 %v3322_v61, %v3258_v26 }
 0x294   :  { %v3259_v19 = vpop.f32.mrb[52].mxu1 }
 0x295   :  { %v3323_v39 = vpop.f32.mrb[36].mxu0  ;;  %v3260_v51 = vpop.f32.mrb[53].mxu1 }
 0x296   :  { %v3261_v60 = vadd.f32 %v3260_v51, %v3259_v19  ;;  %v3324_v62 = vpop.f32.mrb[37].mxu0  ;;  %v3262_v46 = vpop.f32.mrb[54].mxu1 }
 0x297   :  { %v3325_v7 = vadd.f32 %v3324_v62, %v3323_v39  ;;  %v3326_v9 = vpop.f32.mrb[38].mxu0  ;;  %v3263_v20 = vpop.f32.mrb[55].mxu1 }
 0x298   :  { %v3264_v49 = vadd.f32 %v3263_v20, %v3262_v46  ;;  %v3327_v13 = vpop.f32.mrb[39].mxu0 }
 0x299   :  { %v4969_v10 = vadd.f32 %v3325_v7, %v3261_v60  ;;  %v3328_v25 = vadd.f32 %v3327_v13, %v3326_v9 }
 0x29b   :  { %v4971_v17 = vadd.f32 %v3328_v25, %v3264_v49 }
 0x29c   :  { %v3265_v36 = vpop.f32.mrb[56].mxu1 }
 0x29d   :  { %v3329_v2 = vpop.f32.mrb[40].mxu0  ;;  %v3266_v57 = vpop.f32.mrb[57].mxu1 }
 0x29e   :  { %v3267_v21 = vadd.f32 %v3266_v57, %v3265_v36  ;;  %v3330_v4 = vpop.f32.mrb[41].mxu0  ;;  %v3268_v24 = vpop.f32.mrb[58].mxu1 }
 0x29f   :  { %v3331_v34 = vadd.f32 %v3330_v4, %v3329_v2  ;;  %v3332_v59 = vpop.f32.mrb[42].mxu0  ;;  %v3269_v5 = vpop.f32.mrb[59].mxu1 }
 0x2a0   :  { %v3270_v54 = vadd.f32 %v3269_v5, %v3268_v24  ;;  %v3333_v35 = vpop.f32.mrb[43].mxu0 }
 0x2a1   :  { %v4973_v31 = vadd.f32 %v3331_v34, %v3267_v21  ;;  %v3334_v48 = vadd.f32 %v3333_v35, %v3332_v59  ;;  %v3659_v35 = vld [vmem:[#allocation10 + $0x20] ss:$8 sps:$4 sm:$0xff]  }
 0x2a3   :  { %v4975_v12 = vadd.f32 %v3334_v48, %v3270_v54  ;;  %v3661_v48 = vld [vmem:[#allocation10 + $0x24] ss:$8 sps:$4 sm:$0xff]  }
 0x2a4   :  { %v3271_v29 = vpop.f32.mrb[60].mxu1  ;;  %2590 = vmatprep.subr.bf16.mxu0 %v3661_v48 }
 0x2a5   :  { %v3335_v18 = vpop.f32.mrb[44].mxu0  ;;  %v3272_v32 = vpop.f32.mrb[61].mxu1  ;;  %2591 = vmatpush1.bf16.msra.mxu0 %v3659_v35 }
 0x2a6   :  { %v3273_v37 = vadd.f32 %v3272_v32, %v3271_v29  ;;  %v3336_v41 = vpop.f32.mrb[45].mxu0  ;;  %v3274_v27 = vpop.f32.mrb[62].mxu1 }
 0x2a7   :  { %v3337_v55 = vadd.f32 %v3336_v41, %v3335_v18  ;;  %v3338_v43 = vpop.f32.mrb[46].mxu0  ;;  %v3275_v26 = vpop.f32.mrb[63].mxu1 }
 0x2a8   :  { %v3276_v6 = vadd.f32 %v3275_v26, %v3274_v27  ;;  %v3339_v61 = vpop.f32.mrb[47].mxu0  ;;  %v3662_v26 = vld [vmem:[#allocation10 + $0x30] ss:$8 sps:$4 sm:$0xff]  }
 0x2a9   :  { %v4977_v19 = vadd.f32 %v3337_v55, %v3273_v37  ;;  %v3340_v39 = vadd.f32 %v3339_v61, %v3338_v43  ;;  %v3664_v37 = vld [vmem:[#allocation10 + $0x34] ss:$8 sps:$4 sm:$0xff]   ;;  %v3667_v61 = vld [vmem:[#allocation10 + $0x44] ss:$8 sps:$4 sm:$0xff]  }
 0x2aa   :  { %2592 = vmatprep.subr.bf16.mxu0 %v3664_v37 }
 0x2ab   :  { %v4979_v51 = vadd.f32 %v3340_v39, %v3276_v6  ;;  %2593 = vmatpush1.bf16.msra.mxu0 %v3662_v26 }
 0x2ac   :  { %v3357_v60 = vpop.f32.mrb[64].mxu1  ;;  %2594 = vmatprep.subr.bf16.mxu0 %v3667_v61 }
 0x2ad   :  { %v3421_v62 = vpop.f32.mrb[48].mxu0  ;;  %v3358_v46 = vpop.f32.mrb[65].mxu1 }
 0x2ae   :  { %v3359_v7 = vadd.f32 %v3358_v46, %v3357_v60  ;;  %v3422_v9 = vpop.f32.mrb[49].mxu0  ;;  %v3360_v20 = vpop.f32.mrb[66].mxu1 }
 0x2af   :  { %v3423_v49 = vadd.f32 %v3422_v9, %v3421_v62  ;;  %v3424_v13 = vpop.f32.mrb[50].mxu0  ;;  %v3361_v25 = vpop.f32.mrb[67].mxu1 }
 0x2b0   :  { %v2082_v36 = vadd.f32 %v3359_v7, %v4949_v11  ;;  %v3362_v2 = vadd.f32 %v3361_v25, %v3360_v20  ;;  %v3425_v57 = vpop.f32.mrb[51].mxu0  ;;  %v3665_v7 = vld [vmem:[#allocation10 + $0x40] ss:$8 sps:$4 sm:$0xff]  }
 0x2b1   :  { %v3426_v21 = vadd.f32 %v3425_v57, %v3424_v13  ;;  %2595 = vmatpush1.bf16.msra.mxu0 %v3665_v7 }
 0x2b2   :  { %v2085_v4 = vadd.f32 %v3362_v2, %v4951_v63  ;;  %v4983_v24 = vadd.f32 %v3423_v49, %v2082_v36 }
 0x2b4   :  { %v3363_v34 = vpop.f32.mrb[68].mxu1  ;;  %v4985_v59 = vadd.f32 %v3426_v21, %v2085_v4 }
 0x2b5   :  { %v3427_v5 = vpop.f32.mrb[52].mxu0  ;;  %v3364_v54 = vpop.f32.mrb[69].mxu1 }
 0x2b6   :  { %v3365_v29 = vadd.f32 %v3364_v54, %v3363_v34  ;;  %v3428_v18 = vpop.f32.mrb[53].mxu0  ;;  %v3366_v32 = vpop.f32.mrb[70].mxu1  ;;  %v3668_v34 = vld [vmem:[#allocation10 + $0x50] ss:$8 sps:$4 sm:$0xff]   ;;  %v3673_v54 = vld [vmem:[#allocation10 + $0x64] ss:$8 sps:$4 sm:$0xff]  }
 0x2b7   :  { %v3429_v41 = vadd.f32 %v3428_v18, %v3427_v5  ;;  %v3430_v11 = vpop.f32.mrb[54].mxu0  ;;  %v3367_v27 = vpop.f32.mrb[71].mxu1 }
 0x2b8   :  { %v2090_v55 = vadd.f32 %v3365_v29, %v4953_v44  ;;  %v3368_v63 = vadd.f32 %v3367_v27, %v3366_v32  ;;  %v3431_v43 = vpop.f32.mrb[55].mxu0  ;;  %v3670_v44 = vld [vmem:[#allocation10 + $0x54] ss:$8 sps:$4 sm:$0xff]   ;;  %v3671_v32 = vld [vmem:[#allocation10 + $0x60] ss:$8 sps:$4 sm:$0xff]  }
 0x2b9   :  { %v3432_v6 = vadd.f32 %v3431_v43, %v3430_v11  ;;  %2596 = vmatprep.subr.bf16.mxu0 %v3670_v44 }
 0x2ba   :  { %v2093_v39 = vadd.f32 %v3368_v63, %v4955_v53  ;;  %v4989_v60 = vadd.f32 %v3429_v41, %v2090_v55  ;;  %2597 = vmatpush1.bf16.msra.mxu0 %v3668_v34 }
 0x2bb   :  { %2598 = vmatprep.subr.bf16.mxu0 %v3673_v54 }
 0x2bc   :  { %v3369_v62 = vpop.f32.mrb[72].mxu1  ;;  %v4991_v46 = vadd.f32 %v3432_v6, %v2093_v39  ;;  %v3674_v39 = vld [vmem:[#allocation10 + $0x70] ss:$8 sps:$4 sm:$0xff]  }
 0x2bd   :  { %v3433_v9 = vpop.f32.mrb[56].mxu0  ;;  %v3370_v20 = vpop.f32.mrb[73].mxu1 }
 0x2be   :  { %v3371_v49 = vadd.f32 %v3370_v20, %v3369_v62  ;;  %v3434_v13 = vpop.f32.mrb[57].mxu0  ;;  %v3372_v25 = vpop.f32.mrb[74].mxu1  ;;  %2599 = vmatpush1.bf16.msra.mxu0 %v3671_v32 }
 0x2bf   :  { %v3435_v36 = vadd.f32 %v3434_v13, %v3433_v9  ;;  %v3436_v2 = vpop.f32.mrb[58].mxu0  ;;  %v3373_v57 = vpop.f32.mrb[75].mxu1 }
 0x2c0   :  { %v2098_v21 = vadd.f32 %v3371_v49, %v4957_v3  ;;  %v3374_v53 = vadd.f32 %v3373_v57, %v3372_v25  ;;  %v3437_v4 = vpop.f32.mrb[59].mxu0  ;;  %v3676_v3 = vld [vmem:[#allocation10 + $0x74] ss:$8 sps:$4 sm:$0xff]  }
 0x2c1   :  { %v3438_v5 = vadd.f32 %v3437_v4, %v3436_v2  ;;  %2600 = vmatprep.subr.bf16.mxu0 %v3676_v3 }
 0x2c2   :  { %v2101_v35 = vadd.f32 %v3374_v53, %v4959_v1  ;;  %v4995_v48 = vadd.f32 %v3435_v36, %v2098_v21  ;;  %2601 = vmatpush1.bf16.msra.mxu0 %v3674_v39 }
 0x2c4   :  { %v3375_v29 = vpop.f32.mrb[76].mxu1  ;;  %v4997_v18 = vadd.f32 %v3438_v5, %v2101_v35 }
 0x2c5   :  { %v3439_v37 = vpop.f32.mrb[60].mxu0  ;;  %v3376_v41 = vpop.f32.mrb[77].mxu1 }
 0x2c6   :  { %v3377_v11 = vadd.f32 %v3376_v41, %v3375_v29  ;;  %v3440_v27 = vpop.f32.mrb[61].mxu0  ;;  %v3378_v55 = vpop.f32.mrb[78].mxu1 }
 0x2c7   :  { %v3441_v63 = vadd.f32 %v3440_v27, %v3439_v37  ;;  %v3442_v43 = vpop.f32.mrb[62].mxu0  ;;  %v3379_v26 = vpop.f32.mrb[79].mxu1 }
 0x2c8   :  { %v2106_v6 = vadd.f32 %v3377_v11, %v4961_v52  ;;  %v3380_v1 = vadd.f32 %v3379_v26, %v3378_v55  ;;  %v3443_v61 = vpop.f32.mrb[63].mxu0 }
 0x2c9   :  { %v3444_v62 = vadd.f32 %v3443_v61, %v3442_v43 }
 0x2ca   :  { %v2109_v7 = vadd.f32 %v3380_v1, %v4963_v33  ;;  %v5001_v9 = vadd.f32 %v3441_v63, %v2106_v6 }
 0x2cc   :  { %v3381_v20 = vpop.f32.mrb[80].mxu1  ;;  %v5003_v44 = vadd.f32 %v3444_v62, %v2109_v7 }
 0x2cd   :  { %v3445_v49 = vpop.f32.mrb[64].mxu0  ;;  %v3382_v13 = vpop.f32.mrb[81].mxu1 }
 0x2ce   :  { %v3383_v25 = vadd.f32 %v3382_v13, %v3381_v20  ;;  %v3446_v36 = vpop.f32.mrb[65].mxu0  ;;  %v3384_v2 = vpop.f32.mrb[82].mxu1 }
 0x2cf   :  { %v3447_v52 = vadd.f32 %v3446_v36, %v3445_v49  ;;  %v3448_v57 = vpop.f32.mrb[66].mxu0  ;;  %v3385_v21 = vpop.f32.mrb[83].mxu1 }
 0x2d0   :  { %v2114_v53 = vadd.f32 %v3383_v25, %v4965_v16  ;;  %v3386_v4 = vadd.f32 %v3385_v21, %v3384_v2  ;;  %v3449_v34 = vpop.f32.mrb[67].mxu0 }
 0x2d1   :  { %v3450_v5 = vadd.f32 %v3449_v34, %v3448_v57 }
 0x2d2   :  { %v2117_v33 = vadd.f32 %v3386_v4, %v4967_v38  ;;  %v5007_v54 = vadd.f32 %v3447_v52, %v2114_v53 }
 0x2d4   :  { %v3387_v35 = vpop.f32.mrb[84].mxu1  ;;  %v5009_v29 = vadd.f32 %v3450_v5, %v2117_v33 }
 0x2d5   :  { %v3451_v32 = vpop.f32.mrb[68].mxu0  ;;  %v3388_v37 = vpop.f32.mrb[85].mxu1 }
 0x2d6   :  { %v3389_v41 = vadd.f32 %v3388_v37, %v3387_v35  ;;  %v3452_v3 = vpop.f32.mrb[69].mxu0  ;;  %v3390_v11 = vpop.f32.mrb[86].mxu1 }
 0x2d7   :  { %v3453_v27 = vadd.f32 %v3452_v3, %v3451_v32  ;;  %v3454_v55 = vpop.f32.mrb[70].mxu0  ;;  %v3391_v63 = vpop.f32.mrb[87].mxu1 }
 0x2d8   :  { %v2122_v16 = vadd.f32 %v3389_v41, %v4969_v10  ;;  %v3392_v43 = vadd.f32 %v3391_v63, %v3390_v11  ;;  %v3455_v26 = vpop.f32.mrb[71].mxu0 }
 0x2d9   :  { %v3456_v6 = vadd.f32 %v3455_v26, %v3454_v55 }
 0x2da   :  { %v2125_v38 = vadd.f32 %v3392_v43, %v4971_v17  ;;  %v5013_v1 = vadd.f32 %v3453_v27, %v2122_v16 }
 0x2dc   :  { %v3393_v61 = vpop.f32.mrb[88].mxu1  ;;  %v5015_v39 = vadd.f32 %v3456_v6, %v2125_v38 }
 0x2dd   :  { %v3457_v62 = vpop.f32.mrb[72].mxu0  ;;  %v3394_v7 = vpop.f32.mrb[89].mxu1 }
 0x2de   :  { %v3395_v20 = vadd.f32 %v3394_v7, %v3393_v61  ;;  %v3458_v49 = vpop.f32.mrb[73].mxu0  ;;  %v3396_v13 = vpop.f32.mrb[90].mxu1 }
 0x2df   :  { %v3459_v25 = vadd.f32 %v3458_v49, %v3457_v62  ;;  %v3460_v36 = vpop.f32.mrb[74].mxu0  ;;  %v3397_v2 = vpop.f32.mrb[91].mxu1 }
 0x2e0   :  { %v2130_v10 = vadd.f32 %v3395_v20, %v4973_v31  ;;  %v3398_v52 = vadd.f32 %v3397_v2, %v3396_v13  ;;  %v3461_v57 = vpop.f32.mrb[75].mxu0 }
 0x2e1   :  { %v3462_v21 = vadd.f32 %v3461_v57, %v3460_v36 }
 0x2e2   :  { %v2133_v17 = vadd.f32 %v3398_v52, %v4975_v12  ;;  %v5019_v53 = vadd.f32 %v3459_v25, %v2130_v10 }
 0x2e4   :  { %v3399_v4 = vpop.f32.mrb[92].mxu1  ;;  %v5021_v34 = vadd.f32 %v3462_v21, %v2133_v17 }
 0x2e5   :  { %v3463_v5 = vpop.f32.mrb[76].mxu0  ;;  %v3400_v33 = vpop.f32.mrb[93].mxu1 }
 0x2e6   :  { %v3401_v35 = vadd.f32 %v3400_v33, %v3399_v4  ;;  %v3464_v32 = vpop.f32.mrb[77].mxu0  ;;  %v3402_v37 = vpop.f32.mrb[94].mxu1 }
 0x2e7   :  { %v3465_v41 = vadd.f32 %v3464_v32, %v3463_v5  ;;  %v3466_v3 = vpop.f32.mrb[78].mxu0  ;;  %v3403_v11 = vpop.f32.mrb[95].mxu1 }
 0x2e8   :  { %v2138_v31 = vadd.f32 %v3401_v35, %v4977_v19  ;;  %v3404_v27 = vadd.f32 %v3403_v11, %v3402_v37  ;;  %v3467_v55 = vpop.f32.mrb[79].mxu0 }
 0x2e9   :  { %v3468_v63 = vadd.f32 %v3467_v55, %v3466_v3 }
 0x2ea   :  { %v2141_v12 = vadd.f32 %v3404_v27, %v4979_v51  ;;  %v2235_v16 = vadd.f32 %v3465_v41, %v2138_v31 }
 0x2ec   :  { %v3527_v43 = vpop.f32.mrb[96].mxu1  ;;  %v2238_v26 = vadd.f32 %v3468_v63, %v2141_v12 }
 0x2ed   :  { %v5026_v6 = vadd.f32 %v3527_v43, %v4989_v60  ;;  %v2275_v38 = vpop.f32.mrb[97].mxu1 }
 0x2ee   :  { %v5029_v61 = vadd.f32 %v2275_v38, %v4983_v24  ;;  %v3528_v62 = vpop.f32.mrb[98].mxu1 }
 0x2ef   :  { %v5032_v7 = vadd.f32 %v3528_v62, %v4991_v46  ;;  %v2278_v19 = vpop.f32.mrb[99].mxu1  ;;  %v2364_v24 = vmul.f32 %v5026_v6, %v5026_v6 }
 0x2f0   :  { %v5035_v20 = vadd.f32 %v2278_v19, %v4985_v59  ;;  %v2362_v51 = vmul.f32 %v5029_v61, %v5029_v61 }
 0x2f1   :  { %v2365_v2 = vmul.f32 %v5032_v7, %v5032_v7 }
 0x2f2   :  { %v2340_v49 = vadd.f32 %v5035_v20, %v5029_v61  ;;  %v2363_v60 = vmul.f32 %v5035_v20, %v5035_v20 }
 0x2f4   :  { %v2341_v13 = vadd.f32 %v2340_v49, %v5026_v6  ;;  %v2378_v46 = vadd.f32 %v2363_v60, %v2362_v51  ;;  %v3531_v25 = vpop.f32.mrb[100].mxu1 }
 0x2f5   :  { %v5047_v36 = vadd.f32 %v3531_v25, %v5001_v9  ;;  %v2291_v59 = vpop.f32.mrb[101].mxu1 }
 0x2f6   :  { %v2379_v10 = vadd.f32 %v2378_v46, %v2364_v24  ;;  %v5052_v52 = vadd.f32 %v2291_v59, %v4995_v48  ;;  %v2342_v57 = vadd.f32 %v2341_v13, %v5032_v7  ;;  %v3532_v21 = vpop.f32.mrb[102].mxu1 }
 0x2f7   :  { %v5056_v17 = vadd.f32 %v3532_v21, %v5003_v44  ;;  %v2294_v4 = vpop.f32.mrb[103].mxu1  ;;  %v2368_v44 = vmul.f32 %v5047_v36, %v5047_v36 }
 0x2f8   :  { %v2343_v5 = vadd.f32 %v2342_v57, %v5052_v52  ;;  %v2366_v9 = vmul.f32 %v5052_v52, %v5052_v52  ;;  %v2380_v33 = vadd.f32 %v2379_v10, %v2365_v2  ;;  %v5062_v35 = vadd.f32 %v2294_v4, %v4997_v18 }
 0x2f9   :  { %v2369_v18 = vmul.f32 %v5056_v17, %v5056_v17 }
 0x2fa   :  { %v2381_v32 = vadd.f32 %v2380_v33, %v2366_v9  ;;  %v2344_v48 = vadd.f32 %v2343_v5, %v5062_v35  ;;  %v2367_v37 = vmul.f32 %v5062_v35, %v5062_v35 }
 0x2fc   :  { %v2345_v41 = vadd.f32 %v2344_v48, %v5047_v36  ;;  %v2382_v3 = vadd.f32 %v2381_v32, %v2367_v37  ;;  %v3535_v11 = vpop.f32.mrb[104].mxu1 }
 0x2fd   :  { %v5071_v31 = vadd.f32 %v3535_v11, %v5013_v1  ;;  %v2307_v27 = vpop.f32.mrb[105].mxu1 }
 0x2fe   :  { %v2383_v55 = vadd.f32 %v2382_v3, %v2368_v44  ;;  %v5076_v63 = vadd.f32 %v2307_v27, %v5007_v54  ;;  %v2346_v12 = vadd.f32 %v2345_v41, %v5056_v17  ;;  %v3536_v43 = vpop.f32.mrb[106].mxu1 }
 0x2ff   :  { %v5080_v38 = vadd.f32 %v3536_v43, %v5015_v39  ;;  %v2310_v62 = vpop.f32.mrb[107].mxu1  ;;  %v2372_v39 = vmul.f32 %v5071_v31, %v5071_v31 }
 0x300   :  { %v2347_v19 = vadd.f32 %v2346_v12, %v5076_v63  ;;  %v2370_v1 = vmul.f32 %v5076_v63, %v5076_v63  ;;  %v2384_v51 = vadd.f32 %v2383_v55, %v2369_v18  ;;  %v5086_v49 = vadd.f32 %v2310_v62, %v5009_v29 }
 0x301   :  { %v2373_v29 = vmul.f32 %v5080_v38, %v5080_v38 }
 0x302   :  { %v2385_v60 = vadd.f32 %v2384_v51, %v2370_v1  ;;  %v2348_v54 = vadd.f32 %v2347_v19, %v5086_v49  ;;  %v2371_v24 = vmul.f32 %v5086_v49, %v5086_v49 }
 0x304   :  { %v2349_v13 = vadd.f32 %v2348_v54, %v5071_v31  ;;  %v2386_v46 = vadd.f32 %v2385_v60, %v2371_v24  ;;  %v3539_v25 = vpop.f32.mrb[108].mxu1 }
 0x305   :  { %v5094_v59 = vadd.f32 %v3539_v25, %v2235_v16  ;;  %v2323_v2 = vpop.f32.mrb[109].mxu1 }
 0x306   :  { %v2387_v10 = vadd.f32 %v2386_v46, %v2372_v39  ;;  %v5099_v57 = vadd.f32 %v2323_v2, %v5019_v53  ;;  %v2350_v21 = vadd.f32 %v2349_v13, %v5080_v38  ;;  %v3540_v4 = vpop.f32.mrb[110].mxu1 }
 0x307   :  { %v5102_v5 = vadd.f32 %v3540_v4, %v2238_v26  ;;  %v2326_v9 = vpop.f32.mrb[111].mxu1  ;;  %v2376_v53 = vmul.f32 %v5094_v59, %v5094_v59 }
 0x308   :  { %v2351_v33 = vadd.f32 %v2350_v21, %v5099_v57  ;;  %v2374_v16 = vmul.f32 %v5099_v57, %v5099_v57  ;;  %v2388_v32 = vadd.f32 %v2387_v10, %v2373_v29  ;;  %v2327_v48 = vadd.f32 %v2326_v9, %v5021_v34 }
 0x309   :  { %v2377_v26 = vmul.f32 %v5102_v5, %v5102_v5 }
 0x30a   :  { %v2389_v37 = vadd.f32 %v2388_v32, %v2374_v16  ;;  %v2352_v44 = vadd.f32 %v2351_v33, %v2327_v48  ;;  %v2375_v41 = vmul.f32 %v2327_v48, %v2327_v48 }
 0x30c   :  { %v2353_v3 = vadd.f32 %v2352_v44, %v5094_v59  ;;  %v2390_v11 = vadd.f32 %v2389_v37, %v2375_v41  ;;  %v5820_v41 = vld [vmem:[#allocation30_spill] sm:$0xff] }
 0x30e   :  { %v2354_v27 = vadd.f32 %v2353_v3, %v5102_v5  ;;  %v2391_v18 = vadd.f32 %v2390_v11, %v2376_v53 }
 0x310   :  { %v2355_v55 = vrot.slane %v2354_v27, 4  ;;  %v2392_v12 = vadd.f32 %v2391_v18, %v2377_v26 }
 0x312   :  { %v2356_v43 = vadd.f32 %v2355_v55, %v2354_v27  ;;  %v2393_v62 = vrot.slane %v2392_v12, 4 }
 0x314   :  { %v2357_v34 = vrot.slane %v2356_v43, 2  ;;  %v2394_v19 = vadd.f32 %v2393_v62, %v2392_v12 }
 0x316   :  { %v2358_v1 = vadd.f32 %v2357_v34, %v2356_v43  ;;  %v2395_v51 = vrot.slane %v2394_v19, 2 }
 0x318   :  { %v2359_v60 = vrot.slane %v2358_v1, 1  ;;  %v2396_v54 = vadd.f32 %v2395_v51, %v2394_v19 }
 0x31a   :  { %v2360_v24 = vadd.f32 %v2359_v60, %v2358_v1  ;;  %v2397_v39 = vrot.slane %v2396_v54, 1 }
 0x31c   :  { %v5114_v13 = vmul.f32 0.0078125, %v2360_v24  ;;  %v2398_v46 = vadd.f32 %v2397_v39, %v2396_v54 }
 0x31e   :  { %v2399_v25 = vmul.f32 0.0078125, %v2398_v46  ;;  %v2400_v2 = vmul.f32 %v5114_v13, %v5114_v13  ;;  %v2416_v29 = vsub.f32 %v2327_v48, %v5114_v13  ;;  %v2403_v10 = vsub.f32 %v5029_v61, %v5114_v13 }
 0x31f   :  { %v2404_v21 = vsub.f32 %v5035_v20, %v5114_v13  ;;  %v2405_v4 = vsub.f32 %v5026_v6, %v5114_v13  ;;  %v2406_v9 = vsub.f32 %v5032_v7, %v5114_v13  ;;  %v2407_v33 = vsub.f32 %v5052_v52, %v5114_v13 }
 0x320   :  { %v2401_v16 = vsub.f32 %v2399_v25, %v2400_v2  ;;  %v2408_v32 = vsub.f32 %v5062_v35, %v5114_v13  ;;  %v2409_v48 = vsub.f32 %v5047_v36, %v5114_v13  ;;  %v2410_v61 = vsub.f32 %v5056_v17, %v5114_v13 }
 0x321   :  { %v2411_v20 = vsub.f32 %v5076_v63, %v5114_v13  ;;  %v2412_v6 = vsub.f32 %v5086_v49, %v5114_v13  ;;  %v2413_v7 = vsub.f32 %v5071_v31, %v5114_v13  ;;  %v2414_v52 = vsub.f32 %v5080_v38, %v5114_v13  ;;  %v2338_v49 = vld [vmem:[%s5644_s5] sm:$0x1] }
 0x322   :  { %v2402_v37 = vmax.f32 %v2401_v16, 0.0  ;;  %v2415_v35 = vsub.f32 %v5099_v57, %v5114_v13  ;;  %v2417_v36 = vsub.f32 %v5094_v59, %v5114_v13  ;;  %v2418_v17 = vsub.f32 %v5102_v5, %v5114_v13  ;;  %v3184_v57 = vld [vmem:[%s5645_s6] ss:$0 sm:$0xff] }
 0x324   :  { %v2419_v63 = vadd.f32 1e-05, %v2402_v37 }
 0x326   :  { %3683 = vrsqrt.f32 %v2419_v63 }
 0x330   :  { %v3684_v31 = vpop.eup %3683 }
 0x331   :  { %v2421_v44 = vmul.f32 %v3684_v31, %v2338_v49 }
 0x333   :  { %v2426_v38 = vrot.slane %v2421_v44, %v5820_v41 }
 0x335   :  { %v2441_v53 = vmul.f32 %v2426_v38, %v2416_v29  ;;  %v2428_v3 = vmul.f32 %v2426_v38, %v2403_v10  ;;  %v2429_v59 = vmul.f32 %v2426_v38, %v2404_v21  ;;  %v2430_v11 = vmul.f32 %v2426_v38, %v2405_v4 }
 0x336   :  { %v2431_v26 = vmul.f32 %v2426_v38, %v2406_v9  ;;  %v2432_v5 = vmul.f32 %v2426_v38, %v2407_v33  ;;  %v2433_v27 = vmul.f32 %v2426_v38, %v2408_v32  ;;  %v2434_v18 = vmul.f32 %v2426_v38, %v2409_v48 }
 0x337   :  { %v2450_v55 = vadd.f32 %v3184_v57, %v2428_v3  ;;  %v2451_v12 = vadd.f32 %v3184_v57, %v2429_v59  ;;  %v2452_v43 = vadd.f32 %v3184_v57, %v2430_v11  ;;  %v2435_v62 = vmul.f32 %v2426_v38, %v2410_v61 }
 0x338   :  { %v2453_v34 = vadd.f32 %v3184_v57, %v2431_v26  ;;  %v2454_v19 = vadd.f32 %v3184_v57, %v2432_v5  ;;  %v2455_v1 = vadd.f32 %v3184_v57, %v2433_v27  ;;  %v2456_v51 = vadd.f32 %v3184_v57, %v2434_v18 }
 0x339   :  { %v2466_v60 = vmax.f32 %v2450_v55, 0.0  ;;  %v2467_v54 = vmax.f32 %v2451_v12, 0.0  ;;  %v2468_v24 = vmax.f32 %v2452_v43, 0.0  ;;  %v2457_v39 = vadd.f32 %v3184_v57, %v2435_v62 }
 0x33a   :  { %v2469_v13 = vmax.f32 %v2453_v34, 0.0  ;;  %v2470_v46 = vmax.f32 %v2454_v19, 0.0  ;;  %v2471_v25 = vmax.f32 %v2455_v1, 0.0  ;;  %v2472_v2 = vmax.f32 %v2456_v51, 0.0 }
 0x33b   :  { %v2482_v29 = vpack.c.bf16 %v2467_v54, %v2466_v60  ;;  %v2473_v10 = vmax.f32 %v2457_v39, 0.0  ;;  %v2436_v21 = vmul.f32 %v2426_v38, %v2411_v20  ;;  %v2437_v4 = vmul.f32 %v2426_v38, %v2412_v6 }
 0x33c   :  { %v2483_v9 = vpack.c.bf16 %v2469_v13, %v2468_v24  ;;  %v2484_v33 = vpack.c.bf16 %v2471_v25, %v2470_v46  ;;  %v2438_v16 = vmul.f32 %v2426_v38, %v2413_v7  ;;  %v2439_v32 = vmul.f32 %v2426_v38, %v2414_v52 }
 0x33d   :  { %2619 = vmatmul.mubr.bf16.vlgmr.msra.gmra.mrb[80].mxu0 %v2482_v29  ;;  %v2485_v48 = vpack.c.bf16 %v2473_v10, %v2472_v2  ;;  %v2458_v61 = vadd.f32 %v3184_v57, %v2436_v21  ;;  %v2459_v37 = vadd.f32 %v3184_v57, %v2437_v4  ;;  %v2440_v63 = vmul.f32 %v2426_v38, %v2415_v35 }
 0x33e   :  { %2628 = vmatprep.mubr.bf16.mxu0 %v5819_v28  ;;  %v2460_v49 = vadd.f32 %v3184_v57, %v2438_v16  ;;  %v2461_v31 = vadd.f32 %v3184_v57, %v2439_v32  ;;  %v2463_v44 = vadd.f32 %v3184_v57, %v2441_v53  ;;  %v2442_v3 = vmul.f32 %v2426_v38, %v2417_v36 }
 0x33f   :  { %v2474_v59 = vmax.f32 %v2458_v61, 0.0  ;;  %v2475_v11 = vmax.f32 %v2459_v37, 0.0  ;;  %v2462_v26 = vadd.f32 %v3184_v57, %v2440_v63  ;;  %v2443_v20 = vmul.f32 %v2426_v38, %v2418_v17 }
 0x340   :  { %v2476_v6 = vmax.f32 %v2460_v49, 0.0  ;;  %v2477_v5 = vmax.f32 %v2461_v31, 0.0  ;;  %v2479_v27 = vmax.f32 %v2463_v44, 0.0  ;;  %v2464_v7 = vadd.f32 %v3184_v57, %v2442_v3 }
 0x341   :  { %v2486_v52 = vpack.c.bf16 %v2475_v11, %v2474_v59  ;;  %v2478_v18 = vmax.f32 %v2462_v26, 0.0  ;;  %v2465_v55 = vadd.f32 %v3184_v57, %v2443_v20 }
 0x342   :  { %v2487_v12 = vpack.c.bf16 %v2477_v5, %v2476_v6  ;;  %v2480_v43 = vmax.f32 %v2464_v7, 0.0 }
 0x343   :  { %v2488_v35 = vpack.c.bf16 %v2479_v27, %v2478_v18  ;;  %v2481_v62 = vmax.f32 %v2465_v55, 0.0 }
 0x345   :  { %2629 = vmatmul.mubr.bf16.gmra.mrb[84].mxu0 %v2483_v9  ;;  %v2489_v34 = vpack.c.bf16 %v2481_v62, %v2480_v43 }
 0x346   :  { %2638 = vmatprep.mubr.bf16.mxu0 %v5819_v28 }
 0x34d   :  { %2639 = vmatmul.mubr.bf16.gmra.mrb[88].mxu0 %v2484_v33 }
 0x34e   :  { %2648 = vmatprep.mubr.bf16.mxu0 %v5819_v28 }
 0x355   :  { %2649 = vmatmul.mubr.bf16.gmra.mrb[92].mxu0 %v2485_v48 }
 0x356   :  { %2658 = vmatprep.mubr.bf16.mxu0 %v5819_v28 }
 0x35d   :  { %2659 = vmatmul.mubr.bf16.gmra.mrb[96].mxu0 %v2486_v52 }
 0x35e   :  { %2668 = vmatprep.mubr.bf16.mxu0 %v5819_v28 }
 0x365   :  { %2669 = vmatmul.mubr.bf16.gmra.mrb[100].mxu0 %v2487_v12 }
 0x366   :  { %2678 = vmatprep.mubr.bf16.mxu0 %v5819_v28 }
 0x36d   :  { %2679 = vmatmul.mubr.bf16.gmra.mrb[104].mxu0 %v2488_v35 }
 0x36e   :  { %2688 = vmatprep.mubr.bf16.mxu0 %v5819_v28 }
 0x375   :  { %2689 = vmatmul.mubr.bf16.gmra.mrb[108].mxu0 %v2489_v34 }
 0x410   :  { %v5163_v36 = vpop.f32.mrb[80].mxu0 }
 0x411   :  { %v5165_v17 = vpop.f32.mrb[81].mxu0  ;;  %v2745_v57 = vmul.f32 %v5163_v36, %v5163_v36 }
 0x412   :  { %v5167_v38 = vpop.f32.mrb[82].mxu0  ;;  %v2746_v28 = vmul.f32 %v5165_v17, %v5165_v17 }
 0x413   :  { %v2701_v53 = vadd.f32 %v5167_v38, %v5163_v36  ;;  %v2747_v19 = vmul.f32 %v5167_v38, %v5167_v38  ;;  %v5175_v1 = vpop.f32.mrb[83].mxu0 }
 0x414   :  { %v2722_v51 = vadd.f32 %v5175_v1, %v5165_v17  ;;  %v2748_v60 = vmul.f32 %v5175_v1, %v5175_v1 }
 0x415   :  { %v2777_v54 = vadd.f32 %v2747_v19, %v2745_v57 }
 0x416   :  { %v2798_v24 = vadd.f32 %v2748_v60, %v2746_v28 }
 0x418   :  { %v5183_v39 = vpop.f32.mrb[84].mxu0 }
 0x419   :  { %v2702_v13 = vadd.f32 %v2701_v53, %v5183_v39  ;;  %v2749_v46 = vmul.f32 %v5183_v39, %v5183_v39  ;;  %v5188_v25 = vpop.f32.mrb[85].mxu0 }
 0x41a   :  { %v2723_v2 = vadd.f32 %v2722_v51, %v5188_v25  ;;  %v2750_v29 = vmul.f32 %v5188_v25, %v5188_v25  ;;  %v5193_v10 = vpop.f32.mrb[86].mxu0 }
 0x41b   :  { %v2778_v21 = vadd.f32 %v2777_v54, %v2749_v46  ;;  %v2703_v4 = vadd.f32 %v2702_v13, %v5193_v10  ;;  %v2751_v9 = vmul.f32 %v5193_v10, %v5193_v10  ;;  %v5198_v33 = vpop.f32.mrb[87].mxu0 }
 0x41c   :  { %v2799_v16 = vadd.f32 %v2798_v24, %v2750_v29  ;;  %v2724_v32 = vadd.f32 %v2723_v2, %v5198_v33  ;;  %v2752_v48 = vmul.f32 %v5198_v33, %v5198_v33 }
 0x41d   :  { %v2779_v61 = vadd.f32 %v2778_v21, %v2751_v9 }
 0x41e   :  { %v2800_v37 = vadd.f32 %v2799_v16, %v2752_v48 }
 0x420   :  { %v5203_v63 = vpop.f32.mrb[88].mxu0 }
 0x421   :  { %v2704_v49 = vadd.f32 %v2703_v4, %v5203_v63  ;;  %v2753_v31 = vmul.f32 %v5203_v63, %v5203_v63  ;;  %v5208_v44 = vpop.f32.mrb[89].mxu0 }
 0x422   :  { %v2725_v3 = vadd.f32 %v2724_v32, %v5208_v44  ;;  %v2754_v59 = vmul.f32 %v5208_v44, %v5208_v44  ;;  %v5213_v11 = vpop.f32.mrb[90].mxu0 }
 0x423   :  { %v2780_v26 = vadd.f32 %v2779_v61, %v2753_v31  ;;  %v2705_v20 = vadd.f32 %v2704_v49, %v5213_v11  ;;  %v2755_v6 = vmul.f32 %v5213_v11, %v5213_v11  ;;  %v5218_v5 = vpop.f32.mrb[91].mxu0 }
 0x424   :  { %v2801_v27 = vadd.f32 %v2800_v37, %v2754_v59  ;;  %v2726_v7 = vadd.f32 %v2725_v3, %v5218_v5  ;;  %v2756_v52 = vmul.f32 %v5218_v5, %v5218_v5 }
 0x425   :  { %v2781_v18 = vadd.f32 %v2780_v26, %v2755_v6 }
 0x426   :  { %v2802_v55 = vadd.f32 %v2801_v27, %v2756_v52 }
 0x428   :  { %v5223_v12 = vpop.f32.mrb[92].mxu0 }
 0x429   :  { %v2706_v43 = vadd.f32 %v2705_v20, %v5223_v12  ;;  %v2757_v35 = vmul.f32 %v5223_v12, %v5223_v12  ;;  %v5228_v62 = vpop.f32.mrb[93].mxu0 }
 0x42a   :  { %v2727_v34 = vadd.f32 %v2726_v7, %v5228_v62  ;;  %v2758_v57 = vmul.f32 %v5228_v62, %v5228_v62  ;;  %v5233_v53 = vpop.f32.mrb[94].mxu0 }
 0x42b   :  { %v2782_v19 = vadd.f32 %v2781_v18, %v2757_v35  ;;  %v2707_v28 = vadd.f32 %v2706_v43, %v5233_v53  ;;  %v2759_v51 = vmul.f32 %v5233_v53, %v5233_v53  ;;  %v5238_v60 = vpop.f32.mrb[95].mxu0 }
 0x42c   :  { %v2803_v54 = vadd.f32 %v2802_v55, %v2758_v57  ;;  %v2728_v24 = vadd.f32 %v2727_v34, %v5238_v60  ;;  %v2760_v13 = vmul.f32 %v5238_v60, %v5238_v60 }
 0x42d   :  { %v2783_v46 = vadd.f32 %v2782_v19, %v2759_v51 }
 0x42e   :  { %v2804_v2 = vadd.f32 %v2803_v54, %v2760_v13 }
 0x430   :  { %v5243_v29 = vpop.f32.mrb[96].mxu0 }
 0x431   :  { %v2708_v21 = vadd.f32 %v2707_v28, %v5243_v29  ;;  %v2761_v4 = vmul.f32 %v5243_v29, %v5243_v29  ;;  %v5248_v9 = vpop.f32.mrb[97].mxu0 }
 0x432   :  { %v2729_v16 = vadd.f32 %v2728_v24, %v5248_v9  ;;  %v2762_v32 = vmul.f32 %v5248_v9, %v5248_v9  ;;  %v5253_v48 = vpop.f32.mrb[98].mxu0 }
 0x433   :  { %v2784_v61 = vadd.f32 %v2783_v46, %v2761_v4  ;;  %v2709_v37 = vadd.f32 %v2708_v21, %v5253_v48  ;;  %v2763_v49 = vmul.f32 %v5253_v48, %v5253_v48  ;;  %v5258_v31 = vpop.f32.mrb[99].mxu0 }
 0x434   :  { %v2805_v3 = vadd.f32 %v2804_v2, %v2762_v32  ;;  %v2730_v59 = vadd.f32 %v2729_v16, %v5258_v31  ;;  %v2764_v26 = vmul.f32 %v5258_v31, %v5258_v31 }
 0x435   :  { %v2785_v20 = vadd.f32 %v2784_v61, %v2763_v49 }
 0x436   :  { %v2806_v6 = vadd.f32 %v2805_v3, %v2764_v26 }
 0x438   :  { %v5263_v27 = vpop.f32.mrb[100].mxu0 }
 0x439   :  { %v2710_v7 = vadd.f32 %v2709_v37, %v5263_v27  ;;  %v2765_v52 = vmul.f32 %v5263_v27, %v5263_v27  ;;  %v5268_v18 = vpop.f32.mrb[101].mxu0 }
 0x43a   :  { %v2731_v55 = vadd.f32 %v2730_v59, %v5268_v18  ;;  %v2766_v43 = vmul.f32 %v5268_v18, %v5268_v18  ;;  %v5273_v35 = vpop.f32.mrb[102].mxu0 }
 0x43b   :  { %v2786_v34 = vadd.f32 %v2785_v20, %v2765_v52  ;;  %v2711_v57 = vadd.f32 %v2710_v7, %v5273_v35  ;;  %v2767_v19 = vmul.f32 %v5273_v35, %v5273_v35  ;;  %v5278_v28 = vpop.f32.mrb[103].mxu0 }
 0x43c   :  { %v2807_v51 = vadd.f32 %v2806_v6, %v2766_v43  ;;  %v2732_v54 = vadd.f32 %v2731_v55, %v5278_v28  ;;  %v2768_v24 = vmul.f32 %v5278_v28, %v5278_v28 }
 0x43d   :  { %v2787_v13 = vadd.f32 %v2786_v34, %v2767_v19 }
 0x43e   :  { %v2808_v46 = vadd.f32 %v2807_v51, %v2768_v24 }
 0x440   :  { %v5283_v2 = vpop.f32.mrb[104].mxu0 }
 0x441   :  { %v2712_v21 = vadd.f32 %v2711_v57, %v5283_v2  ;;  %v2769_v4 = vmul.f32 %v5283_v2, %v5283_v2  ;;  %v5288_v16 = vpop.f32.mrb[105].mxu0 }
 0x442   :  { %v2733_v32 = vadd.f32 %v2732_v54, %v5288_v16  ;;  %v2770_v61 = vmul.f32 %v5288_v16, %v5288_v16  ;;  %v5293_v37 = vpop.f32.mrb[106].mxu0 }
 0x443   :  { %v2788_v49 = vadd.f32 %v2787_v13, %v2769_v4  ;;  %v2713_v3 = vadd.f32 %v2712_v21, %v5293_v37  ;;  %v2771_v59 = vmul.f32 %v5293_v37, %v5293_v37  ;;  %v5298_v26 = vpop.f32.mrb[107].mxu0 }
 0x444   :  { %v2809_v20 = vadd.f32 %v2808_v46, %v2770_v61  ;;  %v2734_v6 = vadd.f32 %v2733_v32, %v5298_v26  ;;  %v2772_v7 = vmul.f32 %v5298_v26, %v5298_v26 }
 0x445   :  { %v2789_v52 = vadd.f32 %v2788_v49, %v2771_v59 }
 0x446   :  { %v2810_v55 = vadd.f32 %v2809_v20, %v2772_v7 }
 0x448   :  { %v5303_v43 = vpop.f32.mrb[108].mxu0 }
 0x449   :  { %v2714_v34 = vadd.f32 %v2713_v3, %v5303_v43  ;;  %v2773_v57 = vmul.f32 %v5303_v43, %v5303_v43  ;;  %v5308_v19 = vpop.f32.mrb[109].mxu0 }
 0x44a   :  { %v2735_v51 = vadd.f32 %v2734_v6, %v5308_v19  ;;  %v2774_v54 = vmul.f32 %v5308_v19, %v5308_v19  ;;  %v5313_v24 = vpop.f32.mrb[110].mxu0 }
 0x44b   :  { %v2790_v13 = vadd.f32 %v2789_v52, %v2773_v57  ;;  %v2715_v46 = vadd.f32 %v2714_v34, %v5313_v24  ;;  %v2775_v21 = vmul.f32 %v5313_v24, %v5313_v24  ;;  %v5318_v4 = vpop.f32.mrb[111].mxu0 }
 0x44c   :  { %v2811_v32 = vadd.f32 %v2810_v55, %v2774_v54  ;;  %v2736_v61 = vadd.f32 %v2735_v51, %v5318_v4  ;;  %v2776_v49 = vmul.f32 %v5318_v4, %v5318_v4 }
 0x44d   :  { %v2716_v3 = vrot.slane %v2715_v46, 4  ;;  %v2791_v59 = vadd.f32 %v2790_v13, %v2775_v21 }
 0x44e   :  { %v2737_v20 = vrot.slane %v2736_v61, 4  ;;  %v2812_v6 = vadd.f32 %v2811_v32, %v2776_v49 }
 0x44f   :  { %v2717_v7 = vadd.f32 %v2716_v3, %v2715_v46  ;;  %v2792_v14 = vrot.slane %v2791_v59, 4 }
 0x450   :  { %v2738_v52 = vadd.f32 %v2737_v20, %v2736_v61  ;;  %v2813_v57 = vrot.slane %v2812_v6, 4 }
 0x451   :  { %v2718_v34 = vrot.slane %v2717_v7, 2  ;;  %v2793_v0 = vadd.f32 %v2792_v14, %v2791_v59 }
 0x452   :  { %v2739_v56 = vrot.slane %v2738_v52, 2  ;;  %v2814_v50 = vadd.f32 %v2813_v57, %v2812_v6  ;;  %v5824_v6 = vld [vmem:[#allocation40_spill] sm:$0xff] }
 0x453   :  { %v2719_v47 = vadd.f32 %v2718_v34, %v2717_v7  ;;  %v2794_v23 = vrot.slane %v2793_v0, 2 }
 0x454   :  { %v2740_v55 = vadd.f32 %v2739_v56, %v2738_v52  ;;  %v2815_v54 = vrot.slane %v2814_v50, 2  ;;  %v5823_v52 = vld [vmem:[#allocation39_spill] sm:$0xff] }
 0x455   :  { %v2720_v51 = vrot.slane %v2719_v47, 1  ;;  %v2795_v30 = vadd.f32 %v2794_v23, %v2793_v0 }
 0x456   :  { %v2741_v58 = vrot.slane %v2740_v55, 1  ;;  %v2816_v22 = vadd.f32 %v2815_v54, %v2814_v50 }
 0x457   :  { %v2721_v8 = vadd.f32 %v2720_v51, %v2719_v47  ;;  %v2796_v13 = vrot.slane %v2795_v30, 1 }
 0x458   :  { %v2742_v21 = vadd.f32 %v2741_v58, %v2740_v55  ;;  %v2817_v32 = vrot.slane %v2816_v22, 1 }
 0x459   :  { %v5323_v46 = vmul.f32 0.0078125, %v2721_v8  ;;  %v2797_v61 = vadd.f32 %v2796_v13, %v2795_v30 }
 0x45a   :  { %v5325_v49 = vmul.f32 0.0078125, %v2742_v21  ;;  %v2818_v14 = vadd.f32 %v2817_v32, %v2816_v22 }
 0x45b   :  { %v2819_v3 = vmul.f32 0.0078125, %v2797_v61  ;;  %v2821_v59 = vmul.f32 %v5323_v46, %v5323_v46 }
 0x45c   :  { %v2820_v13 = vmul.f32 0.0078125, %v2818_v14  ;;  %v2822_v21 = vmul.f32 %v5325_v49, %v5325_v49  ;;  %v2828_v32 = vsub.f32 %v5165_v17, %v5325_v49  ;;  %v2830_v61 = vsub.f32 %v5175_v1, %v5325_v49 }
 0x45d   :  { %v2823_v47 = vsub.f32 %v2819_v3, %v2821_v59  ;;  %v2832_v59 = vsub.f32 %v5188_v25, %v5325_v49  ;;  %v2836_v51 = vsub.f32 %v5208_v44, %v5325_v49  ;;  %v2838_v54 = vsub.f32 %v5218_v5, %v5325_v49 }
 0x45e   :  { %v2824_v14 = vsub.f32 %v2820_v13, %v2822_v21  ;;  %v2840_v17 = vsub.f32 %v5228_v62, %v5325_v49  ;;  %v2842_v1 = vsub.f32 %v5238_v60, %v5325_v49  ;;  %v2846_v25 = vsub.f32 %v5258_v31, %v5325_v49  ;;  %v2700_v62 = vld [vmem:[%s5648_s9] sm:$0x3]  ;;  %v5821_v60 = vld [vmem:[#allocation35_spill] sm:$0xff] }
 0x45f   :  { %v2825_v34 = vmax.f32 %v2823_v47, 0.0  ;;  %v2834_v47 = vsub.f32 %v5198_v33, %v5325_v49  ;;  %v2848_v33 = vsub.f32 %v5268_v18, %v5325_v49  ;;  %v2850_v13 = vsub.f32 %v5278_v28, %v5325_v49  ;;  %v3690_v28 = vld [vmem:[%s5650_s11] sm:$0x3] }
 0x460   :  { %v2826_v44 = vmax.f32 %v2824_v14, 0.0  ;;  %v2852_v5 = vsub.f32 %v5288_v16, %v5325_v49  ;;  %v811_v16 = vrot.slane %v3690_v28, %v5820_v41 }
 0x461   :  { %v2859_v3 = vadd.f32 1e-05, %v2825_v34  ;;  %v2844_v34 = vsub.f32 %v5248_v9, %v5325_v49 }
 0x462   :  { %v2860_v31 = vadd.f32 1e-05, %v2826_v44  ;;  %v5407_v44 = vrot.slane %v2700_v62, %v5820_v41  ;;  %v5414_v28 = vadd.f32 %v811_v16, %v4595_v40  ;;  %v5417_v9 = vadd.f32 %v811_v16, %v4604_v45  ;;  %v5826_v40 = vld [vmem:[#allocation42_spill] sm:$0xff]  ;;  %v5827_v45 = vld [vmem:[#allocation43_spill] sm:$0xff] }
 0x463   :  { %3685 = vrsqrt.f32 %v2859_v3  ;;  %v2699_v3 = vld [vmem:[%s5647_s8] sm:$0x3]  ;;  %v5423_v57 = vadd.f32 %v811_v16, %v4624_v15  ;;  %v5426_v7 = vadd.f32 %v811_v16, %v5823_v52  ;;  %v5435_v0 = vadd.f32 %v811_v16, %v5826_v40  ;;  %v5830_v52 = vld [vmem:[#allocation46_spill] sm:$0xff]  ;;  %v5833_v40 = vld [vmem:[#allocation27_spill] sm:$0xff]  ;;  %s3822_s8 = smov [#allocation12]  }
 0x464   :  { %3687 = vrsqrt.f32 %v2860_v31  ;;  %v5438_v50 = vadd.f32 %v811_v16, %v5827_v45  ;;  %v5829_v15 = vld [vmem:[#allocation45_spill] sm:$0xff]  ;;  %v5447_v8 = vadd.f32 %v811_v16, %v5830_v52  ;;  %v5455_v58 = vadd.f32 %v811_v16, %v5833_v40  ;;  %v5835_v45 = vld [vmem:[#allocation18_spill] sm:$0xff]  ;;  %s3069_s9 = sshll.u32 %s3822_s8, 4  ;;  %s5616_s9 = int_to_ptr.vmem [resolvable:$true] %s3069_s9 }
 0x465   :  { %v5444_v30 = vadd.f32 %v811_v16, %v5829_v15  ;;  %v5458_v23 = vadd.f32 %v811_v16, %v5835_v45  ;;  %v5837_v15 = vsub.f32 %v5163_v36, %v5323_v46  ;;  %v5840_v45 = vsub.f32 %v5193_v10, %v5323_v46  ;;  %s3779_s11 = scalar_lea.vmem %s5616_s9, 4096  ;;  %p3784_p5 = scmp.lt.s32.totalorder %s5616_s9, %s5616_s9 }
 0x466   :  { %5831 = vst [vmem:[#allocation34_spill] sm:$0xff] %v5447_v8  ;;  %5834 = vst [vmem:[#allocation33_spill] sm:$0xff] %v5455_v58  ;;  %v5841_v36 = vsub.f32 %v5203_v63, %v5323_v46  ;;  %v5844_v10 = vsub.f32 %v5233_v53, %v5323_v46  ;;  %v5845_v63 = vsub.f32 %v5243_v29, %v5323_v46  ;;  %p3780_p4 = scmp.ne.s32.totalorder %s5616_s9, %s3779_s11  ;;  %p3785_p6 = scmp.lt.s32.totalorder %s3779_s11, %s3779_s11 }
 0x467   :  { %v5848_v53 = vsub.f32 %v5273_v35, %v5323_v46  ;;  %v5849_v29 = vsub.f32 %v5283_v2, %v5323_v46  ;;  %v5853_v35 = vsub.f32 %v5308_v19, %v5325_v49  ;;  %v5854_v2 = vsub.f32 %v5313_v24, %v5323_v46 }
 0x468   :  { %p3786_p7 = por %p3785_p6, %p3784_p5 }
 0x46a   :  { %p3787_p8 = pnand %p3786_p7, %p3780_p4 }
 0x46d   :  { %v3686_v18 = vpop.eup %3685 }
 0x46e   :  { %v3688_v21 = vpop.eup %3687 }
 0x46f   :  { %v2865_v14 = vcombine.low %v3686_v18, %v3688_v21  ;;  %v5822_v18 = vld [vmem:[#allocation37_spill] sm:$0xff] }
 0x470   :  { %v5411_v21 = vrot.slane %v2700_v62, %v5822_v18 }
 0x471   :  { %v2872_v55 = vrot.slane %v2865_v14, %v5821_v60  ;;  %v5420_v14 = vadd.f32 %v811_v16, %v4613_v42  ;;  %v5828_v42 = vld [vmem:[#allocation44_spill] sm:$0xff] }
 0x472   :  { %v5441_v22 = vadd.f32 %v811_v16, %v5828_v42  ;;  %v5836_v42 = vld [vmem:[#allocation29_spill] sm:$0xff] }
 0x473   :  { %v2879_v31 = vrot.slane %v2872_v55, %v5821_v60  ;;  %v5429_v55 = vadd.f32 %v811_v16, %v5824_v6  ;;  %v5825_v60 = vld [vmem:[#allocation41_spill] sm:$0xff]  ;;  %v5461_v56 = vadd.f32 %v811_v16, %v5836_v42 }
 0x474   :  { %v5432_v20 = vadd.f32 %v811_v16, %v5825_v60 }
 0x475   :  { %v2881_v62 = vmul.f32 %v2879_v31, %v2699_v3  ;;  %v5832_v31 = vld [vmem:[#allocation17_spill] sm:$0xff] }
 0x476   :  { %v5452_v60 = vadd.f32 %v811_v16, %v5832_v31  ;;  %v5839_v31 = vsub.f32 %v5183_v39, %v5323_v46  ;;  %v5843_v39 = vsub.f32 %v5223_v12, %v5323_v46  ;;  %v5847_v12 = vsub.f32 %v5263_v27, %v5323_v46 }
 0x477   :  { %v2886_v6 = vrot.slane %v2881_v62, %v5820_v41  ;;  %v2890_v3 = vrot.slane %v2881_v62, %v5822_v18  ;;  %v5838_v41 = vsub.f32 %v5167_v38, %v5323_v46  ;;  %v5842_v38 = vsub.f32 %v5213_v11, %v5323_v46 }
 0x478   :  { %v5846_v11 = vsub.f32 %v5253_v48, %v5323_v46  ;;  %v5850_v48 = vsub.f32 %v5293_v37, %v5323_v46  ;;  %v5855_v37 = vsub.f32 %v5318_v4, %v5325_v49 }
 0x479   :  { %v2893_v52 = vmul.f32 %v2886_v6, %v5837_v15  ;;  %v2894_v8 = vmul.f32 %v2890_v3, %v2828_v32  ;;  %v2895_v18 = vmul.f32 %v2886_v6, %v5838_v41  ;;  %v2896_v62 = vmul.f32 %v2890_v3, %v2830_v61 }
 0x47a   :  { %v2897_v40 = vmul.f32 %v2886_v6, %v5839_v31  ;;  %v2898_v58 = vmul.f32 %v2890_v3, %v2832_v59  ;;  %v2899_v16 = vmul.f32 %v2886_v6, %v5840_v45  ;;  %v2900_v42 = vmul.f32 %v2890_v3, %v2834_v47 }
 0x47b   :  { %v2901_v15 = vmul.f32 %v2886_v6, %v5841_v36  ;;  %v2902_v32 = vmul.f32 %v2890_v3, %v2836_v51  ;;  %v2903_v41 = vmul.f32 %v2886_v6, %v5842_v38  ;;  %v2904_v61 = vmul.f32 %v2890_v3, %v2838_v54 }
 0x47c   :  { %v2905_v31 = vmul.f32 %v2886_v6, %v5843_v39  ;;  %v2906_v59 = vmul.f32 %v2890_v3, %v2840_v17  ;;  %v2907_v45 = vmul.f32 %v2886_v6, %v5844_v10  ;;  %v2908_v47 = vmul.f32 %v2890_v3, %v2842_v1 }
 0x47d   :  { %v2909_v36 = vmul.f32 %v2886_v6, %v5845_v63  ;;  %v2910_v51 = vmul.f32 %v2890_v3, %v2844_v34  ;;  %v2911_v38 = vmul.f32 %v2886_v6, %v5846_v11  ;;  %v2912_v54 = vmul.f32 %v2890_v3, %v2846_v25 }
 0x47e   :  { %v2913_v39 = vmul.f32 %v2886_v6, %v5847_v12  ;;  %v2914_v17 = vmul.f32 %v2890_v3, %v2848_v33  ;;  %v2915_v10 = vmul.f32 %v2886_v6, %v5848_v53  ;;  %v2916_v1 = vmul.f32 %v2890_v3, %v2850_v13 }
 0x47f   :  { %v2917_v63 = vmul.f32 %v2886_v6, %v5849_v29  ;;  %v2918_v34 = vmul.f32 %v2890_v3, %v2852_v5  ;;  %v2919_v11 = vmul.f32 %v2886_v6, %v5850_v48  ;;  %v5851_v25 = vsub.f32 %v5298_v26, %v5325_v49 }
 0x480   :  { %v5852_v33 = vsub.f32 %v5303_v43, %v5323_v46  ;;  %v2922_v13 = vmul.f32 %v2890_v3, %v5853_v35  ;;  %v2923_v5 = vmul.f32 %v2886_v6, %v5854_v2  ;;  %v2924_v53 = vmul.f32 %v2890_v3, %v5855_v37  ;;  %v5859_v35 = vld [vmem:[#allocation28_spill] sm:$0xff]  ;;  %v5860_v2 = vld [vmem:[#allocation47_spill] sm:$0xff] }
 0x481   :  { %v2920_v27 = vmul.f32 %v2890_v3, %v5851_v25  ;;  %v2936_v29 = vadd.f32 %v5407_v44, %v2893_v52  ;;  %v2937_v26 = vadd.f32 %v5411_v21, %v2894_v8  ;;  %v2938_v48 = vadd.f32 %v5407_v44, %v2895_v18 }
 0x482   :  { %v2921_v12 = vmul.f32 %v2886_v6, %v5852_v33  ;;  %v2939_v43 = vadd.f32 %v5411_v21, %v2896_v62  ;;  %v2940_v25 = vadd.f32 %v5407_v44, %v2897_v40  ;;  %v2941_v19 = vadd.f32 %v5411_v21, %v2898_v58 }
 0x483   :  { %v2942_v33 = vadd.f32 %v5407_v44, %v2899_v16  ;;  %v2943_v24 = vadd.f32 %v5411_v21, %v2900_v42  ;;  %v2944_v46 = vadd.f32 %v5407_v44, %v2901_v15  ;;  %v2945_v4 = vadd.f32 %v5411_v21, %v2902_v32 }
 0x484   :  { %v2946_v49 = vadd.f32 %v5407_v44, %v2903_v41  ;;  %v2947_v8 = vadd.f32 %v5411_v21, %v2904_v61  ;;  %v2948_v6 = vadd.f32 %v5407_v44, %v2905_v31  ;;  %v2949_v3 = vadd.f32 %v5411_v21, %v2906_v59 }
 0x485   :  { %v2950_v52 = vadd.f32 %v5407_v44, %v2907_v45  ;;  %v2951_v58 = vadd.f32 %v5411_v21, %v2908_v47  ;;  %v2952_v18 = vadd.f32 %v5407_v44, %v2909_v36  ;;  %v2953_v62 = vadd.f32 %v5411_v21, %v2910_v51 }
 0x486   :  { %v2954_v40 = vadd.f32 %v5407_v44, %v2911_v38  ;;  %v2955_v16 = vadd.f32 %v5411_v21, %v2912_v54  ;;  %v2956_v42 = vadd.f32 %v5407_v44, %v2913_v39  ;;  %v2957_v15 = vadd.f32 %v5411_v21, %v2914_v17  ;;  %v5856_v39 = vld [vmem:[#allocation19_spill] sm:$0xff] }
 0x487   :  { %v2958_v32 = vadd.f32 %v5407_v44, %v2915_v10  ;;  %v2959_v41 = vadd.f32 %v5411_v21, %v2916_v1  ;;  %v2960_v61 = vadd.f32 %v5407_v44, %v2917_v63  ;;  %v2961_v31 = vadd.f32 %v5411_v21, %v2918_v34  ;;  %v5857_v1 = vld [vmem:[#allocation26_spill] sm:$0xff] }
 0x488   :  { %v2962_v59 = vadd.f32 %v5407_v44, %v2919_v11  ;;  %v2963_v45 = vadd.f32 %v5411_v21, %v2920_v27  ;;  %v2964_v47 = vadd.f32 %v5407_v44, %v2921_v12  ;;  %v2965_v36 = vadd.f32 %v5411_v21, %v2922_v13  ;;  %v5858_v11 = vld [vmem:[#allocation20_spill] sm:$0xff] }
 0x489   :  { %v2966_v51 = vadd.f32 %v5407_v44, %v2923_v5  ;;  %v2967_v38 = vadd.f32 %v5411_v21, %v2924_v53  ;;  %v2968_v54 = vadd.f32 %v2936_v29, %v5414_v28  ;;  %v2969_v17 = vadd.f32 %v2937_v26, %v5856_v39  ;;  %v5861_v5 = vld [vmem:[#allocation48_spill] sm:$0xff]  ;;  %v5862_v53 = vld [vmem:[#allocation49_spill] sm:$0xff]  ;;  %v5863_v26 = vld [vmem:[#allocation50_spill] sm:$0xff] }
 0x48a   :  { %v2970_v10 = vadd.f32 %v2938_v48, %v5417_v9  ;;  %v2971_v63 = vadd.f32 %v2939_v43, %v5857_v1  ;;  %v2972_v34 = vadd.f32 %v2940_v25, %v5420_v14  ;;  %v2973_v27 = vadd.f32 %v2941_v19, %v5858_v11  ;;  %v5864_v43 = vld [vmem:[#allocation51_spill] sm:$0xff]  ;;  %v5865_v19 = vld [vmem:[#allocation52_spill] sm:$0xff] }
 0x48b   :  { %v2974_v12 = vadd.f32 %v2942_v33, %v5423_v57  ;;  %v2975_v13 = vadd.f32 %v2943_v24, %v5859_v35  ;;  %v2976_v44 = vadd.f32 %v2944_v46, %v5426_v7  ;;  %v2977_v21 = vadd.f32 %v2945_v4, %v5860_v2  ;;  %v5866_v24 = vld [vmem:[#allocation53_spill] sm:$0xff] }
 0x48c   :  { %v2978_v28 = vadd.f32 %v2946_v49, %v5429_v55  ;;  %v2979_v37 = vadd.f32 %v2947_v8, %v5861_v5  ;;  %v2980_v9 = vadd.f32 %v2948_v6, %v5432_v20  ;;  %v2981_v29 = vadd.f32 %v2949_v3, %v5862_v53  ;;  %v5867_v20 = vld [vmem:[#allocation34_spill] sm:$0xff]  ;;  %v5869_v8 = vld [vmem:[#allocation55_spill] sm:$0xff] }
 0x48d   :  { %v2982_v14 = vadd.f32 %v2950_v52, %v5435_v0  ;;  %v2983_v48 = vadd.f32 %v2951_v58, %v5863_v26  ;;  %v2984_v57 = vadd.f32 %v2952_v18, %v5438_v50  ;;  %v2985_v25 = vadd.f32 %v2953_v62, %v5864_v43  ;;  %v5868_v0 = vld [vmem:[#allocation54_spill] sm:$0xff]  ;;  %v5872_v18 = vld [vmem:[#allocation56_spill] sm:$0xff] }
 0x48e   :  { %v2986_v7 = vadd.f32 %v2954_v40, %v5441_v22  ;;  %v2987_v33 = vadd.f32 %v2955_v16, %v5865_v19  ;;  %v5573_v55 = vadd.f32 %v2956_v42, %v5444_v30  ;;  %v5576_v46 = vadd.f32 %v2957_v15, %v5866_v24  ;;  %v5870_v22 = vld [vmem:[#allocation33_spill] sm:$0xff]  ;;  %v5871_v30 = vld [vmem:[#allocation32_spill] sm:$0xff] }
 0x48f   :  { %v5579_v4 = vadd.f32 %v2958_v32, %v5867_v20  ;;  %v5582_v49 = vadd.f32 %v2959_v41, %v5868_v0  ;;  %v5585_v50 = vadd.f32 %v2960_v61, %v5452_v60  ;;  %v5588_v6 = vadd.f32 %v2961_v31, %v5869_v8  ;;  %v5873_v60 = vld [vmem:[#allocation57_spill] sm:$0xff] }
 0x490   :  { %v5591_v3 = vadd.f32 %v2962_v59, %v5870_v22  ;;  %v5594_v52 = vadd.f32 %v2963_v45, %v5871_v30  ;;  %v5597_v58 = vadd.f32 %v2964_v47, %v5458_v23  ;;  %v5600_v62 = vadd.f32 %v2965_v36, %v5872_v18 }
 0x491   :  { %v5603_v40 = vadd.f32 %v2966_v51, %v5461_v56  ;;  %v5606_v16 = vadd.f32 %v2967_v38, %v5873_v60  ;;  %v3000_v42 = vmax.f32 %v2968_v54, 0.0  ;;  %v3001_v15 = vmax.f32 %v2969_v17, 0.0 }
 0x492   :  { %v3002_v32 = vmax.f32 %v2970_v10, 0.0  ;;  %v3003_v41 = vmax.f32 %v2971_v63, 0.0  ;;  %v3004_v61 = vmax.f32 %v2972_v34, 0.0  ;;  %v3005_v31 = vmax.f32 %v2973_v27, 0.0 }
 0x493   :  { %v3006_v59 = vmax.f32 %v2974_v12, 0.0  ;;  %v3007_v45 = vmax.f32 %v2975_v13, 0.0  ;;  %v3008_v39 = vmax.f32 %v2976_v44, 0.0  ;;  %v3009_v23 = vmax.f32 %v2977_v21, 0.0  ;;  %3032 = vst [vmem:[#allocation12] sm:$0xff] %v3000_v42  ;;  %3033 = vst [vmem:[#allocation12 + $0x8] sm:$0xff] %v3001_v15 }
 0x494   :  { %v3010_v47 = vmax.f32 %v2978_v28, 0.0  ;;  %v3011_v1 = vmax.f32 %v2979_v37, 0.0  ;;  %3034 = vst [vmem:[#allocation12 + $0x10] sm:$0xff] %v3002_v32  ;;  %3035 = vst [vmem:[#allocation12 + $0x18] sm:$0xff] %v3003_v41  ;;  %v3012_v56 = vmax.f32 %v2980_v9, 0.0  ;;  %v3013_v36 = vmax.f32 %v2981_v29, 0.0 }
 0x495   :  { %v3014_v51 = vmax.f32 %v2982_v14, 0.0  ;;  %v3015_v38 = vmax.f32 %v2983_v48, 0.0  ;;  %3036 = vst [vmem:[#allocation12 + $0x20] sm:$0xff] %v3004_v61  ;;  %3037 = vst [vmem:[#allocation12 + $0x28] sm:$0xff] %v3005_v31  ;;  %v3016_v54 = vmax.f32 %v2984_v57, 0.0  ;;  %v3017_v17 = vmax.f32 %v2985_v25, 0.0 }
 0x496   :  { %3038 = vst [vmem:[#allocation12 + $0x30] sm:$0xff] %v3006_v59  ;;  %3039 = vst [vmem:[#allocation12 + $0x38] sm:$0xff] %v3007_v45  ;;  %v3018_v10 = vmax.f32 %v2986_v7, 0.0  ;;  %v3019_v63 = vmax.f32 %v2987_v33, 0.0  ;;  %v3020_v34 = vmax.f32 %v5573_v55, 0.0  ;;  %v3021_v11 = vmax.f32 %v5576_v46, 0.0 }
 0x497   :  { %3040 = vst [vmem:[#allocation12 + $0x40] sm:$0xff] %v3008_v39  ;;  %3041 = vst [vmem:[#allocation12 + $0x48] sm:$0xff] %v3009_v23  ;;  %v3022_v27 = vmax.f32 %v5579_v4, 0.0  ;;  %v3023_v12 = vmax.f32 %v5582_v49, 0.0  ;;  %v3024_v35 = vmax.f32 %v5585_v50, 0.0  ;;  %v3025_v13 = vmax.f32 %v5588_v6, 0.0 }
 0x498   :  { %3042 = vst [vmem:[#allocation12 + $0x50] sm:$0xff] %v3010_v47  ;;  %3043 = vst [vmem:[#allocation12 + $0x58] sm:$0xff] %v3011_v1  ;;  %v3026_v44 = vmax.f32 %v5591_v3, 0.0  ;;  %v3027_v2 = vmax.f32 %v5594_v52, 0.0  ;;  %v3028_v21 = vmax.f32 %v5597_v58, 0.0  ;;  %v3029_v28 = vmax.f32 %v5600_v62, 0.0 }
 0x499   :  { %3044 = vst [vmem:[#allocation12 + $0x60] sm:$0xff] %v3012_v56  ;;  %3045 = vst [vmem:[#allocation12 + $0x68] sm:$0xff] %v3013_v36  ;;  %v3030_v5 = vmax.f32 %v5603_v40, 0.0  ;;  %v3031_v37 = vmax.f32 %v5606_v16, 0.0 }
 0x49a   :  { %3046 = vst [vmem:[#allocation12 + $0x70] sm:$0xff] %v3014_v51  ;;  %3047 = vst [vmem:[#allocation12 + $0x78] sm:$0xff] %v3015_v38 }
 0x49b   :  { %3048 = vst [vmem:[#allocation12 + $0x80] sm:$0xff] %v3016_v54  ;;  %3049 = vst [vmem:[#allocation12 + $0x88] sm:$0xff] %v3017_v17 }
 0x49c   :  { %3050 = vst [vmem:[#allocation12 + $0x90] sm:$0xff] %v3018_v10  ;;  %3051 = vst [vmem:[#allocation12 + $0x98] sm:$0xff] %v3019_v63 }
 0x49d   :  { %3052 = vst [vmem:[#allocation12 + $0xa0] sm:$0xff] %v3020_v34  ;;  %3053 = vst [vmem:[#allocation12 + $0xa8] sm:$0xff] %v3021_v11 }
 0x49e   :  { %3054 = vst [vmem:[#allocation12 + $0xb0] sm:$0xff] %v3022_v27  ;;  %3055 = vst [vmem:[#allocation12 + $0xb8] sm:$0xff] %v3023_v12 }
 0x49f   :  { %3056 = vst [vmem:[#allocation12 + $0xc0] sm:$0xff] %v3024_v35  ;;  %3057 = vst [vmem:[#allocation12 + $0xc8] sm:$0xff] %v3025_v13 }
 0x4a0   :  { %3058 = vst [vmem:[#allocation12 + $0xd0] sm:$0xff] %v3026_v44  ;;  %3059 = vst [vmem:[#allocation12 + $0xd8] sm:$0xff] %v3027_v2 }
 0x4a1   :  { %3060 = vst [vmem:[#allocation12 + $0xe0] sm:$0xff] %v3028_v21  ;;  %3061 = vst [vmem:[#allocation12 + $0xe8] sm:$0xff] %v3029_v28 }
 0x4a2   :  { %3062 = vst [vmem:[#allocation12 + $0xf0] sm:$0xff] %v3030_v5  ;;  %3063 = vst [vmem:[#allocation12 + $0xf8] sm:$0xff] %v3031_v37 }
 0x4a3   :  { %3790 = shalt.err (!%p3787_p8)
}
 0x4a4   :  { %s3791_s14 = scalar_lea.hbm %s5651_s12, 4096 }
 0x4a5   :  { %p3792_p9 = scmp.ne.s32.totalorder %s5651_s12, %s3791_s14  ;;  %p3795_p10 = scmp.lt.u32.totalorder %s3791_s14, %s5651_s12 }
 0x4a7   :  { %p3797_p11 = pnand %p3795_p10, %p3792_p9 }
 0x4a9   :  { %3800 = shalt.err (!%p3797_p11)
}
 0x4aa   :  { %s3823_s4 = smov 256   ;;  %s3824_s13 = smov 16  }
 0x4ab   :  { %3075 = dma.vmem_to_hbm [thread:$0]  %s5616_s9, 4096, %s5651_s12, [#allocation6], %s3823_s4, %s3823_s4, %s3824_s13  }
 0x4ac   :  { %3807 = dma.done.wait [#allocation6], 4096  }
 0x4ad   :  { %3808 = vsyncadd [#allocation6], 4294963200 }
 0x4ae   :  { %3079 = vsyncpa [#allocation5], 1 }
 0x4af   :  { %3080 = vsyncpa [#allocation8], 1 }
 0x4b0   :  { %3081 = vsyncpa [#allocation11], 1 }
 0x4b1   :  { %3082 = vsyncpa [#allocation6], 1 }

</bundles_post_ra>
